<compile_context>
chip_gen: v7x
topology: tpu7x:2x2x1
jax: 0.10.0
libtpu: 0.0.40
codegen_flags: <defaults>
</compile_context>

<pallas_src>
import jax
import jax.numpy as jnp
from jax.experimental import pallas as pl
from jax.experimental.pallas import tpu as pltpu


# ---------------------------------------------------------------------------
# Fused Pallas kernel
# ---------------------------------------------------------------------------
def _decode_layer_kernel(x1_ref, x2p_ref, wup_ref, bup_ref,
                         w1u_ref, w1s_ref, b1_ref, g1_ref, bb1_ref,
                         w2_ref, b2_ref, g2_ref, bb2_ref,
                         p_ref, pt_ref,
                         out_ref, sa_ref, sb_ref):
    n, hp, wp, cup = sa_ref.shape          # cup = 4*out_ch packed channels
    hc, wc = hp - 2, wp - 2                # coarse spatial extent (= H1, W1)
    m = n * hc * wc                        # number of coarse positions
    inv_cnt = 1.0 / float(4 * m)           # fine elements per channel = N*2H*2W
    eps = 1e-5

    def conv3x3_taps(acc, src_ref, w_ref):
        # 3x3 pad=1 conv as 9 accumulated MXU matmuls over shifted views of a
        # zero-padded VMEM scratch (in the parity-packed domain).
        cin = src_ref.shape[-1]
        for u in range(3):
            for v in range(3):
                a = src_ref[:, u:u + hc, v:v + wc, :].reshape(m, cin)
                acc = acc + jnp.dot(a.astype(jnp.bfloat16), w_ref[u * 3 + v],
                                    preferred_element_type=jnp.float32)
        return acc

    def bn_relu(acc, g_ref, beta_ref):
        # Training-mode BatchNorm2d (biased variance) per *fine* channel + ReLU,
        # fused as the conv epilogue; all statistics in f32.
        colsum = jnp.sum(acc, axis=0, keepdims=True)                  # (1, 4*out_ch)
        mean_f = jnp.dot(colsum, p_ref[...]) * inv_cnt                # (1, out_ch)
        cen = acc - jnp.dot(mean_f, pt_ref[...])
        var_f = jnp.dot(jnp.sum(cen * cen, axis=0, keepdims=True),
                        p_ref[...]) * inv_cnt                         # (1, out_ch)
        scale_f = g_ref[...] * jax.lax.rsqrt(var_f + eps)             # (1, out_ch)
        y = cen * jnp.dot(scale_f, pt_ref[...]) + jnp.dot(beta_ref[...], pt_ref[...])
        return jnp.maximum(y, 0.0)

    # -- ConvTranspose2d(k=2, s=2): one matmul in the space-to-depth domain -------
    up = (jnp.dot(x1_ref[...], wup_ref[...], preferred_element_type=jnp.float32)
          + bup_ref[...])                                             # (m, 4*out_ch)

    # -- stage conv1 inputs in zero-padded VMEM scratches (concat never built) ----
    sa_ref[...] = jnp.zeros(sa_ref.shape, sa_ref.dtype)
    sb_ref[...] = jnp.zeros(sb_ref.shape, sb_ref.dtype)
    sa_ref[:, 1:hc + 1, 1:wc + 1, :] = up.reshape(n, hc, wc, cup)
    sb_ref[:, 1:hc + 1, 1:wc + 1, :] = x2p_ref[...]

    # -- conv1 (3x3, pad=1): up-block + skip-block accumulated matmuls ------------
    acc1 = b1_ref[...] + jnp.zeros((m, cup), jnp.float32)
    acc1 = conv3x3_taps(acc1, sa_ref, w1u_ref)
    acc1 = conv3x3_taps(acc1, sb_ref, w1s_ref)
    y1 = bn_relu(acc1, g1_ref, bb1_ref)

    # -- conv2 (3x3, pad=1): reuse sa scratch (border ring is still zero) ---------
    sa_ref[:, 1:hc + 1, 1:wc + 1, :] = y1.reshape(n, hc, wc, cup)
    acc2 = b2_ref[...] + jnp.zeros((m, cup), jnp.float32)
    acc2 = conv3x3_taps(acc2, sa_ref, w2_ref)
    y2 = bn_relu(acc2, g2_ref, bb2_ref)

    out_ref[...] = y2                       # single small HBM writeback


# ---------------------------------------------------------------------------
# Weight / layout packing helpers (tiny, trace-time)
# ---------------------------------------------------------------------------
def _pack_conv3x3(w_fine):
    """Pack a fine 3x3 (stride 1, pad 1) conv weight (Cout, Cin, 3, 3) into the
    space-to-depth (parity) domain: returns (9, 4*Cin, 4*Cout) such that the fine
    conv equals a coarse 3x3 conv over parity-packed tensors.
    Packing order for channels is (row parity a, col parity b, channel c)."""
    cout, cin = w_fine.shape[0], w_fine.shape[1]
    wp = jnp.zeros((9, 4 * cin, 4 * cout), w_fine.dtype)
    for a in range(2):
        for b in range(2):
            ko0 = (2 * a + b) * cout
            for kh in range(3):
                for kw in range(3):
                    pa = (a + kh - 1) % 2
                    pb = (b + kw - 1) % 2
                    u = 1 + (a + kh - 1) // 2
                    v = 1 + (b + kw - 1) // 2
                    ki0 = (2 * pa + pb) * cin
                    blk = jnp.transpose(w_fine[:, :, kh, kw])   # (Cin, Cout)
                    wp = wp.at[u * 3 + v, ki0:ki0 + cin, ko0:ko0 + cout].set(blk)
    return wp


def _full_spec(shape):
    nd = len(shape)
    return pl.BlockSpec(tuple(shape), lambda i, _nd=nd: (0,) * _nd)


# ---------------------------------------------------------------------------
# Forward pass (PyTorch-facing NCHW in / NCHW out)
# ---------------------------------------------------------------------------
def decode_layer_forward(params, input1_nchw, input2_nchw):
    n, in_ch, h1, w1 = input1_nchw.shape
    mid_ch = input2_nchw.shape[1]
    out_ch = params["up_w"].shape[1]
    m = n * h1 * w1
    cup = 4 * out_ch
    cskip = 4 * mid_ch

    # ---- input layout prep (single tiny pass; everything after stays in VMEM) ---
    x1 = (jnp.transpose(input1_nchw, (0, 2, 3, 1))
          .reshape(m, in_ch).astype(jnp.bfloat16))
    x2 = jnp.transpose(input2_nchw, (0, 2, 3, 1))                     # (n, 2H, 2W, mid)
    x2p = (x2.reshape(n, h1, 2, w1, 2, mid_ch)
             .transpose(0, 1, 3, 2, 4, 5)
             .reshape(n, h1, w1, cskip).astype(jnp.float32))          # space-to-depth

    # ---- weight packing (tiny, static) ------------------------------------------
    wup = (jnp.transpose(params["up_w"], (0, 2, 3, 1))
           .reshape(in_ch, cup).astype(jnp.bfloat16))
    bup = jnp.tile(params["up_b"], 4).reshape(1, cup).astype(jnp.float32)

    w1u = _pack_conv3x3(params["c1_w"][:, :out_ch]).astype(jnp.bfloat16)   # (9, 4oc, 4oc)
    w1s = _pack_conv3x3(params["c1_w"][:, out_ch:]).astype(jnp.bfloat16)   # (9, 4mid, 4oc)
    b1p = jnp.tile(params["c1_b"], 4).reshape(1, cup).astype(jnp.float32)
    w2p = _pack_conv3x3(params["c2_w"]).astype(jnp.bfloat16)               # (9, 4oc, 4oc)
    b2p = jnp.tile(params["c2_b"], 4).reshape(1, cup).astype(jnp.float32)

    g1 = params["bn1_g"].reshape(1, out_ch).astype(jnp.float32)
    bb1 = params["bn1_b"].reshape(1, out_ch).astype(jnp.float32)
    g2 = params["bn2_g"].reshape(1, out_ch).astype(jnp.float32)
    bb2 = params["bn2_b"].reshape(1, out_ch).astype(jnp.float32)

    # packed-channel <-> fine-channel reduction / broadcast matrices
    p_mat = jnp.tile(jnp.eye(out_ch, dtype=jnp.float32), (4, 1))      # (4oc, oc)
    pt_mat = p_mat.T                                                  # (oc, 4oc)

    operands = (x1, x2p, wup, bup, w1u, w1s, b1p, g1, bb1,
                w2p, b2p, g2, bb2, p_mat, pt_mat)

    flops = (2 * m * in_ch * cup
             + 9 * 2 * m * cup * cup          # conv1 up block
             + 9 * 2 * m * cskip * cup        # conv1 skip block
             + 9 * 2 * m * cup * cup)         # conv2
    bytes_accessed = (m * in_ch * 2 + m * cskip * 4 + m * cup * 4
                      + in_ch * cup * 2 + 9 * cup * cup * 4 + 9 * cskip * cup * 2
                      + 16 * cup)

    out = pl.pallas_call(
        _decode_layer_kernel,
        out_shape=jax.ShapeDtypeStruct((m, cup), jnp.float32),
        grid=(1,),
        in_specs=[_full_spec(op.shape) for op in operands],
        out_specs=_full_spec((m, cup)),
        scratch_shapes=[
            pltpu.VMEM((n, h1 + 2, w1 + 2, cup), jnp.float32),    # up / conv2 input
            pltpu.VMEM((n, h1 + 2, w1 + 2, cskip), jnp.float32),  # skip connection
        ],
        compiler_params=pltpu.CompilerParams(dimension_semantics=("arbitrary",)),
        cost_estimate=pl.CostEstimate(flops=flops, transcendentals=8 * out_ch,
                                      bytes_accessed=bytes_accessed),
    )(*operands)

    # depth-to-space + NCHW for the PyTorch-facing layout (one tiny output pass)
    out = out.reshape(n, h1, w1, 2, 2, out_ch)
    out = jnp.transpose(out, (0, 5, 1, 3, 2, 4))
    return out.reshape(n, out_ch, 2 * h1, 2 * w1)


# ---------------------------------------------------------------------------
# Parameters & pure-JAX reference (for a loose numerical self-check)
# ---------------------------------------------------------------------------
def init_params(key, in_ch, mid_ch, out_ch):
    ks = jax.random.split(key, 6)
    return {
        "up_w": 0.1 * jax.random.normal(ks[0], (in_ch, out_ch, 2, 2), jnp.float32),
        "up_b": 0.1 * jax.random.normal(ks[1], (out_ch,), jnp.float32),
        "c1_w": 0.1 * jax.random.normal(ks[2], (out_ch, out_ch + mid_ch, 3, 3), jnp.float32),
        "c1_b": 0.1 * jax.random.normal(ks[3], (out_ch,), jnp.float32),
        "bn1_g": jnp.ones((out_ch,), jnp.float32),
        "bn1_b": jnp.zeros((out_ch,), jnp.float32),
        "c2_w": 0.1 * jax.random.normal(ks[4], (out_ch, out_ch, 3, 3), jnp.float32),
        "c2_b": 0.1 * jax.random.normal(ks[5], (out_ch,), jnp.float32),
        "bn2_g": jnp.ones((out_ch,), jnp.float32),
        "bn2_b": jnp.zeros((out_ch,), jnp.float32),
    }


def _reference_forward(params, input1, input2, eps=1e-5):
    n, _, h1, w1 = input1.shape
    out_ch = params["up_w"].shape[1]
    hi = jax.lax.Precision.HIGHEST
    t = jnp.einsum("ncij,cokl->noikjl", input1, params["up_w"], precision=hi)
    up = t.reshape(n, out_ch, 2 * h1, 2 * w1) + params["up_b"].reshape(1, -1, 1, 1)
    x = jnp.concatenate([up, input2], axis=1)

    def conv_bn_relu(x, w, b, g, beta):
        y = jax.lax.conv_general_dilated(
            x, w, window_strides=(1, 1), padding=((1, 1), (1, 1)),
            dimension_numbers=("NCHW", "OIHW", "NCHW"), precision=hi)
        y = y + b.reshape(1, -1, 1, 1)
        mean = y.mean(axis=(0, 2, 3), keepdims=True)
        var = y.var(axis=(0, 2, 3), keepdims=True)
        y = (y - mean) * (g.reshape(1, -1, 1, 1) * jax.lax.rsqrt(var + eps))
        y = y + beta.reshape(1, -1, 1, 1)
        return jnp.maximum(y, 0.0)

    x = conv_bn_relu(x, params["c1_w"], params["c1_b"], params["bn1_g"], params["bn1_b"])
    x = conv_bn_relu(x, params["c2_w"], params["c2_b"], params["bn2_g"], params["bn2_b"])
    return x


if __name__ == "__main__":
    in_ch, mid_ch, out_ch = 8, 4, 8
    n, h1, w1 = 2, 8, 8                       # input1 spatial; skip is 2x resolution

    key = jax.random.PRNGKey(0)
    k1, k2, kp = jax.random.split(key, 3)
    input1 = jax.random.normal(k1, (n, in_ch, h1, w1), jnp.float32)            # NCHW
    input2 = jax.random.normal(k2, (n, mid_ch, 2 * h1, 2 * w1), jnp.float32)   # NCHW
    params = init_params(kp, in_ch, mid_ch, out_ch)

    out = jax.jit(decode_layer_forward)(params, input1, input2)
    out = jax.block_until_ready(out)
    assert out.shape == (n, out_ch, 2 * h1, 2 * w1), out.shape
    assert bool(jnp.all(jnp.isfinite(out)))

    # loose check vs pure-JAX reference (kernel feeds bf16 to the MXU)
    ref = _reference_forward(params, input1, input2)
    assert bool(jnp.allclose(out, ref, atol=0.1, rtol=0.1)), \
        float(jnp.max(jnp.abs(out - ref)))

    print("KERNEL_OK")
</pallas_src>

<mosaic_0001>
module attributes {stable_mosaic.version = 11 : i64} {
  func.func @_decode_layer_kernel(%arg0: i32, %arg1: memref<128x8xbf16, #tpu.memory_space<vmem>>, %arg2: memref<2x8x8x16xf32, #tpu.memory_space<vmem>>, %arg3: memref<8x32xbf16, #tpu.memory_space<vmem>>, %arg4: memref<1x32xf32, #tpu.memory_space<vmem>>, %arg5: memref<9x32x32xbf16, #tpu.memory_space<vmem>>, %arg6: memref<9x16x32xbf16, #tpu.memory_space<vmem>>, %arg7: memref<1x32xf32, #tpu.memory_space<vmem>>, %arg8: memref<1x8xf32, #tpu.memory_space<vmem>>, %arg9: memref<1x8xf32, #tpu.memory_space<vmem>>, %arg10: memref<9x32x32xbf16, #tpu.memory_space<vmem>>, %arg11: memref<1x32xf32, #tpu.memory_space<vmem>>, %arg12: memref<1x8xf32, #tpu.memory_space<vmem>>, %arg13: memref<1x8xf32, #tpu.memory_space<vmem>>, %arg14: memref<32x8xf32, #tpu.memory_space<vmem>>, %arg15: memref<8x32xf32, #tpu.memory_space<vmem>>, %arg16: memref<128x32xf32, #tpu.memory_space<vmem>>, %arg17: memref<2x10x10x32xf32, #tpu.memory_space<vmem>>, %arg18: memref<2x10x10x16xf32, #tpu.memory_space<vmem>>) attributes {dimension_semantics = [#tpu.dimension_semantics<arbitrary>], iteration_bounds = array<i64: 1>, scalar_prefetch = 0 : i64, scratch_operands = 2 : i64, tpu.core_type = #tpu.core_type<tc>, window_params = [{pipeline_mode = #tpu.pipeline_mode<synchronous>, transform_indices = @transform_0, window_bounds = array<i64: 128, 8>}, {pipeline_mode = #tpu.pipeline_mode<synchronous>, transform_indices = @transform_1, window_bounds = array<i64: 2, 8, 8, 16>}, {pipeline_mode = #tpu.pipeline_mode<synchronous>, transform_indices = @transform_2, window_bounds = array<i64: 8, 32>}, {pipeline_mode = #tpu.pipeline_mode<synchronous>, transform_indices = @transform_3, window_bounds = array<i64: 1, 32>}, {pipeline_mode = #tpu.pipeline_mode<synchronous>, transform_indices = @transform_4, window_bounds = array<i64: 9, 32, 32>}, {pipeline_mode = #tpu.pipeline_mode<synchronous>, transform_indices = @transform_5, window_bounds = array<i64: 9, 16, 32>}, {pipeline_mode = #tpu.pipeline_mode<synchronous>, transform_indices = @transform_6, window_bounds = array<i64: 1, 32>}, {pipeline_mode = #tpu.pipeline_mode<synchronous>, transform_indices = @transform_7, window_bounds = array<i64: 1, 8>}, {pipeline_mode = #tpu.pipeline_mode<synchronous>, transform_indices = @transform_8, window_bounds = array<i64: 1, 8>}, {pipeline_mode = #tpu.pipeline_mode<synchronous>, transform_indices = @transform_9, window_bounds = array<i64: 9, 32, 32>}, {pipeline_mode = #tpu.pipeline_mode<synchronous>, transform_indices = @transform_10, window_bounds = array<i64: 1, 32>}, {pipeline_mode = #tpu.pipeline_mode<synchronous>, transform_indices = @transform_11, window_bounds = array<i64: 1, 8>}, {pipeline_mode = #tpu.pipeline_mode<synchronous>, transform_indices = @transform_12, window_bounds = array<i64: 1, 8>}, {pipeline_mode = #tpu.pipeline_mode<synchronous>, transform_indices = @transform_13, window_bounds = array<i64: 32, 8>}, {pipeline_mode = #tpu.pipeline_mode<synchronous>, transform_indices = @transform_14, window_bounds = array<i64: 8, 32>}, {pipeline_mode = #tpu.pipeline_mode<synchronous>, transform_indices = @transform_15, window_bounds = array<i64: 128, 32>}]} {
    %c0 = arith.constant 0 : index
    %c0_0 = arith.constant 0 : index
    %0 = vector.load %arg1[%c0, %c0_0] : memref<128x8xbf16, #tpu.memory_space<vmem>>, vector<128x8xbf16>
    %c0_1 = arith.constant 0 : index
    %c0_2 = arith.constant 0 : index
    %1 = vector.load %arg3[%c0_1, %c0_2] : memref<8x32xbf16, #tpu.memory_space<vmem>>, vector<8x32xbf16>
    %cst = arith.constant dense<0.000000e+00> : vector<128x32xf32>
    %2 = tpu.matmul %0, %1, %cst {dimension_numbers = #tpu.dot_dimension_numbers<[1], [0], [0], [1], [0, 0, 1, 1], [], []>} : vector<128x8xbf16>, vector<8x32xbf16>, vector<128x32xf32> -> vector<128x32xf32>
    %c0_3 = arith.constant 0 : index
    %c0_4 = arith.constant 0 : index
    %3 = vector.load %arg4[%c0_3, %c0_4] : memref<1x32xf32, #tpu.memory_space<vmem>>, vector<1x32xf32>
    %4 = vector.broadcast %3 : vector<1x32xf32> to vector<128x32xf32>
    %5 = arith.addf %2, %4 : vector<128x32xf32>
    %cst_5 = arith.constant 0.000000e+00 : f32
    %6 = vector.broadcast %cst_5 : f32 to vector<2x10x10x32xf32>
    %c0_6 = arith.constant 0 : index
    %c0_7 = arith.constant 0 : index
    %c0_8 = arith.constant 0 : index
    %c0_9 = arith.constant 0 : index
    %7 = vector.load %arg17[%c0_6, %c0_7, %c0_8, %c0_9] : memref<2x10x10x32xf32, #tpu.memory_space<vmem>>, vector<2x10x10x32xf32>
    tpu.vector_store %arg17[%c0_6, %c0_7, %c0_8, %c0_9], %6 {strides = array<i32>} : memref<2x10x10x32xf32, #tpu.memory_space<vmem>>, vector<2x10x10x32xf32>,
    %cst_10 = arith.constant 0.000000e+00 : f32
    %8 = vector.broadcast %cst_10 : f32 to vector<2x10x10x16xf32>
    %c0_11 = arith.constant 0 : index
    %c0_12 = arith.constant 0 : index
    %c0_13 = arith.constant 0 : index
    %c0_14 = arith.constant 0 : index
    %9 = vector.load %arg18[%c0_11, %c0_12, %c0_13, %c0_14] : memref<2x10x10x16xf32, #tpu.memory_space<vmem>>, vector<2x10x10x16xf32>
    tpu.vector_store %arg18[%c0_11, %c0_12, %c0_13, %c0_14], %8 {strides = array<i32>} : memref<2x10x10x16xf32, #tpu.memory_space<vmem>>, vector<2x10x10x16xf32>,
    %10 = vector.shape_cast %5 : vector<128x32xf32> to vector<2x8x8x32xf32>
    %c0_15 = arith.constant 0 : index
    %c1 = arith.constant 1 : index
    %c1_16 = arith.constant 1 : index
    %c0_17 = arith.constant 0 : index
    %11 = vector.load %arg17[%c0_15, %c1, %c1_16, %c0_17] : memref<2x10x10x32xf32, #tpu.memory_space<vmem>>, vector<2x8x8x32xf32>
    tpu.vector_store %arg17[%c0_15, %c1, %c1_16, %c0_17], %10 {strides = array<i32>} : memref<2x10x10x32xf32, #tpu.memory_space<vmem>>, vector<2x8x8x32xf32>,
    %c0_18 = arith.constant 0 : index
    %c0_19 = arith.constant 0 : index
    %c0_20 = arith.constant 0 : index
    %c0_21 = arith.constant 0 : index
    %12 = vector.load %arg2[%c0_18, %c0_19, %c0_20, %c0_21] : memref<2x8x8x16xf32, #tpu.memory_space<vmem>>, vector<2x8x8x16xf32>
    %c0_22 = arith.constant 0 : index
    %c1_23 = arith.constant 1 : index
    %c1_24 = arith.constant 1 : index
    %c0_25 = arith.constant 0 : index
    %13 = vector.load %arg18[%c0_22, %c1_23, %c1_24, %c0_25] : memref<2x10x10x16xf32, #tpu.memory_space<vmem>>, vector<2x8x8x16xf32>
    tpu.vector_store %arg18[%c0_22, %c1_23, %c1_24, %c0_25], %12 {strides = array<i32>} : memref<2x10x10x16xf32, #tpu.memory_space<vmem>>, vector<2x8x8x16xf32>,
    %c0_26 = arith.constant 0 : index
    %c0_27 = arith.constant 0 : index
    %14 = vector.load %arg7[%c0_26, %c0_27] : memref<1x32xf32, #tpu.memory_space<vmem>>, vector<1x32xf32>
    %cst_28 = arith.constant 0.000000e+00 : f32
    %15 = vector.broadcast %cst_28 : f32 to vector<128x32xf32>
    %16 = vector.broadcast %14 : vector<1x32xf32> to vector<128x32xf32>
    %17 = arith.addf %16, %15 : vector<128x32xf32>
    %c0_29 = arith.constant 0 : index
    %c0_30 = arith.constant 0 : index
    %c0_31 = arith.constant 0 : index
    %c0_32 = arith.constant 0 : index
    %18 = vector.load %arg17[%c0_29, %c0_30, %c0_31, %c0_32] : memref<2x10x10x32xf32, #tpu.memory_space<vmem>>, vector<2x8x8x32xf32>
    %19 = vector.shape_cast %18 : vector<2x8x8x32xf32> to vector<128x32xf32>
    %20 = arith.truncf %19 : vector<128x32xf32> to vector<128x32xbf16>
    %c0_33 = arith.constant 0 : index
    %c0_34 = arith.constant 0 : index
    %c0_35 = arith.constant 0 : index
    %21 = vector.load %arg5[%c0_33, %c0_34, %c0_35] : memref<9x32x32xbf16, #tpu.memory_space<vmem>>, vector<1x32x32xbf16>
    %22 = vector.shape_cast %21 : vector<1x32x32xbf16> to vector<32x32xbf16>
    %cst_36 = arith.constant dense<0.000000e+00> : vector<128x32xf32>
    %23 = tpu.matmul %20, %22, %cst_36 {dimension_numbers = #tpu.dot_dimension_numbers<[1], [0], [0], [1], [0, 0, 1, 1], [], []>} : vector<128x32xbf16>, vector<32x32xbf16>, vector<128x32xf32> -> vector<128x32xf32>
    %24 = arith.addf %17, %23 : vector<128x32xf32>
    %c0_37 = arith.constant 0 : index
    %c0_38 = arith.constant 0 : index
    %c1_39 = arith.constant 1 : index
    %c0_40 = arith.constant 0 : index
    %25 = vector.load %arg17[%c0_37, %c0_38, %c1_39, %c0_40] : memref<2x10x10x32xf32, #tpu.memory_space<vmem>>, vector<2x8x8x32xf32>
    %26 = vector.shape_cast %25 : vector<2x8x8x32xf32> to vector<128x32xf32>
    %27 = arith.truncf %26 : vector<128x32xf32> to vector<128x32xbf16>
    %c1_41 = arith.constant 1 : index
    %c0_42 = arith.constant 0 : index
    %c0_43 = arith.constant 0 : index
    %28 = vector.load %arg5[%c1_41, %c0_42, %c0_43] : memref<9x32x32xbf16, #tpu.memory_space<vmem>>, vector<1x32x32xbf16>
    %29 = vector.shape_cast %28 : vector<1x32x32xbf16> to vector<32x32xbf16>
    %cst_44 = arith.constant dense<0.000000e+00> : vector<128x32xf32>
    %30 = tpu.matmul %27, %29, %cst_44 {dimension_numbers = #tpu.dot_dimension_numbers<[1], [0], [0], [1], [0, 0, 1, 1], [], []>} : vector<128x32xbf16>, vector<32x32xbf16>, vector<128x32xf32> -> vector<128x32xf32>
    %31 = arith.addf %24, %30 : vector<128x32xf32>
    %c0_45 = arith.constant 0 : index
    %c0_46 = arith.constant 0 : index
    %c2 = arith.constant 2 : index
    %c0_47 = arith.constant 0 : index
    %32 = vector.load %arg17[%c0_45, %c0_46, %c2, %c0_47] : memref<2x10x10x32xf32, #tpu.memory_space<vmem>>, vector<2x8x8x32xf32>
    %33 = vector.shape_cast %32 : vector<2x8x8x32xf32> to vector<128x32xf32>
    %34 = arith.truncf %33 : vector<128x32xf32> to vector<128x32xbf16>
    %c2_48 = arith.constant 2 : index
    %c0_49 = arith.constant 0 : index
    %c0_50 = arith.constant 0 : index
    %35 = vector.load %arg5[%c2_48, %c0_49, %c0_50] : memref<9x32x32xbf16, #tpu.memory_space<vmem>>, vector<1x32x32xbf16>
    %36 = vector.shape_cast %35 : vector<1x32x32xbf16> to vector<32x32xbf16>
    %cst_51 = arith.constant dense<0.000000e+00> : vector<128x32xf32>
    %37 = tpu.matmul %34, %36, %cst_51 {dimension_numbers = #tpu.dot_dimension_numbers<[1], [0], [0], [1], [0, 0, 1, 1], [], []>} : vector<128x32xbf16>, vector<32x32xbf16>, vector<128x32xf32> -> vector<128x32xf32>
    %38 = arith.addf %31, %37 : vector<128x32xf32>
    %c0_52 = arith.constant 0 : index
    %c1_53 = arith.constant 1 : index
    %c0_54 = arith.constant 0 : index
    %c0_55 = arith.constant 0 : index
    %39 = vector.load %arg17[%c0_52, %c1_53, %c0_54, %c0_55] : memref<2x10x10x32xf32, #tpu.memory_space<vmem>>, vector<2x8x8x32xf32>
    %40 = vector.shape_cast %39 : vector<2x8x8x32xf32> to vector<128x32xf32>
    %41 = arith.truncf %40 : vector<128x32xf32> to vector<128x32xbf16>
    %c3 = arith.constant 3 : index
    %c0_56 = arith.constant 0 : index
    %c0_57 = arith.constant 0 : index
    %42 = vector.load %arg5[%c3, %c0_56, %c0_57] : memref<9x32x32xbf16, #tpu.memory_space<vmem>>, vector<1x32x32xbf16>
    %43 = vector.shape_cast %42 : vector<1x32x32xbf16> to vector<32x32xbf16>
    %cst_58 = arith.constant dense<0.000000e+00> : vector<128x32xf32>
    %44 = tpu.matmul %41, %43, %cst_58 {dimension_numbers = #tpu.dot_dimension_numbers<[1], [0], [0], [1], [0, 0, 1, 1], [], []>} : vector<128x32xbf16>, vector<32x32xbf16>, vector<128x32xf32> -> vector<128x32xf32>
    %45 = arith.addf %38, %44 : vector<128x32xf32>
    %c0_59 = arith.constant 0 : index
    %c1_60 = arith.constant 1 : index
    %c1_61 = arith.constant 1 : index
    %c0_62 = arith.constant 0 : index
    %46 = vector.load %arg17[%c0_59, %c1_60, %c1_61, %c0_62] : memref<2x10x10x32xf32, #tpu.memory_space<vmem>>, vector<2x8x8x32xf32>
    %47 = vector.shape_cast %46 : vector<2x8x8x32xf32> to vector<128x32xf32>
    %48 = arith.truncf %47 : vector<128x32xf32> to vector<128x32xbf16>
    %c4 = arith.constant 4 : index
    %c0_63 = arith.constant 0 : index
    %c0_64 = arith.constant 0 : index
    %49 = vector.load %arg5[%c4, %c0_63, %c0_64] : memref<9x32x32xbf16, #tpu.memory_space<vmem>>, vector<1x32x32xbf16>
    %50 = vector.shape_cast %49 : vector<1x32x32xbf16> to vector<32x32xbf16>
    %cst_65 = arith.constant dense<0.000000e+00> : vector<128x32xf32>
    %51 = tpu.matmul %48, %50, %cst_65 {dimension_numbers = #tpu.dot_dimension_numbers<[1], [0], [0], [1], [0, 0, 1, 1], [], []>} : vector<128x32xbf16>, vector<32x32xbf16>, vector<128x32xf32> -> vector<128x32xf32>
    %52 = arith.addf %45, %51 : vector<128x32xf32>
    %c0_66 = arith.constant 0 : index
    %c1_67 = arith.constant 1 : index
    %c2_68 = arith.constant 2 : index
    %c0_69 = arith.constant 0 : index
    %53 = vector.load %arg17[%c0_66, %c1_67, %c2_68, %c0_69] : memref<2x10x10x32xf32, #tpu.memory_space<vmem>>, vector<2x8x8x32xf32>
    %54 = vector.shape_cast %53 : vector<2x8x8x32xf32> to vector<128x32xf32>
    %55 = arith.truncf %54 : vector<128x32xf32> to vector<128x32xbf16>
    %c5 = arith.constant 5 : index
    %c0_70 = arith.constant 0 : index
    %c0_71 = arith.constant 0 : index
    %56 = vector.load %arg5[%c5, %c0_70, %c0_71] : memref<9x32x32xbf16, #tpu.memory_space<vmem>>, vector<1x32x32xbf16>
    %57 = vector.shape_cast %56 : vector<1x32x32xbf16> to vector<32x32xbf16>
    %cst_72 = arith.constant dense<0.000000e+00> : vector<128x32xf32>
    %58 = tpu.matmul %55, %57, %cst_72 {dimension_numbers = #tpu.dot_dimension_numbers<[1], [0], [0], [1], [0, 0, 1, 1], [], []>} : vector<128x32xbf16>, vector<32x32xbf16>, vector<128x32xf32> -> vector<128x32xf32>
    %59 = arith.addf %52, %58 : vector<128x32xf32>
    %c0_73 = arith.constant 0 : index
    %c2_74 = arith.constant 2 : index
    %c0_75 = arith.constant 0 : index
    %c0_76 = arith.constant 0 : index
    %60 = vector.load %arg17[%c0_73, %c2_74, %c0_75, %c0_76] : memref<2x10x10x32xf32, #tpu.memory_space<vmem>>, vector<2x8x8x32xf32>
    %61 = vector.shape_cast %60 : vector<2x8x8x32xf32> to vector<128x32xf32>
    %62 = arith.truncf %61 : vector<128x32xf32> to vector<128x32xbf16>
    %c6 = arith.constant 6 : index
    %c0_77 = arith.constant 0 : index
    %c0_78 = arith.constant 0 : index
    %63 = vector.load %arg5[%c6, %c0_77, %c0_78] : memref<9x32x32xbf16, #tpu.memory_space<vmem>>, vector<1x32x32xbf16>
    %64 = vector.shape_cast %63 : vector<1x32x32xbf16> to vector<32x32xbf16>
    %cst_79 = arith.constant dense<0.000000e+00> : vector<128x32xf32>
    %65 = tpu.matmul %62, %64, %cst_79 {dimension_numbers = #tpu.dot_dimension_numbers<[1], [0], [0], [1], [0, 0, 1, 1], [], []>} : vector<128x32xbf16>, vector<32x32xbf16>, vector<128x32xf32> -> vector<128x32xf32>
    %66 = arith.addf %59, %65 : vector<128x32xf32>
    %c0_80 = arith.constant 0 : index
    %c2_81 = arith.constant 2 : index
    %c1_82 = arith.constant 1 : index
    %c0_83 = arith.constant 0 : index
    %67 = vector.load %arg17[%c0_80, %c2_81, %c1_82, %c0_83] : memref<2x10x10x32xf32, #tpu.memory_space<vmem>>, vector<2x8x8x32xf32>
    %68 = vector.shape_cast %67 : vector<2x8x8x32xf32> to vector<128x32xf32>
    %69 = arith.truncf %68 : vector<128x32xf32> to vector<128x32xbf16>
    %c7 = arith.constant 7 : index
    %c0_84 = arith.constant 0 : index
    %c0_85 = arith.constant 0 : index
    %70 = vector.load %arg5[%c7, %c0_84, %c0_85] : memref<9x32x32xbf16, #tpu.memory_space<vmem>>, vector<1x32x32xbf16>
    %71 = vector.shape_cast %70 : vector<1x32x32xbf16> to vector<32x32xbf16>
    %cst_86 = arith.constant dense<0.000000e+00> : vector<128x32xf32>
    %72 = tpu.matmul %69, %71, %cst_86 {dimension_numbers = #tpu.dot_dimension_numbers<[1], [0], [0], [1], [0, 0, 1, 1], [], []>} : vector<128x32xbf16>, vector<32x32xbf16>, vector<128x32xf32> -> vector<128x32xf32>
    %73 = arith.addf %66, %72 : vector<128x32xf32>
    %c0_87 = arith.constant 0 : index
    %c2_88 = arith.constant 2 : index
    %c2_89 = arith.constant 2 : index
    %c0_90 = arith.constant 0 : index
    %74 = vector.load %arg17[%c0_87, %c2_88, %c2_89, %c0_90] : memref<2x10x10x32xf32, #tpu.memory_space<vmem>>, vector<2x8x8x32xf32>
    %75 = vector.shape_cast %74 : vector<2x8x8x32xf32> to vector<128x32xf32>
    %76 = arith.truncf %75 : vector<128x32xf32> to vector<128x32xbf16>
    %c8 = arith.constant 8 : index
    %c0_91 = arith.constant 0 : index
    %c0_92 = arith.constant 0 : index
    %77 = vector.load %arg5[%c8, %c0_91, %c0_92] : memref<9x32x32xbf16, #tpu.memory_space<vmem>>, vector<1x32x32xbf16>
    %78 = vector.shape_cast %77 : vector<1x32x32xbf16> to vector<32x32xbf16>
    %cst_93 = arith.constant dense<0.000000e+00> : vector<128x32xf32>
    %79 = tpu.matmul %76, %78, %cst_93 {dimension_numbers = #tpu.dot_dimension_numbers<[1], [0], [0], [1], [0, 0, 1, 1], [], []>} : vector<128x32xbf16>, vector<32x32xbf16>, vector<128x32xf32> -> vector<128x32xf32>
    %80 = arith.addf %73, %79 : vector<128x32xf32>
    %c0_94 = arith.constant 0 : index
    %c0_95 = arith.constant 0 : index
    %c0_96 = arith.constant 0 : index
    %c0_97 = arith.constant 0 : index
    %81 = vector.load %arg18[%c0_94, %c0_95, %c0_96, %c0_97] : memref<2x10x10x16xf32, #tpu.memory_space<vmem>>, vector<2x8x8x16xf32>
    %82 = vector.shape_cast %81 : vector<2x8x8x16xf32> to vector<128x16xf32>
    %83 = arith.truncf %82 : vector<128x16xf32> to vector<128x16xbf16>
    %c0_98 = arith.constant 0 : index
    %c0_99 = arith.constant 0 : index
    %c0_100 = arith.constant 0 : index
    %84 = vector.load %arg6[%c0_98, %c0_99, %c0_100] : memref<9x16x32xbf16, #tpu.memory_space<vmem>>, vector<1x16x32xbf16>
    %85 = vector.shape_cast %84 : vector<1x16x32xbf16> to vector<16x32xbf16>
    %cst_101 = arith.constant dense<0.000000e+00> : vector<128x32xf32>
    %86 = tpu.matmul %83, %85, %cst_101 {dimension_numbers = #tpu.dot_dimension_numbers<[1], [0], [0], [1], [0, 0, 1, 1], [], []>} : vector<128x16xbf16>, vector<16x32xbf16>, vector<128x32xf32> -> vector<128x32xf32>
    %87 = arith.addf %80, %86 : vector<128x32xf32>
    %c0_102 = arith.constant 0 : index
    %c0_103 = arith.constant 0 : index
    %c1_104 = arith.constant 1 : index
    %c0_105 = arith.constant 0 : index
    %88 = vector.load %arg18[%c0_102, %c0_103, %c1_104, %c0_105] : memref<2x10x10x16xf32, #tpu.memory_space<vmem>>, vector<2x8x8x16xf32>
    %89 = vector.shape_cast %88 : vector<2x8x8x16xf32> to vector<128x16xf32>
    %90 = arith.truncf %89 : vector<128x16xf32> to vector<128x16xbf16>
    %c1_106 = arith.constant 1 : index
    %c0_107 = arith.constant 0 : index
    %c0_108 = arith.constant 0 : index
    %91 = vector.load %arg6[%c1_106, %c0_107, %c0_108] : memref<9x16x32xbf16, #tpu.memory_space<vmem>>, vector<1x16x32xbf16>
    %92 = vector.shape_cast %91 : vector<1x16x32xbf16> to vector<16x32xbf16>
    %cst_109 = arith.constant dense<0.000000e+00> : vector<128x32xf32>
    %93 = tpu.matmul %90, %92, %cst_109 {dimension_numbers = #tpu.dot_dimension_numbers<[1], [0], [0], [1], [0, 0, 1, 1], [], []>} : vector<128x16xbf16>, vector<16x32xbf16>, vector<128x32xf32> -> vector<128x32xf32>
    %94 = arith.addf %87, %93 : vector<128x32xf32>
    %c0_110 = arith.constant 0 : index
    %c0_111 = arith.constant 0 : index
    %c2_112 = arith.constant 2 : index
    %c0_113 = arith.constant 0 : index
    %95 = vector.load %arg18[%c0_110, %c0_111, %c2_112, %c0_113] : memref<2x10x10x16xf32, #tpu.memory_space<vmem>>, vector<2x8x8x16xf32>
    %96 = vector.shape_cast %95 : vector<2x8x8x16xf32> to vector<128x16xf32>
    %97 = arith.truncf %96 : vector<128x16xf32> to vector<128x16xbf16>
    %c2_114 = arith.constant 2 : index
    %c0_115 = arith.constant 0 : index
    %c0_116 = arith.constant 0 : index
    %98 = vector.load %arg6[%c2_114, %c0_115, %c0_116] : memref<9x16x32xbf16, #tpu.memory_space<vmem>>, vector<1x16x32xbf16>
    %99 = vector.shape_cast %98 : vector<1x16x32xbf16> to vector<16x32xbf16>
    %cst_117 = arith.constant dense<0.000000e+00> : vector<128x32xf32>
    %100 = tpu.matmul %97, %99, %cst_117 {dimension_numbers = #tpu.dot_dimension_numbers<[1], [0], [0], [1], [0, 0, 1, 1], [], []>} : vector<128x16xbf16>, vector<16x32xbf16>, vector<128x32xf32> -> vector<128x32xf32>
    %101 = arith.addf %94, %100 : vector<128x32xf32>
    %c0_118 = arith.constant 0 : index
    %c1_119 = arith.constant 1 : index
    %c0_120 = arith.constant 0 : index
    %c0_121 = arith.constant 0 : index
    %102 = vector.load %arg18[%c0_118, %c1_119, %c0_120, %c0_121] : memref<2x10x10x16xf32, #tpu.memory_space<vmem>>, vector<2x8x8x16xf32>
    %103 = vector.shape_cast %102 : vector<2x8x8x16xf32> to vector<128x16xf32>
    %104 = arith.truncf %103 : vector<128x16xf32> to vector<128x16xbf16>
    %c3_122 = arith.constant 3 : index
    %c0_123 = arith.constant 0 : index
    %c0_124 = arith.constant 0 : index
    %105 = vector.load %arg6[%c3_122, %c0_123, %c0_124] : memref<9x16x32xbf16, #tpu.memory_space<vmem>>, vector<1x16x32xbf16>
    %106 = vector.shape_cast %105 : vector<1x16x32xbf16> to vector<16x32xbf16>
    %cst_125 = arith.constant dense<0.000000e+00> : vector<128x32xf32>
    %107 = tpu.matmul %104, %106, %cst_125 {dimension_numbers = #tpu.dot_dimension_numbers<[1], [0], [0], [1], [0, 0, 1, 1], [], []>} : vector<128x16xbf16>, vector<16x32xbf16>, vector<128x32xf32> -> vector<128x32xf32>
    %108 = arith.addf %101, %107 : vector<128x32xf32>
    %c0_126 = arith.constant 0 : index
    %c1_127 = arith.constant 1 : index
    %c1_128 = arith.constant 1 : index
    %c0_129 = arith.constant 0 : index
    %109 = vector.load %arg18[%c0_126, %c1_127, %c1_128, %c0_129] : memref<2x10x10x16xf32, #tpu.memory_space<vmem>>, vector<2x8x8x16xf32>
    %110 = vector.shape_cast %109 : vector<2x8x8x16xf32> to vector<128x16xf32>
    %111 = arith.truncf %110 : vector<128x16xf32> to vector<128x16xbf16>
    %c4_130 = arith.constant 4 : index
    %c0_131 = arith.constant 0 : index
    %c0_132 = arith.constant 0 : index
    %112 = vector.load %arg6[%c4_130, %c0_131, %c0_132] : memref<9x16x32xbf16, #tpu.memory_space<vmem>>, vector<1x16x32xbf16>
    %113 = vector.shape_cast %112 : vector<1x16x32xbf16> to vector<16x32xbf16>
    %cst_133 = arith.constant dense<0.000000e+00> : vector<128x32xf32>
    %114 = tpu.matmul %111, %113, %cst_133 {dimension_numbers = #tpu.dot_dimension_numbers<[1], [0], [0], [1], [0, 0, 1, 1], [], []>} : vector<128x16xbf16>, vector<16x32xbf16>, vector<128x32xf32> -> vector<128x32xf32>
    %115 = arith.addf %108, %114 : vector<128x32xf32>
    %c0_134 = arith.constant 0 : index
    %c1_135 = arith.constant 1 : index
    %c2_136 = arith.constant 2 : index
    %c0_137 = arith.constant 0 : index
    %116 = vector.load %arg18[%c0_134, %c1_135, %c2_136, %c0_137] : memref<2x10x10x16xf32, #tpu.memory_space<vmem>>, vector<2x8x8x16xf32>
    %117 = vector.shape_cast %116 : vector<2x8x8x16xf32> to vector<128x16xf32>
    %118 = arith.truncf %117 : vector<128x16xf32> to vector<128x16xbf16>
    %c5_138 = arith.constant 5 : index
    %c0_139 = arith.constant 0 : index
    %c0_140 = arith.constant 0 : index
    %119 = vector.load %arg6[%c5_138, %c0_139, %c0_140] : memref<9x16x32xbf16, #tpu.memory_space<vmem>>, vector<1x16x32xbf16>
    %120 = vector.shape_cast %119 : vector<1x16x32xbf16> to vector<16x32xbf16>
    %cst_141 = arith.constant dense<0.000000e+00> : vector<128x32xf32>
    %121 = tpu.matmul %118, %120, %cst_141 {dimension_numbers = #tpu.dot_dimension_numbers<[1], [0], [0], [1], [0, 0, 1, 1], [], []>} : vector<128x16xbf16>, vector<16x32xbf16>, vector<128x32xf32> -> vector<128x32xf32>
    %122 = arith.addf %115, %121 : vector<128x32xf32>
    %c0_142 = arith.constant 0 : index
    %c2_143 = arith.constant 2 : index
    %c0_144 = arith.constant 0 : index
    %c0_145 = arith.constant 0 : index
    %123 = vector.load %arg18[%c0_142, %c2_143, %c0_144, %c0_145] : memref<2x10x10x16xf32, #tpu.memory_space<vmem>>, vector<2x8x8x16xf32>
    %124 = vector.shape_cast %123 : vector<2x8x8x16xf32> to vector<128x16xf32>
    %125 = arith.truncf %124 : vector<128x16xf32> to vector<128x16xbf16>
    %c6_146 = arith.constant 6 : index
    %c0_147 = arith.constant 0 : index
    %c0_148 = arith.constant 0 : index
    %126 = vector.load %arg6[%c6_146, %c0_147, %c0_148] : memref<9x16x32xbf16, #tpu.memory_space<vmem>>, vector<1x16x32xbf16>
    %127 = vector.shape_cast %126 : vector<1x16x32xbf16> to vector<16x32xbf16>
    %cst_149 = arith.constant dense<0.000000e+00> : vector<128x32xf32>
    %128 = tpu.matmul %125, %127, %cst_149 {dimension_numbers = #tpu.dot_dimension_numbers<[1], [0], [0], [1], [0, 0, 1, 1], [], []>} : vector<128x16xbf16>, vector<16x32xbf16>, vector<128x32xf32> -> vector<128x32xf32>
    %129 = arith.addf %122, %128 : vector<128x32xf32>
    %c0_150 = arith.constant 0 : index
    %c2_151 = arith.constant 2 : index
    %c1_152 = arith.constant 1 : index
    %c0_153 = arith.constant 0 : index
    %130 = vector.load %arg18[%c0_150, %c2_151, %c1_152, %c0_153] : memref<2x10x10x16xf32, #tpu.memory_space<vmem>>, vector<2x8x8x16xf32>
    %131 = vector.shape_cast %130 : vector<2x8x8x16xf32> to vector<128x16xf32>
    %132 = arith.truncf %131 : vector<128x16xf32> to vector<128x16xbf16>
    %c7_154 = arith.constant 7 : index
    %c0_155 = arith.constant 0 : index
    %c0_156 = arith.constant 0 : index
    %133 = vector.load %arg6[%c7_154, %c0_155, %c0_156] : memref<9x16x32xbf16, #tpu.memory_space<vmem>>, vector<1x16x32xbf16>
    %134 = vector.shape_cast %133 : vector<1x16x32xbf16> to vector<16x32xbf16>
    %cst_157 = arith.constant dense<0.000000e+00> : vector<128x32xf32>
    %135 = tpu.matmul %132, %134, %cst_157 {dimension_numbers = #tpu.dot_dimension_numbers<[1], [0], [0], [1], [0, 0, 1, 1], [], []>} : vector<128x16xbf16>, vector<16x32xbf16>, vector<128x32xf32> -> vector<128x32xf32>
    %136 = arith.addf %129, %135 : vector<128x32xf32>
    %c0_158 = arith.constant 0 : index
    %c2_159 = arith.constant 2 : index
    %c2_160 = arith.constant 2 : index
    %c0_161 = arith.constant 0 : index
    %137 = vector.load %arg18[%c0_158, %c2_159, %c2_160, %c0_161] : memref<2x10x10x16xf32, #tpu.memory_space<vmem>>, vector<2x8x8x16xf32>
    %138 = vector.shape_cast %137 : vector<2x8x8x16xf32> to vector<128x16xf32>
    %139 = arith.truncf %138 : vector<128x16xf32> to vector<128x16xbf16>
    %c8_162 = arith.constant 8 : index
    %c0_163 = arith.constant 0 : index
    %c0_164 = arith.constant 0 : index
    %140 = vector.load %arg6[%c8_162, %c0_163, %c0_164] : memref<9x16x32xbf16, #tpu.memory_space<vmem>>, vector<1x16x32xbf16>
    %141 = vector.shape_cast %140 : vector<1x16x32xbf16> to vector<16x32xbf16>
    %cst_165 = arith.constant dense<0.000000e+00> : vector<128x32xf32>
    %142 = tpu.matmul %139, %141, %cst_165 {dimension_numbers = #tpu.dot_dimension_numbers<[1], [0], [0], [1], [0, 0, 1, 1], [], []>} : vector<128x16xbf16>, vector<16x32xbf16>, vector<128x32xf32> -> vector<128x32xf32>
    %143 = arith.addf %136, %142 : vector<128x32xf32>
    %cst_166 = arith.constant dense<0.000000e+00> : vector<32xf32>
    %144 = vector.multi_reduction <add>, %143, %cst_166 [0] : vector<128x32xf32> to vector<32xf32>
    %145 = vector.shape_cast %144 : vector<32xf32> to vector<1x32xf32>
    %c0_167 = arith.constant 0 : index
    %c0_168 = arith.constant 0 : index
    %146 = vector.load %arg14[%c0_167, %c0_168] : memref<32x8xf32, #tpu.memory_space<vmem>>, vector<32x8xf32>
    %cst_169 = arith.constant dense<0.000000e+00> : vector<1x8xf32>
    %147 = tpu.matmul %145, %146, %cst_169 {dimension_numbers = #tpu.dot_dimension_numbers<[1], [0], [0], [1], [0, 0, 1, 1], [], []>} : vector<1x32xf32>, vector<32x8xf32>, vector<1x8xf32> -> vector<1x8xf32>
    %cst_170 = arith.constant 0.001953125 : f32
    %148 = vector.broadcast %cst_170 : f32 to vector<1x8xf32>
    %149 = arith.mulf %147, %148 : vector<1x8xf32>
    %c0_171 = arith.constant 0 : index
    %c0_172 = arith.constant 0 : index
    %150 = vector.load %arg15[%c0_171, %c0_172] : memref<8x32xf32, #tpu.memory_space<vmem>>, vector<8x32xf32>
    %cst_173 = arith.constant dense<0.000000e+00> : vector<1x32xf32>
    %151 = tpu.matmul %149, %150, %cst_173 {dimension_numbers = #tpu.dot_dimension_numbers<[1], [0], [0], [1], [0, 0, 1, 1], [], []>} : vector<1x8xf32>, vector<8x32xf32>, vector<1x32xf32> -> vector<1x32xf32>
    %152 = vector.broadcast %151 : vector<1x32xf32> to vector<128x32xf32>
    %153 = arith.subf %143, %152 : vector<128x32xf32>
    %154 = arith.mulf %153, %153 : vector<128x32xf32>
    %cst_174 = arith.constant dense<0.000000e+00> : vector<32xf32>
    %155 = vector.multi_reduction <add>, %154, %cst_174 [0] : vector<128x32xf32> to vector<32xf32>
    %156 = vector.shape_cast %155 : vector<32xf32> to vector<1x32xf32>
    %c0_175 = arith.constant 0 : index
    %c0_176 = arith.constant 0 : index
    %157 = vector.load %arg14[%c0_175, %c0_176] : memref<32x8xf32, #tpu.memory_space<vmem>>, vector<32x8xf32>
    %cst_177 = arith.constant dense<0.000000e+00> : vector<1x8xf32>
    %158 = tpu.matmul %156, %157, %cst_177 {dimension_numbers = #tpu.dot_dimension_numbers<[1], [0], [0], [1], [0, 0, 1, 1], [], []>} : vector<1x32xf32>, vector<32x8xf32>, vector<1x8xf32> -> vector<1x8xf32>
    %cst_178 = arith.constant 0.001953125 : f32
    %159 = vector.broadcast %cst_178 : f32 to vector<1x8xf32>
    %160 = arith.mulf %158, %159 : vector<1x8xf32>
    %c0_179 = arith.constant 0 : index
    %c0_180 = arith.constant 0 : index
    %161 = vector.load %arg8[%c0_179, %c0_180] : memref<1x8xf32, #tpu.memory_space<vmem>>, vector<1x8xf32>
    %cst_181 = arith.constant 9.99999974E-6 : f32
    %162 = vector.broadcast %cst_181 : f32 to vector<1x8xf32>
    %163 = arith.addf %160, %162 : vector<1x8xf32>
    %164 = math.rsqrt %163 : vector<1x8xf32>
    %165 = arith.mulf %161, %164 : vector<1x8xf32>
    %c0_182 = arith.constant 0 : index
    %c0_183 = arith.constant 0 : index
    %166 = vector.load %arg15[%c0_182, %c0_183] : memref<8x32xf32, #tpu.memory_space<vmem>>, vector<8x32xf32>
    %cst_184 = arith.constant dense<0.000000e+00> : vector<1x32xf32>
    %167 = tpu.matmul %165, %166, %cst_184 {dimension_numbers = #tpu.dot_dimension_numbers<[1], [0], [0], [1], [0, 0, 1, 1], [], []>} : vector<1x8xf32>, vector<8x32xf32>, vector<1x32xf32> -> vector<1x32xf32>
    %168 = vector.broadcast %167 : vector<1x32xf32> to vector<128x32xf32>
    %169 = arith.mulf %153, %168 : vector<128x32xf32>
    %c0_185 = arith.constant 0 : index
    %c0_186 = arith.constant 0 : index
    %170 = vector.load %arg9[%c0_185, %c0_186] : memref<1x8xf32, #tpu.memory_space<vmem>>, vector<1x8xf32>
    %c0_187 = arith.constant 0 : index
    %c0_188 = arith.constant 0 : index
    %171 = vector.load %arg15[%c0_187, %c0_188] : memref<8x32xf32, #tpu.memory_space<vmem>>, vector<8x32xf32>
    %cst_189 = arith.constant dense<0.000000e+00> : vector<1x32xf32>
    %172 = tpu.matmul %170, %171, %cst_189 {dimension_numbers = #tpu.dot_dimension_numbers<[1], [0], [0], [1], [0, 0, 1, 1], [], []>} : vector<1x8xf32>, vector<8x32xf32>, vector<1x32xf32> -> vector<1x32xf32>
    %173 = vector.broadcast %172 : vector<1x32xf32> to vector<128x32xf32>
    %174 = arith.addf %169, %173 : vector<128x32xf32>
    %cst_190 = arith.constant 0.000000e+00 : f32
    %175 = vector.broadcast %cst_190 : f32 to vector<128x32xf32>
    %176 = arith.maximumf %174, %175 : vector<128x32xf32>
    %177 = vector.shape_cast %176 : vector<128x32xf32> to vector<2x8x8x32xf32>
    %c0_191 = arith.constant 0 : index
    %c1_192 = arith.constant 1 : index
    %c1_193 = arith.constant 1 : index
    %c0_194 = arith.constant 0 : index
    %178 = vector.load %arg17[%c0_191, %c1_192, %c1_193, %c0_194] : memref<2x10x10x32xf32, #tpu.memory_space<vmem>>, vector<2x8x8x32xf32>
    tpu.vector_store %arg17[%c0_191, %c1_192, %c1_193, %c0_194], %177 {strides = array<i32>} : memref<2x10x10x32xf32, #tpu.memory_space<vmem>>, vector<2x8x8x32xf32>,
    %c0_195 = arith.constant 0 : index
    %c0_196 = arith.constant 0 : index
    %179 = vector.load %arg11[%c0_195, %c0_196] : memref<1x32xf32, #tpu.memory_space<vmem>>, vector<1x32xf32>
    %cst_197 = arith.constant 0.000000e+00 : f32
    %180 = vector.broadcast %cst_197 : f32 to vector<128x32xf32>
    %181 = vector.broadcast %179 : vector<1x32xf32> to vector<128x32xf32>
    %182 = arith.addf %181, %180 : vector<128x32xf32>
    %c0_198 = arith.constant 0 : index
    %c0_199 = arith.constant 0 : index
    %c0_200 = arith.constant 0 : index
    %c0_201 = arith.constant 0 : index
    %183 = vector.load %arg17[%c0_198, %c0_199, %c0_200, %c0_201] : memref<2x10x10x32xf32, #tpu.memory_space<vmem>>, vector<2x8x8x32xf32>
    %184 = vector.shape_cast %183 : vector<2x8x8x32xf32> to vector<128x32xf32>
    %185 = arith.truncf %184 : vector<128x32xf32> to vector<128x32xbf16>
    %c0_202 = arith.constant 0 : index
    %c0_203 = arith.constant 0 : index
    %c0_204 = arith.constant 0 : index
    %186 = vector.load %arg10[%c0_202, %c0_203, %c0_204] : memref<9x32x32xbf16, #tpu.memory_space<vmem>>, vector<1x32x32xbf16>
    %187 = vector.shape_cast %186 : vector<1x32x32xbf16> to vector<32x32xbf16>
    %cst_205 = arith.constant dense<0.000000e+00> : vector<128x32xf32>
    %188 = tpu.matmul %185, %187, %cst_205 {dimension_numbers = #tpu.dot_dimension_numbers<[1], [0], [0], [1], [0, 0, 1, 1], [], []>} : vector<128x32xbf16>, vector<32x32xbf16>, vector<128x32xf32> -> vector<128x32xf32>
    %189 = arith.addf %182, %188 : vector<128x32xf32>
    %c0_206 = arith.constant 0 : index
    %c0_207 = arith.constant 0 : index
    %c1_208 = arith.constant 1 : index
    %c0_209 = arith.constant 0 : index
    %190 = vector.load %arg17[%c0_206, %c0_207, %c1_208, %c0_209] : memref<2x10x10x32xf32, #tpu.memory_space<vmem>>, vector<2x8x8x32xf32>
    %191 = vector.shape_cast %190 : vector<2x8x8x32xf32> to vector<128x32xf32>
    %192 = arith.truncf %191 : vector<128x32xf32> to vector<128x32xbf16>
    %c1_210 = arith.constant 1 : index
    %c0_211 = arith.constant 0 : index
    %c0_212 = arith.constant 0 : index
    %193 = vector.load %arg10[%c1_210, %c0_211, %c0_212] : memref<9x32x32xbf16, #tpu.memory_space<vmem>>, vector<1x32x32xbf16>
    %194 = vector.shape_cast %193 : vector<1x32x32xbf16> to vector<32x32xbf16>
    %cst_213 = arith.constant dense<0.000000e+00> : vector<128x32xf32>
    %195 = tpu.matmul %192, %194, %cst_213 {dimension_numbers = #tpu.dot_dimension_numbers<[1], [0], [0], [1], [0, 0, 1, 1], [], []>} : vector<128x32xbf16>, vector<32x32xbf16>, vector<128x32xf32> -> vector<128x32xf32>
    %196 = arith.addf %189, %195 : vector<128x32xf32>
    %c0_214 = arith.constant 0 : index
    %c0_215 = arith.constant 0 : index
    %c2_216 = arith.constant 2 : index
    %c0_217 = arith.constant 0 : index
    %197 = vector.load %arg17[%c0_214, %c0_215, %c2_216, %c0_217] : memref<2x10x10x32xf32, #tpu.memory_space<vmem>>, vector<2x8x8x32xf32>
    %198 = vector.shape_cast %197 : vector<2x8x8x32xf32> to vector<128x32xf32>
    %199 = arith.truncf %198 : vector<128x32xf32> to vector<128x32xbf16>
    %c2_218 = arith.constant 2 : index
    %c0_219 = arith.constant 0 : index
    %c0_220 = arith.constant 0 : index
    %200 = vector.load %arg10[%c2_218, %c0_219, %c0_220] : memref<9x32x32xbf16, #tpu.memory_space<vmem>>, vector<1x32x32xbf16>
    %201 = vector.shape_cast %200 : vector<1x32x32xbf16> to vector<32x32xbf16>
    %cst_221 = arith.constant dense<0.000000e+00> : vector<128x32xf32>
    %202 = tpu.matmul %199, %201, %cst_221 {dimension_numbers = #tpu.dot_dimension_numbers<[1], [0], [0], [1], [0, 0, 1, 1], [], []>} : vector<128x32xbf16>, vector<32x32xbf16>, vector<128x32xf32> -> vector<128x32xf32>
    %203 = arith.addf %196, %202 : vector<128x32xf32>
    %c0_222 = arith.constant 0 : index
    %c1_223 = arith.constant 1 : index
    %c0_224 = arith.constant 0 : index
    %c0_225 = arith.constant 0 : index
    %204 = vector.load %arg17[%c0_222, %c1_223, %c0_224, %c0_225] : memref<2x10x10x32xf32, #tpu.memory_space<vmem>>, vector<2x8x8x32xf32>
    %205 = vector.shape_cast %204 : vector<2x8x8x32xf32> to vector<128x32xf32>
    %206 = arith.truncf %205 : vector<128x32xf32> to vector<128x32xbf16>
    %c3_226 = arith.constant 3 : index
    %c0_227 = arith.constant 0 : index
    %c0_228 = arith.constant 0 : index
    %207 = vector.load %arg10[%c3_226, %c0_227, %c0_228] : memref<9x32x32xbf16, #tpu.memory_space<vmem>>, vector<1x32x32xbf16>
    %208 = vector.shape_cast %207 : vector<1x32x32xbf16> to vector<32x32xbf16>
    %cst_229 = arith.constant dense<0.000000e+00> : vector<128x32xf32>
    %209 = tpu.matmul %206, %208, %cst_229 {dimension_numbers = #tpu.dot_dimension_numbers<[1], [0], [0], [1], [0, 0, 1, 1], [], []>} : vector<128x32xbf16>, vector<32x32xbf16>, vector<128x32xf32> -> vector<128x32xf32>
    %210 = arith.addf %203, %209 : vector<128x32xf32>
    %c0_230 = arith.constant 0 : index
    %c1_231 = arith.constant 1 : index
    %c1_232 = arith.constant 1 : index
    %c0_233 = arith.constant 0 : index
    %211 = vector.load %arg17[%c0_230, %c1_231, %c1_232, %c0_233] : memref<2x10x10x32xf32, #tpu.memory_space<vmem>>, vector<2x8x8x32xf32>
    %212 = vector.shape_cast %211 : vector<2x8x8x32xf32> to vector<128x32xf32>
    %213 = arith.truncf %212 : vector<128x32xf32> to vector<128x32xbf16>
    %c4_234 = arith.constant 4 : index
    %c0_235 = arith.constant 0 : index
    %c0_236 = arith.constant 0 : index
    %214 = vector.load %arg10[%c4_234, %c0_235, %c0_236] : memref<9x32x32xbf16, #tpu.memory_space<vmem>>, vector<1x32x32xbf16>
    %215 = vector.shape_cast %214 : vector<1x32x32xbf16> to vector<32x32xbf16>
    %cst_237 = arith.constant dense<0.000000e+00> : vector<128x32xf32>
    %216 = tpu.matmul %213, %215, %cst_237 {dimension_numbers = #tpu.dot_dimension_numbers<[1], [0], [0], [1], [0, 0, 1, 1], [], []>} : vector<128x32xbf16>, vector<32x32xbf16>, vector<128x32xf32> -> vector<128x32xf32>
    %217 = arith.addf %210, %216 : vector<128x32xf32>
    %c0_238 = arith.constant 0 : index
    %c1_239 = arith.constant 1 : index
    %c2_240 = arith.constant 2 : index
    %c0_241 = arith.constant 0 : index
    %218 = vector.load %arg17[%c0_238, %c1_239, %c2_240, %c0_241] : memref<2x10x10x32xf32, #tpu.memory_space<vmem>>, vector<2x8x8x32xf32>
    %219 = vector.shape_cast %218 : vector<2x8x8x32xf32> to vector<128x32xf32>
    %220 = arith.truncf %219 : vector<128x32xf32> to vector<128x32xbf16>
    %c5_242 = arith.constant 5 : index
    %c0_243 = arith.constant 0 : index
    %c0_244 = arith.constant 0 : index
    %221 = vector.load %arg10[%c5_242, %c0_243, %c0_244] : memref<9x32x32xbf16, #tpu.memory_space<vmem>>, vector<1x32x32xbf16>
    %222 = vector.shape_cast %221 : vector<1x32x32xbf16> to vector<32x32xbf16>
    %cst_245 = arith.constant dense<0.000000e+00> : vector<128x32xf32>
    %223 = tpu.matmul %220, %222, %cst_245 {dimension_numbers = #tpu.dot_dimension_numbers<[1], [0], [0], [1], [0, 0, 1, 1], [], []>} : vector<128x32xbf16>, vector<32x32xbf16>, vector<128x32xf32> -> vector<128x32xf32>
    %224 = arith.addf %217, %223 : vector<128x32xf32>
    %c0_246 = arith.constant 0 : index
    %c2_247 = arith.constant 2 : index
    %c0_248 = arith.constant 0 : index
    %c0_249 = arith.constant 0 : index
    %225 = vector.load %arg17[%c0_246, %c2_247, %c0_248, %c0_249] : memref<2x10x10x32xf32, #tpu.memory_space<vmem>>, vector<2x8x8x32xf32>
    %226 = vector.shape_cast %225 : vector<2x8x8x32xf32> to vector<128x32xf32>
    %227 = arith.truncf %226 : vector<128x32xf32> to vector<128x32xbf16>
    %c6_250 = arith.constant 6 : index
    %c0_251 = arith.constant 0 : index
    %c0_252 = arith.constant 0 : index
    %228 = vector.load %arg10[%c6_250, %c0_251, %c0_252] : memref<9x32x32xbf16, #tpu.memory_space<vmem>>, vector<1x32x32xbf16>
    %229 = vector.shape_cast %228 : vector<1x32x32xbf16> to vector<32x32xbf16>
    %cst_253 = arith.constant dense<0.000000e+00> : vector<128x32xf32>
    %230 = tpu.matmul %227, %229, %cst_253 {dimension_numbers = #tpu.dot_dimension_numbers<[1], [0], [0], [1], [0, 0, 1, 1], [], []>} : vector<128x32xbf16>, vector<32x32xbf16>, vector<128x32xf32> -> vector<128x32xf32>
    %231 = arith.addf %224, %230 : vector<128x32xf32>
    %c0_254 = arith.constant 0 : index
    %c2_255 = arith.constant 2 : index
    %c1_256 = arith.constant 1 : index
    %c0_257 = arith.constant 0 : index
    %232 = vector.load %arg17[%c0_254, %c2_255, %c1_256, %c0_257] : memref<2x10x10x32xf32, #tpu.memory_space<vmem>>, vector<2x8x8x32xf32>
    %233 = vector.shape_cast %232 : vector<2x8x8x32xf32> to vector<128x32xf32>
    %234 = arith.truncf %233 : vector<128x32xf32> to vector<128x32xbf16>
    %c7_258 = arith.constant 7 : index
    %c0_259 = arith.constant 0 : index
    %c0_260 = arith.constant 0 : index
    %235 = vector.load %arg10[%c7_258, %c0_259, %c0_260] : memref<9x32x32xbf16, #tpu.memory_space<vmem>>, vector<1x32x32xbf16>
    %236 = vector.shape_cast %235 : vector<1x32x32xbf16> to vector<32x32xbf16>
    %cst_261 = arith.constant dense<0.000000e+00> : vector<128x32xf32>
    %237 = tpu.matmul %234, %236, %cst_261 {dimension_numbers = #tpu.dot_dimension_numbers<[1], [0], [0], [1], [0, 0, 1, 1], [], []>} : vector<128x32xbf16>, vector<32x32xbf16>, vector<128x32xf32> -> vector<128x32xf32>
    %238 = arith.addf %231, %237 : vector<128x32xf32>
    %c0_262 = arith.constant 0 : index
    %c2_263 = arith.constant 2 : index
    %c2_264 = arith.constant 2 : index
    %c0_265 = arith.constant 0 : index
    %239 = vector.load %arg17[%c0_262, %c2_263, %c2_264, %c0_265] : memref<2x10x10x32xf32, #tpu.memory_space<vmem>>, vector<2x8x8x32xf32>
    %240 = vector.shape_cast %239 : vector<2x8x8x32xf32> to vector<128x32xf32>
    %241 = arith.truncf %240 : vector<128x32xf32> to vector<128x32xbf16>
    %c8_266 = arith.constant 8 : index
    %c0_267 = arith.constant 0 : index
    %c0_268 = arith.constant 0 : index
    %242 = vector.load %arg10[%c8_266, %c0_267, %c0_268] : memref<9x32x32xbf16, #tpu.memory_space<vmem>>, vector<1x32x32xbf16>
    %243 = vector.shape_cast %242 : vector<1x32x32xbf16> to vector<32x32xbf16>
    %cst_269 = arith.constant dense<0.000000e+00> : vector<128x32xf32>
    %244 = tpu.matmul %241, %243, %cst_269 {dimension_numbers = #tpu.dot_dimension_numbers<[1], [0], [0], [1], [0, 0, 1, 1], [], []>} : vector<128x32xbf16>, vector<32x32xbf16>, vector<128x32xf32> -> vector<128x32xf32>
    %245 = arith.addf %238, %244 : vector<128x32xf32>
    %cst_270 = arith.constant dense<0.000000e+00> : vector<32xf32>
    %246 = vector.multi_reduction <add>, %245, %cst_270 [0] : vector<128x32xf32> to vector<32xf32>
    %247 = vector.shape_cast %246 : vector<32xf32> to vector<1x32xf32>
    %c0_271 = arith.constant 0 : index
    %c0_272 = arith.constant 0 : index
    %248 = vector.load %arg14[%c0_271, %c0_272] : memref<32x8xf32, #tpu.memory_space<vmem>>, vector<32x8xf32>
    %cst_273 = arith.constant dense<0.000000e+00> : vector<1x8xf32>
    %249 = tpu.matmul %247, %248, %cst_273 {dimension_numbers = #tpu.dot_dimension_numbers<[1], [0], [0], [1], [0, 0, 1, 1], [], []>} : vector<1x32xf32>, vector<32x8xf32>, vector<1x8xf32> -> vector<1x8xf32>
    %cst_274 = arith.constant 0.001953125 : f32
    %250 = vector.broadcast %cst_274 : f32 to vector<1x8xf32>
    %251 = arith.mulf %249, %250 : vector<1x8xf32>
    %c0_275 = arith.constant 0 : index
    %c0_276 = arith.constant 0 : index
    %252 = vector.load %arg15[%c0_275, %c0_276] : memref<8x32xf32, #tpu.memory_space<vmem>>, vector<8x32xf32>
    %cst_277 = arith.constant dense<0.000000e+00> : vector<1x32xf32>
    %253 = tpu.matmul %251, %252, %cst_277 {dimension_numbers = #tpu.dot_dimension_numbers<[1], [0], [0], [1], [0, 0, 1, 1], [], []>} : vector<1x8xf32>, vector<8x32xf32>, vector<1x32xf32> -> vector<1x32xf32>
    %254 = vector.broadcast %253 : vector<1x32xf32> to vector<128x32xf32>
    %255 = arith.subf %245, %254 : vector<128x32xf32>
    %256 = arith.mulf %255, %255 : vector<128x32xf32>
    %cst_278 = arith.constant dense<0.000000e+00> : vector<32xf32>
    %257 = vector.multi_reduction <add>, %256, %cst_278 [0] : vector<128x32xf32> to vector<32xf32>
    %258 = vector.shape_cast %257 : vector<32xf32> to vector<1x32xf32>
    %c0_279 = arith.constant 0 : index
    %c0_280 = arith.constant 0 : index
    %259 = vector.load %arg14[%c0_279, %c0_280] : memref<32x8xf32, #tpu.memory_space<vmem>>, vector<32x8xf32>
    %cst_281 = arith.constant dense<0.000000e+00> : vector<1x8xf32>
    %260 = tpu.matmul %258, %259, %cst_281 {dimension_numbers = #tpu.dot_dimension_numbers<[1], [0], [0], [1], [0, 0, 1, 1], [], []>} : vector<1x32xf32>, vector<32x8xf32>, vector<1x8xf32> -> vector<1x8xf32>
    %cst_282 = arith.constant 0.001953125 : f32
    %261 = vector.broadcast %cst_282 : f32 to vector<1x8xf32>
    %262 = arith.mulf %260, %261 : vector<1x8xf32>
    %c0_283 = arith.constant 0 : index
    %c0_284 = arith.constant 0 : index
    %263 = vector.load %arg12[%c0_283, %c0_284] : memref<1x8xf32, #tpu.memory_space<vmem>>, vector<1x8xf32>
    %cst_285 = arith.constant 9.99999974E-6 : f32
    %264 = vector.broadcast %cst_285 : f32 to vector<1x8xf32>
    %265 = arith.addf %262, %264 : vector<1x8xf32>
    %266 = math.rsqrt %265 : vector<1x8xf32>
    %267 = arith.mulf %263, %266 : vector<1x8xf32>
    %c0_286 = arith.constant 0 : index
    %c0_287 = arith.constant 0 : index
    %268 = vector.load %arg15[%c0_286, %c0_287] : memref<8x32xf32, #tpu.memory_space<vmem>>, vector<8x32xf32>
    %cst_288 = arith.constant dense<0.000000e+00> : vector<1x32xf32>
    %269 = tpu.matmul %267, %268, %cst_288 {dimension_numbers = #tpu.dot_dimension_numbers<[1], [0], [0], [1], [0, 0, 1, 1], [], []>} : vector<1x8xf32>, vector<8x32xf32>, vector<1x32xf32> -> vector<1x32xf32>
    %270 = vector.broadcast %269 : vector<1x32xf32> to vector<128x32xf32>
    %271 = arith.mulf %255, %270 : vector<128x32xf32>
    %c0_289 = arith.constant 0 : index
    %c0_290 = arith.constant 0 : index
    %272 = vector.load %arg13[%c0_289, %c0_290] : memref<1x8xf32, #tpu.memory_space<vmem>>, vector<1x8xf32>
    %c0_291 = arith.constant 0 : index
    %c0_292 = arith.constant 0 : index
    %273 = vector.load %arg15[%c0_291, %c0_292] : memref<8x32xf32, #tpu.memory_space<vmem>>, vector<8x32xf32>
    %cst_293 = arith.constant dense<0.000000e+00> : vector<1x32xf32>
    %274 = tpu.matmul %272, %273, %cst_293 {dimension_numbers = #tpu.dot_dimension_numbers<[1], [0], [0], [1], [0, 0, 1, 1], [], []>} : vector<1x8xf32>, vector<8x32xf32>, vector<1x32xf32> -> vector<1x32xf32>
    %275 = vector.broadcast %274 : vector<1x32xf32> to vector<128x32xf32>
    %276 = arith.addf %271, %275 : vector<128x32xf32>
    %cst_294 = arith.constant 0.000000e+00 : f32
    %277 = vector.broadcast %cst_294 : f32 to vector<128x32xf32>
    %278 = arith.maximumf %276, %277 : vector<128x32xf32>
    %c0_295 = arith.constant 0 : index
    %c0_296 = arith.constant 0 : index
    %279 = vector.load %arg16[%c0_295, %c0_296] : memref<128x32xf32, #tpu.memory_space<vmem>>, vector<128x32xf32>
    tpu.vector_store %arg16[%c0_295, %c0_296], %278 {strides = array<i32>} : memref<128x32xf32, #tpu.memory_space<vmem>>, vector<128x32xf32>,
    return
  }
  func.func @transform_0(%arg0: i32) -> (i32, i32) {
    %c0_i32 = arith.constant 0 : i32
    %c0_i32_0 = arith.constant 0 : i32
    %c0_i32_1 = arith.constant 0 : i32
    return %c0_i32, %c0_i32_0 : i32, i32
  }
  func.func @transform_1(%arg0: i32) -> (i32, i32, i32, i32) {
    %c0_i32 = arith.constant 0 : i32
    %c0_i32_0 = arith.constant 0 : i32
    %c0_i32_1 = arith.constant 0 : i32
    %c0_i32_2 = arith.constant 0 : i32
    %c0_i32_3 = arith.constant 0 : i32
    return %c0_i32, %c0_i32_0, %c0_i32_1, %c0_i32_2 : i32, i32, i32, i32
  }
  func.func @transform_2(%arg0: i32) -> (i32, i32) {
    %c0_i32 = arith.constant 0 : i32
    %c0_i32_0 = arith.constant 0 : i32
    %c0_i32_1 = arith.constant 0 : i32
    return %c0_i32, %c0_i32_0 : i32, i32
  }
  func.func @transform_3(%arg0: i32) -> (i32, i32) {
    %c0_i32 = arith.constant 0 : i32
    %c0_i32_0 = arith.constant 0 : i32
    %c0_i32_1 = arith.constant 0 : i32
    return %c0_i32, %c0_i32_0 : i32, i32
  }
  func.func @transform_4(%arg0: i32) -> (i32, i32, i32) {
    %c0_i32 = arith.constant 0 : i32
    %c0_i32_0 = arith.constant 0 : i32
    %c0_i32_1 = arith.constant 0 : i32
    %c0_i32_2 = arith.constant 0 : i32
    return %c0_i32, %c0_i32_0, %c0_i32_1 : i32, i32, i32
  }
  func.func @transform_5(%arg0: i32) -> (i32, i32, i32) {
    %c0_i32 = arith.constant 0 : i32
    %c0_i32_0 = arith.constant 0 : i32
    %c0_i32_1 = arith.constant 0 : i32
    %c0_i32_2 = arith.constant 0 : i32
    return %c0_i32, %c0_i32_0, %c0_i32_1 : i32, i32, i32
  }
  func.func @transform_6(%arg0: i32) -> (i32, i32) {
    %c0_i32 = arith.constant 0 : i32
    %c0_i32_0 = arith.constant 0 : i32
    %c0_i32_1 = arith.constant 0 : i32
    return %c0_i32, %c0_i32_0 : i32, i32
  }
  func.func @transform_7(%arg0: i32) -> (i32, i32) {
    %c0_i32 = arith.constant 0 : i32
    %c0_i32_0 = arith.constant 0 : i32
    %c0_i32_1 = arith.constant 0 : i32
    return %c0_i32, %c0_i32_0 : i32, i32
  }
  func.func @transform_8(%arg0: i32) -> (i32, i32) {
    %c0_i32 = arith.constant 0 : i32
    %c0_i32_0 = arith.constant 0 : i32
    %c0_i32_1 = arith.constant 0 : i32
    return %c0_i32, %c0_i32_0 : i32, i32
  }
  func.func @transform_9(%arg0: i32) -> (i32, i32, i32) {
    %c0_i32 = arith.constant 0 : i32
    %c0_i32_0 = arith.constant 0 : i32
    %c0_i32_1 = arith.constant 0 : i32
    %c0_i32_2 = arith.constant 0 : i32
    return %c0_i32, %c0_i32_0, %c0_i32_1 : i32, i32, i32
  }
  func.func @transform_10(%arg0: i32) -> (i32, i32) {
    %c0_i32 = arith.constant 0 : i32
    %c0_i32_0 = arith.constant 0 : i32
    %c0_i32_1 = arith.constant 0 : i32
    return %c0_i32, %c0_i32_0 : i32, i32
  }
  func.func @transform_11(%arg0: i32) -> (i32, i32) {
    %c0_i32 = arith.constant 0 : i32
    %c0_i32_0 = arith.constant 0 : i32
    %c0_i32_1 = arith.constant 0 : i32
    return %c0_i32, %c0_i32_0 : i32, i32
  }
  func.func @transform_12(%arg0: i32) -> (i32, i32) {
    %c0_i32 = arith.constant 0 : i32
    %c0_i32_0 = arith.constant 0 : i32
    %c0_i32_1 = arith.constant 0 : i32
    return %c0_i32, %c0_i32_0 : i32, i32
  }
  func.func @transform_13(%arg0: i32) -> (i32, i32) {
    %c0_i32 = arith.constant 0 : i32
    %c0_i32_0 = arith.constant 0 : i32
    %c0_i32_1 = arith.constant 0 : i32
    return %c0_i32, %c0_i32_0 : i32, i32
  }
  func.func @transform_14(%arg0: i32) -> (i32, i32) {
    %c0_i32 = arith.constant 0 : i32
    %c0_i32_0 = arith.constant 0 : i32
    %c0_i32_1 = arith.constant 0 : i32
    return %c0_i32, %c0_i32_0 : i32, i32
  }
  func.func @transform_15(%arg0: i32) -> (i32, i32) {
    %c0_i32 = arith.constant 0 : i32
    %c0_i32_0 = arith.constant 0 : i32
    %c0_i32_1 = arith.constant 0 : i32
    return %c0_i32, %c0_i32_0 : i32, i32
  }
}

</mosaic_0001>

<bundles_post_ra>
// kernel: tile.23
= control target key start
LH: loop header
LB: loop body
LE: loop exit
PB: predicated region body
PF: predicated region fallthrough
CT: control target
= control target key end

     0   :  { %s22_s0 = inlined_call_operand.vmem [shape: f32[8], index: 0, kind: input, shape index: {}]   ;;  %s23_s1 = inlined_call_operand.vmem [shape: f32[4,8], index: 1, kind: output, shape index: {}]  }
   0x1   :  { %v4_v0 = vld [vmem:[%s22_s0] ss:$0 sm:$0xff] }
   0x2   :  { %5 = vst [vmem:[%s23_s1] sm:$0xf] %v4_v0 }

// kernel: tile.24
= control target key start
LH: loop header
LB: loop body
LE: loop exit
PB: predicated region body
PF: predicated region fallthrough
CT: control target
= control target key end

     0   :  { %vm7_vm0 = vcmask 64512   ;;  %s37_s8 = smov 8   ;;  %s38_s9 = smov 16   ;;  %vm13_vm1 = vcmask 261312   ;;  %vm19_vm2 = vcmask 195712   ;;  %vm25_vm3 = vcmask 130112   ;;  %s55_s0 = inlined_call_operand.vmem [shape: f32[4,8], index: 0, kind: input, shape index: {}]   ;;  %s56_s1 = inlined_call_operand.vmem [shape: f32[1,32], index: 1, kind: output, shape index: {}]  }
   0x1   :  { %v4_v0 = vld [vmem:[%s55_s0] sm:$0xf]  ;;  %s36_s0 = smov 24  }
   0x2   :  { %5 = vst [vmem:[#allocation1] sm:$0xf] %v4_v0 }
   0x9   :  { %v10_v1 = vld [vmem:[#allocation1 + $0x3] sm:$0x1]   ;;  %v22_v2 = vld [vmem:[#allocation1 + $0x1] sm:$0x1]   ;;  %v6_v3 = vld [vmem:[#allocation1] sm:$0x1]  }
   0xa   :  { %11 = vrot.lane.b32.xlu0 %v10_v1, %s36_s0  ;;  %23 = vrot.lane.b32.xlu1 %v22_v2, %s37_s8  ;;  %v16_v4 = vld [vmem:[#allocation1 + $0x2] sm:$0x1]   ;;  %8 = vst.msk [vmem:[#allocation0] sm:$0x1] %vm7_vm0, %v6_v3  }
   0xe   :  { %17 = vrot.lane.b32.xlu0 %v16_v4, %s38_s9 }
  0x7c   :  { %v12_v5 = vpop.permute.xlu0 %11   ;;  %v24_v6 = vpop.permute.xlu1 %23  }
  0x7d   :  { %14 = vst.msk [vmem:[#allocation0] sm:$0x1] %vm13_vm1, %v12_v5  }
  0x80   :  { %v18_v7 = vpop.permute.xlu0 %17  }
  0x81   :  { %20 = vst.msk [vmem:[#allocation0] sm:$0x1] %vm19_vm2, %v18_v7  }
  0x82   :  { %26 = vst.msk [vmem:[#allocation0] sm:$0x1] %vm25_vm3, %v24_v6  }
  0x89   :  { %v30_v8 = vld [vmem:[#allocation0] sm:$0x1] }
  0x8a   :  { %32 = vst [vmem:[%s56_s1] sm:$0x1] %v30_v8 }

// kernel: tile.39
= control target key start
LH: loop header
LB: loop body
LE: loop exit
PB: predicated region body
PF: predicated region fallthrough
CT: control target
= control target key end

     0   :  { %vm42_vm0 = vcmask 1047556   ;;  %vm44_vm1 = vcmask 64512   ;;  %s93_s22 = smov 8   ;;  %s94_s25 = smov 16   ;;  %vm54_vm2 = vcmask 261312   ;;  %vm64_vm3 = vcmask 195712   ;;  %s146_s0 = inlined_call_operand.vmem [shape: f32[4,8,8], index: 0, kind: input, shape index: {}]   ;;  %s147_s1 = inlined_call_operand.vmem [shape: f32[32,8], index: 1, kind: output, shape index: {}]  }
   0x1   :  { %v82_v0 = vld [vmem:[%s146_s0 + $0x1c] sm:$0xf]  ;;  %v83_v1 = vld [vmem:[%s146_s0 + $0x18] sm:$0xf]  ;;  %v84_v2 = vld [vmem:[%s146_s0 + $0x14] sm:$0xf] }
   0x2   :  { %8 = vst [vmem:[#allocation0 + $0x38] sm:$0xf] %v82_v0  ;;  %13 = vst [vmem:[#allocation0 + $0x30] sm:$0xf] %v83_v1  ;;  %v85_v3 = vld [vmem:[%s146_s0 + $0x10] sm:$0xf] }
   0x3   :  { %18 = vst [vmem:[#allocation0 + $0x28] sm:$0xf] %v84_v2  ;;  %v86_v4 = vld [vmem:[%s146_s0 + $0xc] sm:$0xf]  ;;  %v87_v5 = vld [vmem:[%s146_s0 + $0x8] sm:$0xf] }
   0x4   :  { %23 = vst [vmem:[#allocation0 + $0x20] sm:$0xf] %v85_v3  ;;  %28 = vst [vmem:[#allocation0 + $0x18] sm:$0xf] %v86_v4  ;;  %v88_v6 = vld [vmem:[%s146_s0 + $0x4] sm:$0xf] }
   0x5   :  { %33 = vst [vmem:[#allocation0 + $0x10] sm:$0xf] %v87_v5  ;;  %v38_v7 = vld [vmem:[%s146_s0] sm:$0xf]  ;;  %37 = vst [vmem:[#allocation0 + $0x8] sm:$0xf] %v88_v6 }
   0x6   :  { %39 = vst [vmem:[#allocation0] sm:$0xf] %v38_v7  ;;  %s92_s0 = smov 24   ;;  %vm74_vm4 = vcmask 130112  }
   0xb   :  { %v49_v8 = vld [vmem:[#allocation0 + $0x3] ss:$8 sm:$0xf0]   ;;  %v59_v9 = vld [vmem:[#allocation0 + $0x2] ss:$8 sm:$0xf0]  }
   0xc   :  { %v69_v14 = vld [vmem:[#allocation0 + $0x1] ss:$8 sm:$0xf0]   ;;  %v41_v17 = vld [vmem:[#allocation0] ss:$8 sm:$0xf0]  }
   0xd   :  { %v47_v10 = vld [vmem:[#allocation0 + $0x3] ss:$8 sm:$0xf]   ;;  %v57_v11 = vld [vmem:[#allocation0 + $0x2] ss:$8 sm:$0xf]  }
   0xe   :  { %v51_v12 = vsel %vm42_vm0, %v49_v8, %v47_v10  ;;  %v67_v13 = vld [vmem:[#allocation0 + $0x1] ss:$8 sm:$0xf]   ;;  %v40_v16 = vld [vmem:[#allocation0] ss:$8 sm:$0xf]   ;;  %v61_v18 = vsel %vm42_vm0, %v59_v9, %v57_v11 }
   0xf   :  { %52 = vrot.lane.b32.xlu0 %v51_v12, %s92_s0  ;;  %v71_v15 = vsel %vm42_vm0, %v69_v14, %v67_v13  ;;  %v43_v19 = vsel %vm42_vm0, %v41_v17, %v40_v16 }
  0x10   :  { %72 = vrot.lane.b32.xlu1 %v71_v15, %s93_s22  ;;  %45 = vst.msk [vmem:[%s147_s1] sm:$0xff] %vm44_vm1, %v43_v19  }
  0x13   :  { %62 = vrot.lane.b32.xlu0 %v61_v18, %s94_s25 }
  0x81   :  { %v53_v20 = vpop.permute.xlu0 %52  }
  0x82   :  { %55 = vst.msk [vmem:[%s147_s1] sm:$0xff] %vm54_vm2, %v53_v20   ;;  %v73_v21 = vpop.permute.xlu1 %72  }
  0x85   :  { %v63_v22 = vpop.permute.xlu0 %62  }
  0x86   :  { %65 = vst.msk [vmem:[%s147_s1] sm:$0xff] %vm64_vm3, %v63_v22  }
  0x87   :  { %75 = vst.msk [vmem:[%s147_s1] sm:$0xff] %vm74_vm4, %v73_v21  }

// kernel: decode_layer_forward.1
= control target key start
LH: loop header
LB: loop body
LE: loop exit
PB: predicated region body
PF: predicated region fallthrough
CT: control target
= control target key end

     0   :  { %vm140_vm0 = vcmask 1043456   ;;  %vm115_vm1 = vcmask 64512   ;;  %vm241_vm2 = vcmask 261120   ;;  %vm243_vm3 = vcmask 254976   ;;  %s10076_s2 = inlined_call_operand.vmem [shape: bf16[8,32], index: 2, kind: input, shape index: {}]   ;;  %s10077_s0 = inlined_call_operand.vmem [shape: bf16[128,8], index: 0, kind: input, shape index: {}]   ;;  %s10078_s4 = inlined_call_operand.vmem [shape: bf16[9,32,32], index: 4, kind: input, shape index: {}]   ;;  %s10079_s3 = inlined_call_operand.vmem [shape: f32[1,32], index: 3, kind: input, shape index: {}]   ;;  %s10080_s5 = inlined_call_operand.vmem [shape: bf16[9,16,32], index: 5, kind: input, shape index: {}]   ;;  %s10081_s1 = inlined_call_operand.vmem [shape: f32[2,8,8,16], index: 1, kind: input, shape index: {}]   ;;  %s10082_s13 = inlined_call_operand.vmem [shape: f32[32,8], index: 13, kind: input, shape index: {}]   ;;  %s10083_s6 = inlined_call_operand.vmem [shape: f32[1,32], index: 6, kind: input, shape index: {}]   ;;  %s10084_s14 = inlined_call_operand.vmem [shape: f32[8,32], index: 14, kind: input, shape index: {}]   ;;  %s10085_s7 = inlined_call_operand.vmem [shape: f32[1,8], index: 7, kind: input, shape index: {}]   ;;  %s10086_s8 = inlined_call_operand.vmem [shape: f32[1,8], index: 8, kind: input, shape index: {}]   ;;  %s10087_s9 = inlined_call_operand.vmem [shape: bf16[9,32,32], index: 9, kind: input, shape index: {}]   ;;  %s10088_s10 = inlined_call_operand.vmem [shape: f32[1,32], index: 10, kind: input, shape index: {}]   ;;  %s10089_s11 = inlined_call_operand.vmem [shape: f32[1,8], index: 11, kind: input, shape index: {}]   ;;  %s10090_s12 = inlined_call_operand.vmem [shape: f32[1,8], index: 12, kind: input, shape index: {}]   ;;  %s10091_s15 = inlined_call_operand.vmem [shape: f32[128,32], index: 15, kind: output, shape index: {}]  }
   0x1   :  { %v67_v0 = vld [vmem:[%s10076_s2] sm:$0xf]  ;;  %v7997_v3 = vld [vmem:[%s10077_s0 + $0x8] sm:$0xff]   ;;  %v7998_v4 = vld [vmem:[%s10077_s0 + $0x10] sm:$0xff]   ;;  %v10092_v10 = vmov 0.0   ;;  %vm283_vm4 = vcmask 130048  }
   0x2   :  { %7992 = vmatprep.subr.msk.bf16.mxu0 %vm140_vm0, %v67_v0  ;;  %v142_v1 = vsel %vm140_vm0, %v67_v0, 0  ;;  %v7996_v2 = vld [vmem:[%s10077_s0] sm:$0xff]   ;;  %v7999_v5 = vld [vmem:[%s10077_s0 + $0x18] sm:$0xff]   ;;  %v8001_v7 = vld [vmem:[%s10077_s0 + $0x28] sm:$0xff]   ;;  %249 = vst.msk [vmem:[#allocation2 + $0x30] sm:$0xff] %vm241_vm2, %v10092_v10  ;;  %vm285_vm5 = vcmask 123904  }
   0x3   :  { %6919 = vmatpush3.bf16.msra.mxu0 %v142_v1  ;;  %6920 = vmatprep.mubr.msk.bf16.mxu0 %vm115_vm1, %v7996_v2  ;;  %v8000_v6 = vld [vmem:[%s10077_s0 + $0x20] sm:$0xff]   ;;  %v8002_v8 = vld [vmem:[%s10077_s0 + $0x30] sm:$0xff]   ;;  %v8003_v9 = vld [vmem:[%s10077_s0 + $0x38] sm:$0xff]   ;;  %250 = vst.msk [vmem:[#allocation2 + $0x38] sm:$0x3] %vm243_vm3, %v10092_v10  ;;  %vm8055_vm6 = vmmov 0  }
   0x4   :  { %242 = vst.msk [vmem:[#allocation2] sm:$0xff] %vm241_vm2, %v10092_v10  ;;  %245 = vst.msk [vmem:[#allocation2 + $0x10] sm:$0xff] %vm241_vm2, %v10092_v10  ;;  %v8004_v11 = vld [vmem:[%s10078_s4] sm:$0xff]   ;;  %v8005_v12 = vld [vmem:[%s10078_s4 + $0x8] sm:$0xff]  }
   0x5   :  { %244 = vst.msk [vmem:[#allocation2 + $0x8] sm:$0x3] %vm243_vm3, %v10092_v10  ;;  %246 = vst.msk [vmem:[#allocation2 + $0x18] sm:$0x3] %vm243_vm3, %v10092_v10  ;;  %6936 = vmatprep.subr.bf16.mxu0 %v8004_v11  ;;  %v8260_v13 = vld [vmem:[%s10078_s4 + $0x30] sm:$0xff]   ;;  %v8267_v14 = vld [vmem:[%s10078_s4 + $0x38] sm:$0xff]  }
   0x6   :  { %6921 = vmatmul.mubr.msk.bf16.vlgmr.msra.gmra.mrb[0].mxu0 %vm115_vm1, %v7997_v3  ;;  %247 = vst.msk [vmem:[#allocation2 + $0x20] sm:$0xff] %vm241_vm2, %v10092_v10  ;;  %251 = vst.msk [vmem:[#allocation2 + $0x40] sm:$0xff] %vm241_vm2, %v10092_v10  ;;  %7556 = vmatprep.subr.bf16.mxu1 %v8260_v13  ;;  %v8274_v15 = vld [vmem:[%s10078_s4 + $0x40] sm:$0xff]   ;;  %v8010_v16 = vld [vmem:[%s10078_s4 + $0x10] sm:$0xff]  }
   0x7   :  { %6924 = vmatprep.mubr.msk.bf16.mxu0 %vm115_vm1, %v7998_v4  ;;  %248 = vst.msk [vmem:[#allocation2 + $0x28] sm:$0x3] %vm243_vm3, %v10092_v10  ;;  %252 = vst.msk [vmem:[#allocation2 + $0x48] sm:$0x3] %vm243_vm3, %v10092_v10  ;;  %6937 = vmatpush3.bf16.msra.mxu0 %v8004_v11  ;;  %v8283_v17 = vld [vmem:[%s10079_s3] ss:$0 sm:$0xff] }
   0x8   :  { %253 = vst.msk [vmem:[#allocation2 + $0x50] sm:$0xff] %vm241_vm2, %v10092_v10  ;;  %255 = vst.msk [vmem:[#allocation2 + $0x60] sm:$0xff] %vm241_vm2, %v10092_v10  ;;  %6938 = vmatprep.subr.bf16.mxu0 %v8005_v12  ;;  %7558 = vmatpush3.bf16.msra.mxu1 %v8260_v13  ;;  %v8011_v40 = vld [vmem:[%s10078_s4 + $0x18] sm:$0xff]   ;;  %v8327_v50 = vld [vmem:[%s10078_s4 + $0x20] sm:$0xff]  }
   0x9   :  { %254 = vst.msk [vmem:[#allocation2 + $0x58] sm:$0x3] %vm243_vm3, %v10092_v10  ;;  %256 = vst.msk [vmem:[#allocation2 + $0x68] sm:$0x3] %vm243_vm3, %v10092_v10  ;;  %7557 = vmatprep.subr.bf16.mxu1 %v8267_v14  ;;  %v8009_v59 = vld [vmem:[%s10078_s4 + $0x48] sm:$0xff]  }
   0xa   :  { %257 = vst.msk [vmem:[#allocation2 + $0x70] sm:$0xff] %vm241_vm2, %v10092_v10  ;;  %259 = vst.msk [vmem:[#allocation2 + $0x80] sm:$0xff] %vm241_vm2, %v10092_v10 }
   0xb   :  { %258 = vst.msk [vmem:[#allocation2 + $0x78] sm:$0x3] %vm243_vm3, %v10092_v10  ;;  %260 = vst.msk [vmem:[#allocation2 + $0x88] sm:$0x3] %vm243_vm3, %v10092_v10  ;;  %6939 = vmatpush3.bf16.msra.mxu0 %v8005_v12  ;;  %v383_v29 = vld [vmem:[#allocation2] sm:$0xff] }
   0xc   :  { %261 = vst.msk [vmem:[#allocation2 + $0x90] sm:$0xff] %vm241_vm2, %v10092_v10  ;;  %263 = vst.msk [vmem:[#allocation2 + $0xa0] sm:$0xff] %vm241_vm2, %v10092_v10  ;;  %7559 = vmatpush3.bf16.msra.mxu1 %v8267_v14  ;;  %6956 = vmatprep.subr.bf16.mxu0 %v8010_v16 }
   0xd   :  { %262 = vst.msk [vmem:[#allocation2 + $0x98] sm:$0x3] %vm243_vm3, %v10092_v10  ;;  %264 = vst.msk [vmem:[#allocation2 + $0xa8] sm:$0x3] %vm243_vm3, %v10092_v10  ;;  %7016 = vmatprep.subr.bf16.mxu1 %v8274_v15 }
   0xe   :  { %6925 = vmatmul.mubr.msk.bf16.gmra.mrb[4].mxu0 %vm115_vm1, %v7999_v5  ;;  %265 = vst.msk [vmem:[#allocation2 + $0xb0] sm:$0xff] %vm241_vm2, %v10092_v10  ;;  %267 = vst.msk [vmem:[#allocation2 + $0xc0] sm:$0xff] %vm241_vm2, %v10092_v10  ;;  %v8012_v5 = vld [vmem:[%s10078_s4 + $0x50] sm:$0xff]  }
   0xf   :  { %6928 = vmatprep.mubr.msk.bf16.mxu0 %vm115_vm1, %v8000_v6  ;;  %266 = vst.msk [vmem:[#allocation2 + $0xb8] sm:$0x3] %vm243_vm3, %v10092_v10  ;;  %268 = vst.msk [vmem:[#allocation2 + $0xc8] sm:$0x3] %vm243_vm3, %v10092_v10 }
  0x10   :  { %269 = vst.msk [vmem:[#allocation2 + $0xd0] sm:$0xff] %vm241_vm2, %v10092_v10  ;;  %271 = vst.msk [vmem:[#allocation2 + $0xe0] sm:$0xff] %vm241_vm2, %v10092_v10 }
  0x11   :  { %270 = vst.msk [vmem:[#allocation2 + $0xd8] sm:$0x3] %vm243_vm3, %v10092_v10  ;;  %272 = vst.msk [vmem:[#allocation2 + $0xe8] sm:$0x3] %vm243_vm3, %v10092_v10 }
  0x12   :  { %273 = vst.msk [vmem:[#allocation2 + $0xf0] sm:$0xff] %vm241_vm2, %v10092_v10  ;;  %275 = vst.msk [vmem:[#allocation2 + $0x100] sm:$0xff] %vm241_vm2, %v10092_v10 }
  0x13   :  { %274 = vst.msk [vmem:[#allocation2 + $0xf8] sm:$0x3] %vm243_vm3, %v10092_v10  ;;  %276 = vst.msk [vmem:[#allocation2 + $0x108] sm:$0x3] %vm243_vm3, %v10092_v10  ;;  %v391_v63 = vld [vmem:[#allocation2 + $0xa0] sm:$0xff] }
  0x14   :  { %277 = vst.msk [vmem:[#allocation2 + $0x110] sm:$0xff] %vm241_vm2, %v10092_v10  ;;  %279 = vst.msk [vmem:[#allocation2 + $0x120] sm:$0xff] %vm241_vm2, %v10092_v10 }
  0x15   :  { %278 = vst.msk [vmem:[#allocation2 + $0x118] sm:$0x3] %vm243_vm3, %v10092_v10  ;;  %280 = vst.msk [vmem:[#allocation2 + $0x128] sm:$0x3] %vm243_vm3, %v10092_v10 }
  0x16   :  { %6929 = vmatmul.mubr.msk.bf16.gmra.mrb[8].mxu0 %vm115_vm1, %v8001_v7  ;;  %281 = vst.msk [vmem:[#allocation2 + $0x130] sm:$0xff] %vm241_vm2, %v10092_v10 }
  0x17   :  { %6932 = vmatprep.mubr.msk.bf16.mxu0 %vm115_vm1, %v8002_v8  ;;  %282 = vst.msk [vmem:[#allocation2 + $0x138] sm:$0x3] %vm243_vm3, %v10092_v10 }
  0x18   :  { %284 = vst.msk [vmem:[#allocation3] sm:$0xff] %vm283_vm4, %v10092_v10  ;;  %287 = vst.msk [vmem:[#allocation3 + $0x10] sm:$0xff] %vm283_vm4, %v10092_v10 }
  0x19   :  { %288 = vst.msk [vmem:[#allocation3 + $0x18] sm:$0x3] %vm285_vm5, %v10092_v10  ;;  %286 = vst.msk [vmem:[#allocation3 + $0x8] sm:$0x3] %vm285_vm5, %v10092_v10 }
  0x1a   :  { %289 = vst.msk [vmem:[#allocation3 + $0x20] sm:$0xff] %vm283_vm4, %v10092_v10  ;;  %291 = vst.msk [vmem:[#allocation3 + $0x30] sm:$0xff] %vm283_vm4, %v10092_v10 }
  0x1b   :  { %290 = vst.msk [vmem:[#allocation3 + $0x28] sm:$0x3] %vm285_vm5, %v10092_v10  ;;  %292 = vst.msk [vmem:[#allocation3 + $0x38] sm:$0x3] %vm285_vm5, %v10092_v10 }
  0x1c   :  { %293 = vst.msk [vmem:[#allocation3 + $0x40] sm:$0xff] %vm283_vm4, %v10092_v10  ;;  %295 = vst.msk [vmem:[#allocation3 + $0x50] sm:$0xff] %vm283_vm4, %v10092_v10 }
  0x1d   :  { %294 = vst.msk [vmem:[#allocation3 + $0x48] sm:$0x3] %vm285_vm5, %v10092_v10  ;;  %296 = vst.msk [vmem:[#allocation3 + $0x58] sm:$0x3] %vm285_vm5, %v10092_v10 }
  0x1e   :  { %6933 = vmatmul.mubr.msk.bf16.gmra.mrb[12].mxu0 %vm115_vm1, %v8003_v9  ;;  %297 = vst.msk [vmem:[#allocation3 + $0x60] sm:$0xff] %vm283_vm4, %v10092_v10  ;;  %299 = vst.msk [vmem:[#allocation3 + $0x70] sm:$0xff] %vm283_vm4, %v10092_v10 }
  0x1f   :  { %298 = vst.msk [vmem:[#allocation3 + $0x68] sm:$0x3] %vm285_vm5, %v10092_v10  ;;  %300 = vst.msk [vmem:[#allocation3 + $0x78] sm:$0x3] %vm285_vm5, %v10092_v10 }
  0x20   :  { %301 = vst.msk [vmem:[#allocation3 + $0x80] sm:$0xff] %vm283_vm4, %v10092_v10  ;;  %303 = vst.msk [vmem:[#allocation3 + $0x90] sm:$0xff] %vm283_vm4, %v10092_v10 }
  0x21   :  { %302 = vst.msk [vmem:[#allocation3 + $0x88] sm:$0x3] %vm285_vm5, %v10092_v10  ;;  %304 = vst.msk [vmem:[#allocation3 + $0x98] sm:$0x3] %vm285_vm5, %v10092_v10 }
  0x22   :  { %305 = vst.msk [vmem:[#allocation3 + $0xa0] sm:$0xff] %vm283_vm4, %v10092_v10  ;;  %307 = vst.msk [vmem:[#allocation3 + $0xb0] sm:$0xff] %vm283_vm4, %v10092_v10 }
  0x23   :  { %306 = vst.msk [vmem:[#allocation3 + $0xa8] sm:$0x3] %vm285_vm5, %v10092_v10  ;;  %308 = vst.msk [vmem:[#allocation3 + $0xb8] sm:$0x3] %vm285_vm5, %v10092_v10 }
  0x24   :  { %309 = vst.msk [vmem:[#allocation3 + $0xc0] sm:$0xff] %vm283_vm4, %v10092_v10  ;;  %311 = vst.msk [vmem:[#allocation3 + $0xd0] sm:$0xff] %vm283_vm4, %v10092_v10 }
  0x25   :  { %310 = vst.msk [vmem:[#allocation3 + $0xc8] sm:$0x3] %vm285_vm5, %v10092_v10  ;;  %312 = vst.msk [vmem:[#allocation3 + $0xd8] sm:$0x3] %vm285_vm5, %v10092_v10 }
  0x26   :  { %313 = vst.msk [vmem:[#allocation3 + $0xe0] sm:$0xff] %vm283_vm4, %v10092_v10  ;;  %315 = vst.msk [vmem:[#allocation3 + $0xf0] sm:$0xff] %vm283_vm4, %v10092_v10 }
  0x27   :  { %314 = vst.msk [vmem:[#allocation3 + $0xe8] sm:$0x3] %vm285_vm5, %v10092_v10  ;;  %316 = vst.msk [vmem:[#allocation3 + $0xf8] sm:$0x3] %vm285_vm5, %v10092_v10 }
  0x28   :  { %317 = vst.msk [vmem:[#allocation3 + $0x100] sm:$0xff] %vm283_vm4, %v10092_v10  ;;  %319 = vst.msk [vmem:[#allocation3 + $0x110] sm:$0xff] %vm283_vm4, %v10092_v10 }
  0x29   :  { %318 = vst.msk [vmem:[#allocation3 + $0x108] sm:$0x3] %vm285_vm5, %v10092_v10  ;;  %320 = vst.msk [vmem:[#allocation3 + $0x118] sm:$0x3] %vm285_vm5, %v10092_v10 }
  0x2a   :  { %321 = vst.msk [vmem:[#allocation3 + $0x120] sm:$0xff] %vm283_vm4, %v10092_v10  ;;  %323 = vst.msk [vmem:[#allocation3 + $0x130] sm:$0xff] %vm283_vm4, %v10092_v10 }
  0x2b   :  { %322 = vst.msk [vmem:[#allocation3 + $0x128] sm:$0x3] %vm285_vm5, %v10092_v10  ;;  %324 = vst.msk [vmem:[#allocation3 + $0x138] sm:$0x3] %vm285_vm5, %v10092_v10 }
  0xd9   :  { %v6922_v18 = vpop.f32.mrb[0].mxu0 }
  0xda   :  { %v187_v19 = vadd.f32 %v6922_v18, %v8283_v17  ;;  %v178_v20 = vpop.f32.mrb[1].mxu0 }
  0xdb   :  { %v179_v21 = vadd.f32 %v8283_v17, %v178_v20  ;;  %v6923_v22 = vpop.f32.mrb[2].mxu0 }
  0xdc   :  { %328 = vst.msk [vmem:[#allocation2 + $0x31] sm:$0xff] %vm241_vm2, %v187_v19  ;;  %v190_v23 = vadd.f32 %v6923_v22, %v8283_v17  ;;  %v181_v24 = vpop.f32.mrb[3].mxu0  ;;  %v560_v19 = vld [vmem:[#allocation2 + $0x1] sm:$0xff] }
  0xdd   :  { %326 = vst.msk [vmem:[#allocation2 + $0x11] sm:$0xff] %vm241_vm2, %v179_v21  ;;  %v182_v25 = vadd.f32 %v8283_v17, %v181_v24 }
  0xde   :  { %329 = vst.msk [vmem:[#allocation2 + $0x41] sm:$0xff] %vm241_vm2, %v190_v23 }
  0xdf   :  { %327 = vst.msk [vmem:[#allocation2 + $0x21] sm:$0xff] %vm241_vm2, %v182_v25 }
  0xe1   :  { %v6926_v26 = vpop.f32.mrb[4].mxu0 }
  0xe2   :  { %v203_v27 = vadd.f32 %v6926_v26, %v8283_v17  ;;  %v194_v28 = vpop.f32.mrb[5].mxu0 }
  0xe3   :  { %v195_v30 = vadd.f32 %v8283_v17, %v194_v28  ;;  %v6927_v31 = vpop.f32.mrb[6].mxu0  ;;  %v8305_v38 = vld [vmem:[#allocation2 + $0x30] sm:$0xff] }
  0xe4   :  { %332 = vst.msk [vmem:[#allocation2 + $0x71] sm:$0xff] %vm241_vm2, %v203_v27  ;;  %v206_v32 = vadd.f32 %v6927_v31, %v8283_v17  ;;  %v197_v33 = vpop.f32.mrb[7].mxu0  ;;  %v8297_v34 = vld [vmem:[#allocation2 + $0x10] sm:$0xff] }
  0xe5   :  { %330 = vst.msk [vmem:[#allocation2 + $0x51] sm:$0xff] %vm241_vm2, %v195_v30  ;;  %v198_v35 = vadd.f32 %v8283_v17, %v197_v33  ;;  %v399_v36 = vpack.c.bf16 %v8297_v34, %v383_v29  ;;  %v8322_v48 = vld [vmem:[#allocation2 + $0x40] sm:$0xff]  ;;  %v561_v20 = vld [vmem:[#allocation2 + $0x11] sm:$0xff] }
  0xe6   :  { %333 = vst.msk [vmem:[#allocation2 + $0x81] sm:$0xff] %vm241_vm2, %v206_v32  ;;  %v8303_v37 = vld [vmem:[#allocation2 + $0x20] sm:$0xff]  ;;  %v576_v27 = vpack.c.bf16 %v561_v20, %v560_v19  ;;  %v563_v32 = vld [vmem:[#allocation2 + $0x31] sm:$0xff] }
  0xe7   :  { %331 = vst.msk [vmem:[#allocation2 + $0x61] sm:$0xff] %vm241_vm2, %v198_v35  ;;  %6940 = vmatprep.mubr.msk.bf16.mxu0 %vm241_vm2, %v399_v36  ;;  %v8311_v39 = vpack.c.bf16 %v8305_v38, %v8303_v37  ;;  %v1095_v24 = vld [vmem:[#allocation2 + $0x21] sm:$0xff]  ;;  %v8013_v35 = vld [vmem:[%s10078_s4 + $0x58] sm:$0xff]  }
  0xe8   :  { %v1110_v29 = vpack.c.bf16 %v1095_v24, %v561_v20  ;;  %v564_v30 = vld [vmem:[#allocation2 + $0x41] sm:$0xff]  ;;  %v8388_v36 = vpack.c.bf16 %v563_v32, %v1095_v24 }
  0xe9   :  { %v6930_v41 = vpop.f32.mrb[8].mxu0  ;;  %6941 = vmatmul.mubr.msk.bf16.vlgmr.msra.gmra.mrb[16].mxu0 %vm241_vm2, %v8311_v39  ;;  %v742_v19 = vld [vmem:[#allocation2 + $0x42] sm:$0xff] }
  0xea   :  { %v219_v42 = vadd.f32 %v6930_v41, %v8283_v17  ;;  %v210_v43 = vpop.f32.mrb[9].mxu0  ;;  %6957 = vmatpush3.bf16.msra.mxu0 %v8010_v16 }
  0xeb   :  { %v211_v44 = vadd.f32 %v8283_v17, %v210_v43  ;;  %v6931_v45 = vpop.f32.mrb[10].mxu0  ;;  %6958 = vmatprep.subr.bf16.mxu0 %v8011_v40  ;;  %v390_v55 = vld [vmem:[#allocation2 + $0x70] sm:$0xff] }
  0xec   :  { %336 = vst.msk [vmem:[#allocation2 + $0xd1] sm:$0xff] %vm241_vm2, %v219_v42  ;;  %v222_v46 = vadd.f32 %v6931_v45, %v8283_v17  ;;  %v213_v47 = vpop.f32.mrb[11].mxu0  ;;  %v388_v49 = vld [vmem:[#allocation2 + $0x50] sm:$0xff]  ;;  %v1111_v42 = vpack.c.bf16 %v564_v30, %v563_v32  ;;  %v568_v45 = vld [vmem:[#allocation2 + $0xa1] sm:$0xff] }
  0xed   :  { %334 = vst.msk [vmem:[#allocation2 + $0xb1] sm:$0xff] %vm241_vm2, %v211_v44  ;;  %v214_v51 = vadd.f32 %v8283_v17, %v213_v47  ;;  %v8332_v52 = vpack.c.bf16 %v388_v49, %v8322_v48  ;;  %v8334_v53 = vld [vmem:[#allocation2 + $0x80] sm:$0xff]  ;;  %v565_v31 = vld [vmem:[#allocation2 + $0x51] sm:$0xff]  ;;  %v347_v32 = vld [vmem:[%s10081_s1 + $0x28] sm:$0xff] }
  0xee   :  { %337 = vst.msk [vmem:[#allocation2 + $0xe1] sm:$0xff] %vm241_vm2, %v222_v46  ;;  %v389_v54 = vld [vmem:[#allocation2 + $0x60] sm:$0xff]  ;;  %6959 = vmatpush3.bf16.msra.mxu0 %v8011_v40  ;;  %v935_v58 = vpack.c.bf16 %v8334_v53, %v390_v55  ;;  %v8015_v40 = vld [vmem:[%s10078_s4 + $0x28] sm:$0xff]   ;;  %v8393_v41 = vpack.c.bf16 %v565_v31, %v564_v30  ;;  %v743_v20 = vld [vmem:[#allocation2 + $0x52] sm:$0xff] }
  0xef   :  { %335 = vst.msk [vmem:[#allocation2 + $0xc1] sm:$0xff] %vm241_vm2, %v214_v51  ;;  %6944 = vmatprep.mubr.msk.bf16.mxu0 %vm241_vm2, %v8332_v52  ;;  %v8340_v56 = vpack.c.bf16 %v390_v55, %v389_v54  ;;  %v934_v57 = vpack.c.bf16 %v389_v54, %v388_v49  ;;  %6976 = vmatprep.subr.bf16.mxu0 %v8327_v50  ;;  %v1099_v33 = vld [vmem:[#allocation2 + $0x61] sm:$0xff]  ;;  %v567_v49 = vld [vmem:[#allocation2 + $0x71] sm:$0xff] }
  0xf0   :  { %v1112_v43 = vpack.c.bf16 %v1099_v33, %v565_v31  ;;  %v8405_v44 = vld [vmem:[%s10078_s4 + $0x60] sm:$0xff]   ;;  %v8409_v54 = vpack.c.bf16 %v567_v49, %v1099_v33  ;;  %v348_v33 = vld [vmem:[%s10081_s1 + $0x30] sm:$0xff]  ;;  %364 = vst.msk [vmem:[#allocation3 + $0x61] sm:$0xff] %vm283_vm4, %v347_v32 }
  0xf1   :  { %v6934_v60 = vpop.f32.mrb[12].mxu0  ;;  %6945 = vmatmul.mubr.msk.bf16.gmra.mrb[20].mxu0 %vm241_vm2, %v8340_v56  ;;  %7004 = vmatprep.mubr.msk.bf16.mxu1 %vm241_vm2, %v934_v57  ;;  %v8407_v47 = vld [vmem:[#allocation2 + $0x81] sm:$0xff]  ;;  %365 = vst.msk [vmem:[#allocation3 + $0x71] sm:$0xff] %vm283_vm4, %v348_v33 }
  0xf2   :  { %v235_v61 = vadd.f32 %v6934_v60, %v8283_v17  ;;  %v226_v62 = vpop.f32.mrb[13].mxu0  ;;  %7005 = vmatmul.mubr.msk.bf16.vlgmr.msra.gmra.mrb[0].mxu1 %vm241_vm2, %v935_v58  ;;  %v1113_v57 = vpack.c.bf16 %v8407_v47, %v567_v49  ;;  %v346_v30 = vld [vmem:[%s10081_s1 + $0x20] sm:$0xff] }
  0xf3   :  { %v227_v0 = vadd.f32 %v8283_v17, %v226_v62  ;;  %7017 = vmatpush3.bf16.msra.mxu1 %v8274_v15  ;;  %v6935_v1 = vpop.f32.mrb[14].mxu0  ;;  %v394_v11 = vld [vmem:[#allocation2 + $0xd0] sm:$0xff]  ;;  %363 = vst.msk [vmem:[#allocation3 + $0x51] sm:$0xff] %vm283_vm4, %v346_v30  ;;  %v1993_v33 = vld [vmem:[#allocation3 + $0xa0] sm:$0xff] }
  0xf4   :  { %340 = vst.msk [vmem:[#allocation2 + $0x111] sm:$0xff] %vm241_vm2, %v235_v61  ;;  %v238_v2 = vadd.f32 %v6935_v1, %v8283_v17  ;;  %v229_v3 = vpop.f32.mrb[15].mxu0  ;;  %v392_v4 = vld [vmem:[#allocation2 + $0xb0] sm:$0xff]  ;;  %7018 = vmatprep.subr.bf16.mxu1 %v8009_v59 }
  0xf5   :  { %338 = vst.msk [vmem:[#allocation2 + $0xf1] sm:$0xff] %vm241_vm2, %v227_v0  ;;  %v230_v6 = vadd.f32 %v8283_v17, %v229_v3  ;;  %v403_v7 = vpack.c.bf16 %v392_v4, %v391_v63  ;;  %v927_v8 = vld [vmem:[#allocation2 + $0xe0] sm:$0xff]  ;;  %v569_v46 = vld [vmem:[#allocation2 + $0xb1] sm:$0xff] }
  0xf6   :  { %341 = vst.msk [vmem:[#allocation2 + $0x121] sm:$0xff] %vm241_vm2, %v238_v2  ;;  %v393_v9 = vld [vmem:[#allocation2 + $0xc0] sm:$0xff]  ;;  %v937_v16 = vpack.c.bf16 %v927_v8, %v394_v11  ;;  %v580_v55 = vpack.c.bf16 %v569_v46, %v568_v45  ;;  %v571_v60 = vld [vmem:[#allocation2 + $0xd1] sm:$0xff] }
  0xf7   :  { %339 = vst.msk [vmem:[#allocation2 + $0x101] sm:$0xff] %vm241_vm2, %v230_v6  ;;  %6948 = vmatprep.mubr.msk.bf16.mxu0 %vm241_vm2, %v403_v7  ;;  %v8364_v12 = vpack.c.bf16 %v394_v11, %v393_v9  ;;  %v936_v15 = vpack.c.bf16 %v393_v9, %v392_v4  ;;  %7019 = vmatpush3.bf16.msra.mxu1 %v8009_v59  ;;  %v1103_v51 = vld [vmem:[#allocation2 + $0xc1] sm:$0xff]  ;;  %v739_v3 = vld [vmem:[#allocation2 + $0x12] sm:$0xff] }
  0xf8   :  { %7036 = vmatprep.subr.bf16.mxu1 %v8012_v5  ;;  %v572_v58 = vld [vmem:[#allocation2 + $0xe1] sm:$0xff]  ;;  %v8419_v62 = vpack.c.bf16 %v571_v60, %v1103_v51  ;;  %v745_v45 = vld [vmem:[#allocation2 + $0x72] sm:$0xff] }
  0xf9   :  { %6949 = vmatmul.mubr.msk.bf16.gmra.mrb[24].mxu0 %vm241_vm2, %v8364_v12  ;;  %7008 = vmatprep.mubr.msk.bf16.mxu1 %vm241_vm2, %v936_v15  ;;  %v1115_v0 = vpack.c.bf16 %v572_v58, %v571_v60  ;;  %v738_v2 = vld [vmem:[#allocation2 + $0x2] sm:$0xff]  ;;  %v8024_v30 = vld [vmem:[%s10080_s5 + $0x10] sm:$0xff]  }
  0xfa   :  { %7009 = vmatmul.mubr.msk.bf16.gmra.mrb[4].mxu1 %vm241_vm2, %v937_v16  ;;  %v1273_v6 = vld [vmem:[#allocation2 + $0x22] sm:$0xff]  ;;  %v8725_v32 = vld [vmem:[#allocation3 + $0x70] sm:$0xff] }
  0xfb   :  { %v398_v23 = vld [vmem:[#allocation2 + $0x110] sm:$0xff]  ;;  %v342_v11 = vld [vmem:[%s10081_s1] sm:$0xff]  ;;  %v1288_v15 = vpack.c.bf16 %v1273_v6, %v739_v3  ;;  %v343_v16 = vld [vmem:[%s10081_s1 + $0x8] sm:$0xff] }
  0xfc   :  { %v396_v17 = vld [vmem:[#allocation2 + $0xf0] sm:$0xff]  ;;  %359 = vst.msk [vmem:[#allocation3 + $0x11] sm:$0xff] %vm283_vm4, %v342_v11  ;;  %360 = vst.msk [vmem:[#allocation3 + $0x21] sm:$0xff] %vm283_vm4, %v343_v16  ;;  %v932_v16 = vpack.c.bf16 %v8303_v37, %v8297_v34  ;;  %v8020_v34 = vld [vmem:[%s10078_s4 + $0x80] sm:$0xff]  }
  0xfd   :  { %v8370_v18 = vpack.c.bf16 %v396_v17, %v927_v8  ;;  %v8372_v21 = vld [vmem:[#allocation2 + $0x120] sm:$0xff]  ;;  %v573_v59 = vld [vmem:[#allocation2 + $0xf1] sm:$0xff]  ;;  %v754_v8 = vpack.c.bf16 %v739_v3, %v738_v2 }
  0xfe   :  { %v397_v22 = vld [vmem:[#allocation2 + $0x100] sm:$0xff]  ;;  %v939_v28 = vpack.c.bf16 %v8372_v21, %v398_v23  ;;  %v8421_v63 = vpack.c.bf16 %v573_v59, %v572_v58  ;;  %v751_v58 = vld [vmem:[#allocation2 + $0xf2] sm:$0xff] }
  0xff   :  { %6952 = vmatprep.mubr.msk.bf16.mxu0 %vm241_vm2, %v8370_v18  ;;  %v8376_v25 = vpack.c.bf16 %v398_v23, %v397_v22  ;;  %v938_v26 = vpack.c.bf16 %v397_v22, %v396_v17  ;;  %v1107_v61 = vld [vmem:[#allocation2 + $0x101] sm:$0xff]  ;;  %v344_v17 = vld [vmem:[%s10081_s1 + $0x10] sm:$0xff]  ;;  %v353_v2 = vld [vmem:[%s10081_s1 + $0x58] sm:$0xff] }
 0x100   :  { %v1116_v1 = vpack.c.bf16 %v1107_v61, %v573_v59  ;;  %v8429_v4 = vld [vmem:[#allocation2 + $0x121] sm:$0xff]  ;;  %361 = vst.msk [vmem:[#allocation3 + $0x31] sm:$0xff] %vm283_vm4, %v344_v17  ;;  %v741_v22 = vld [vmem:[#allocation2 + $0x32] sm:$0xff]  ;;  %370 = vst.msk [vmem:[#allocation3 + $0xe1] sm:$0xff] %vm283_vm4, %v353_v2 }
 0x101   :  { %6953 = vmatmul.mubr.msk.bf16.gmra.mrb[28].mxu0 %vm241_vm2, %v8376_v25  ;;  %7012 = vmatprep.mubr.msk.bf16.mxu1 %vm241_vm2, %v938_v26  ;;  %v1277_v23 = vld [vmem:[#allocation2 + $0x62] sm:$0xff]  ;;  %v8531_v24 = vpack.c.bf16 %v741_v22, %v1273_v6  ;;  %v8533_v26 = vpack.c.bf16 %v743_v20, %v742_v19  ;;  %v749_v59 = vld [vmem:[#allocation2 + $0xd2] sm:$0xff] }
 0x102   :  { %6960 = vmatprep.mubr.msk.bf16.mxu0 %vm241_vm2, %v576_v27  ;;  %7013 = vmatmul.mubr.msk.bf16.gmra.mrb[8].mxu1 %vm241_vm2, %v939_v28  ;;  %v1289_v27 = vpack.c.bf16 %v742_v19, %v741_v22  ;;  %v8017_v28 = vld [vmem:[%s10078_s4 + $0x68] sm:$0xff]   ;;  %v1290_v31 = vpack.c.bf16 %v1277_v23, %v743_v20  ;;  %v354_v3 = vld [vmem:[%s10081_s1 + $0x60] sm:$0xff]  ;;  %v753_v11 = vld [vmem:[#allocation2 + $0x112] sm:$0xff]  ;;  %v933_v19 = vpack.c.bf16 %v8322_v48, %v8305_v38 }
 0x103   :  { %7020 = vmatprep.mubr.msk.bf16.mxu1 %vm241_vm2, %v1110_v29  ;;  %v345_v29 = vld [vmem:[%s10081_s1 + $0x18] sm:$0xff]  ;;  %v1285_v60 = vld [vmem:[#allocation2 + $0x102] sm:$0xff]  ;;  %371 = vst.msk [vmem:[#allocation3 + $0xf1] sm:$0xff] %vm283_vm4, %v354_v3  ;;  %v1458_v37 = vld [vmem:[#allocation2 + $0x90] sm:$0xff] }
 0x104   :  { %362 = vst.msk [vmem:[#allocation3 + $0x41] sm:$0xff] %vm283_vm4, %v345_v29  ;;  %v355_v6 = vld [vmem:[%s10081_s1 + $0x68] sm:$0xff]  ;;  %v8019_v20 = vld [vmem:[%s10078_s4 + $0x78] sm:$0xff]   ;;  %v1470_v38 = vpack.c.bf16 %v1458_v37, %v8334_v53  ;;  %v8022_v53 = vld [vmem:[%s10080_s5] sm:$0xff]  }
 0x105   :  { %372 = vst.msk [vmem:[#allocation3 + $0x101] sm:$0xff] %vm283_vm4, %v355_v6  ;;  %v8025_v3 = vld [vmem:[%s10080_s5 + $0x18] sm:$0xff]  }
 0x106   :  { %v8796_v6 = vld [vmem:[#allocation3 + $0x71] sm:$0xff] }
 0x109   :  { %6961 = vmatmul.mubr.msk.bf16.vlgmr.msra.gmra.mrb[16].mxu0 %vm241_vm2, %v8388_v36 }
 0x10a   :  { %6964 = vmatprep.mubr.msk.bf16.mxu0 %vm241_vm2, %v8393_v41  ;;  %7021 = vmatmul.mubr.msk.bf16.vlgmr.msra.gmra.mrb[12].mxu1 %vm241_vm2, %v1111_v42  ;;  %v747_v42 = vld [vmem:[#allocation2 + $0xb2] sm:$0xff] }
 0x10b   :  { %7037 = vmatpush3.bf16.msra.mxu1 %v8012_v5  ;;  %7024 = vmatprep.mubr.msk.bf16.mxu1 %vm241_vm2, %v1112_v43  ;;  %v575_v5 = vld [vmem:[#allocation2 + $0x111] sm:$0xff]  ;;  %v8565_v43 = vld [vmem:[#allocation2 + $0x82] sm:$0xff] }
 0x10c   :  { %7038 = vmatprep.subr.bf16.mxu1 %v8013_v35  ;;  %6977 = vmatpush3.bf16.msra.mxu0 %v8327_v50  ;;  %v1114_v50 = vpack.c.bf16 %v1103_v51, %v569_v46  ;;  %v8431_v7 = vpack.c.bf16 %v575_v5, %v1107_v61  ;;  %v1117_v9 = vpack.c.bf16 %v8429_v4, %v575_v5  ;;  %v1281_v46 = vld [vmem:[#allocation2 + $0xc2] sm:$0xff] }
 0x10d   :  { %6978 = vmatprep.subr.bf16.mxu0 %v8015_v40  ;;  %v1291_v51 = vpack.c.bf16 %v8565_v43, %v745_v45  ;;  %v8589_v61 = vpack.c.bf16 %v749_v59, %v1281_v46  ;;  %v1294_v5 = vpack.c.bf16 %v1285_v60, %v751_v58 }
 0x10f   :  { %7039 = vmatpush3.bf16.msra.mxu1 %v8013_v35  ;;  %v8018_v35 = vld [vmem:[%s10078_s4 + $0x70] sm:$0xff]  }
 0x110   :  { %6979 = vmatpush3.bf16.msra.mxu0 %v8015_v40  ;;  %7056 = vmatprep.subr.bf16.mxu1 %v8405_v44  ;;  %v746_v40 = vld [vmem:[#allocation2 + $0xa2] sm:$0xff] }
 0x111   :  { %6965 = vmatmul.mubr.msk.bf16.gmra.mrb[20].mxu0 %vm241_vm2, %v8409_v54  ;;  %6996 = vmatprep.subr.bf16.mxu0 %v8260_v13  ;;  %v758_v49 = vpack.c.bf16 %v747_v42, %v746_v40 }
 0x112   :  { %6968 = vmatprep.mubr.msk.bf16.mxu0 %vm241_vm2, %v580_v55  ;;  %7025 = vmatmul.mubr.msk.bf16.gmra.mrb[0].mxu1 %vm241_vm2, %v1113_v57  ;;  %v1292_v55 = vpack.c.bf16 %v1281_v46, %v747_v42  ;;  %v351_v57 = vld [vmem:[%s10081_s1 + $0x48] sm:$0xff]  ;;  %v8741_v46 = vld [vmem:[#allocation3 + $0xe0] sm:$0xff] }
 0x113   :  { %7028 = vmatprep.mubr.msk.bf16.mxu1 %vm241_vm2, %v1114_v50  ;;  %v352_v50 = vld [vmem:[%s10081_s1 + $0x50] sm:$0xff]  ;;  %368 = vst.msk [vmem:[#allocation3 + $0xc1] sm:$0xff] %vm283_vm4, %v351_v57  ;;  %v2154_v57 = vld [vmem:[#allocation3 + $0x1] sm:$0xff] }
 0x114   :  { %369 = vst.msk [vmem:[#allocation3 + $0xd1] sm:$0xff] %vm283_vm4, %v352_v50  ;;  %v8761_v50 = vld [vmem:[#allocation3 + $0x11] sm:$0xff] }
 0x119   :  { %6969 = vmatmul.mubr.msk.bf16.gmra.mrb[24].mxu0 %vm241_vm2, %v8419_v62 }
 0x11a   :  { %6972 = vmatprep.mubr.msk.bf16.mxu0 %vm241_vm2, %v8421_v63  ;;  %7029 = vmatmul.mubr.msk.bf16.gmra.mrb[4].mxu1 %vm241_vm2, %v1115_v0 }
 0x11b   :  { %7032 = vmatprep.mubr.msk.bf16.mxu1 %vm241_vm2, %v1116_v1 }
 0x121   :  { %6973 = vmatmul.mubr.msk.bf16.gmra.mrb[28].mxu0 %vm241_vm2, %v8431_v7 }
 0x122   :  { %6980 = vmatprep.mubr.msk.bf16.mxu0 %vm241_vm2, %v754_v8  ;;  %7033 = vmatmul.mubr.msk.bf16.gmra.mrb[8].mxu1 %vm241_vm2, %v1117_v9  ;;  %v356_v8 = vld [vmem:[%s10081_s1 + $0x70] sm:$0xff]  ;;  %v8615_v9 = vld [vmem:[#allocation2 + $0x122] sm:$0xff] }
 0x123   :  { %7040 = vmatprep.mubr.msk.bf16.mxu1 %vm241_vm2, %v1288_v15  ;;  %373 = vst.msk [vmem:[#allocation3 + $0x111] sm:$0xff] %vm283_vm4, %v356_v8  ;;  %v761_v15 = vpack.c.bf16 %v753_v11, %v1285_v60  ;;  %v1295_v17 = vpack.c.bf16 %v8615_v9, %v753_v11  ;;  %v8773_v60 = vld [vmem:[#allocation3 + $0x31] sm:$0xff]  ;;  %v2162_v8 = vld [vmem:[#allocation3 + $0xa1] sm:$0xff] }
 0x129   :  { %6981 = vmatmul.mubr.msk.bf16.vlgmr.msra.gmra.mrb[16].mxu0 %vm241_vm2, %v8531_v24 }
 0x12a   :  { %6984 = vmatprep.mubr.msk.bf16.mxu0 %vm241_vm2, %v8533_v26  ;;  %7041 = vmatmul.mubr.msk.bf16.vlgmr.msra.gmra.mrb[12].mxu1 %vm241_vm2, %v1289_v27  ;;  %v8706_v27 = vld [vmem:[#allocation3 + $0x50] sm:$0xff] }
 0x12b   :  { %7057 = vmatpush3.bf16.msra.mxu1 %v8405_v44  ;;  %7044 = vmatprep.mubr.msk.bf16.mxu1 %vm241_vm2, %v1290_v31  ;;  %v8568_v44 = vpack.c.bf16 %v745_v45, %v1277_v23  ;;  %v8700_v23 = vld [vmem:[#allocation3 + $0x20] sm:$0xff]  ;;  %v8739_v45 = vld [vmem:[#allocation3 + $0xd0] sm:$0xff] }
 0x12c   :  { %7058 = vmatprep.subr.bf16.mxu1 %v8017_v28  ;;  %6997 = vmatpush3.bf16.msra.mxu0 %v8260_v13  ;;  %v350_v13 = vld [vmem:[%s10081_s1 + $0x40] sm:$0xff] }
 0x12d   :  { %6998 = vmatprep.subr.bf16.mxu0 %v8267_v14  ;;  %367 = vst.msk [vmem:[#allocation3 + $0xb1] sm:$0xff] %vm283_vm4, %v350_v13  ;;  %v8723_v31 = vld [vmem:[#allocation3 + $0x60] sm:$0xff] }
 0x12e   :  { %v8731_v40 = vpack.c.bf16 %v8725_v32, %v8723_v31  ;;  %v8757_v13 = vld [vmem:[#allocation3 + $0x100] sm:$0xff] }
 0x12f   :  { %7059 = vmatpush3.bf16.msra.mxu1 %v8017_v28 }
 0x130   :  { %6999 = vmatpush3.bf16.msra.mxu0 %v8267_v14  ;;  %7076 = vmatprep.subr.bf16.mxu1 %v8018_v35  ;;  %v750_v14 = vld [vmem:[#allocation2 + $0xe2] sm:$0xff] }
 0x131   :  { %6985 = vmatmul.mubr.msk.bf16.gmra.mrb[20].mxu0 %vm241_vm2, %v8568_v44  ;;  %v8591_v0 = vpack.c.bf16 %v751_v58, %v750_v14  ;;  %v1293_v1 = vpack.c.bf16 %v750_v14, %v749_v59  ;;  %v2170_v58 = vpack.c.bf16 %v8761_v50, %v2154_v57  ;;  %v8771_v59 = vld [vmem:[#allocation3 + $0x21] sm:$0xff] }
 0x132   :  { %6988 = vmatprep.mubr.msk.bf16.mxu0 %vm241_vm2, %v758_v49  ;;  %7045 = vmatmul.mubr.msk.bf16.gmra.mrb[0].mxu1 %vm241_vm2, %v1291_v51  ;;  %v8883_v57 = vld [vmem:[#allocation3 + $0xe2] sm:$0xff] }
 0x133   :  { %7048 = vmatprep.mubr.msk.bf16.mxu1 %vm241_vm2, %v1292_v55  ;;  %v8759_v55 = vld [vmem:[#allocation3 + $0x110] sm:$0xff] }
 0x134   :  { %v8765_v14 = vpack.c.bf16 %v8759_v55, %v8757_v13 }
 0x139   :  { %6989 = vmatmul.mubr.msk.bf16.gmra.mrb[24].mxu0 %vm241_vm2, %v8589_v61 }
 0x13a   :  { %6992 = vmatprep.mubr.msk.bf16.mxu0 %vm241_vm2, %v8591_v0  ;;  %7049 = vmatmul.mubr.msk.bf16.gmra.mrb[4].mxu1 %vm241_vm2, %v1293_v1  ;;  %v8781_v1 = vpack.c.bf16 %v8773_v60, %v8771_v59 }
 0x13b   :  { %7052 = vmatprep.mubr.msk.bf16.mxu1 %vm241_vm2, %v1294_v5  ;;  %v8794_v5 = vld [vmem:[#allocation3 + $0x61] sm:$0xff] }
 0x13c   :  { %v8802_v11 = vpack.c.bf16 %v8796_v6, %v8794_v5 }
 0x141   :  { %6993 = vmatmul.mubr.msk.bf16.gmra.mrb[28].mxu0 %vm241_vm2, %v761_v15 }
 0x142   :  { %7000 = vmatprep.mubr.msk.bf16.mxu0 %vm241_vm2, %v932_v16  ;;  %7053 = vmatmul.mubr.msk.bf16.gmra.mrb[8].mxu1 %vm241_vm2, %v1295_v17  ;;  %v8808_v16 = vld [vmem:[#allocation3 + $0xc1] sm:$0xff]  ;;  %v8810_v17 = vld [vmem:[#allocation3 + $0xd1] sm:$0xff] }
 0x143   :  { %7060 = vmatprep.mubr.msk.bf16.mxu1 %vm241_vm2, %v8311_v39  ;;  %v1466_v39 = vld [vmem:[#allocation2 + $0x130] sm:$0xff] }
 0x144   :  { %v1474_v48 = vpack.c.bf16 %v1466_v39, %v8372_v21  ;;  %v8830_v39 = vld [vmem:[#allocation3 + $0x111] sm:$0xff] }
 0x149   :  { %7001 = vmatmul.mubr.msk.bf16.vlgmr.msra.gmra.mrb[16].mxu0 %vm241_vm2, %v933_v19  ;;  %v8812_v19 = vld [vmem:[#allocation3 + $0xe1] sm:$0xff] }
 0x14a   :  { %7061 = vmatmul.mubr.msk.bf16.vlgmr.msra.gmra.mrb[12].mxu1 %vm241_vm2, %v8332_v52  ;;  %v8021_v52 = vld [vmem:[%s10078_s4 + $0x88] sm:$0xff]  }
 0x14b   :  { %7077 = vmatpush3.bf16.msra.mxu1 %v8018_v35  ;;  %7064 = vmatprep.mubr.msk.bf16.mxu1 %vm241_vm2, %v8340_v56  ;;  %v1636_v56 = vld [vmem:[#allocation2 + $0x91] sm:$0xff] }
 0x14c   :  { %7078 = vmatprep.subr.bf16.mxu1 %v8019_v20  ;;  %v8727_v35 = vld [vmem:[#allocation3 + $0xb0] sm:$0xff] }
 0x14d   :  { %v2005_v42 = vpack.c.bf16 %v8727_v35, %v1993_v33  ;;  %v8879_v33 = vld [vmem:[#allocation3 + $0xc2] sm:$0xff] }
 0x14f   :  { %7079 = vmatpush3.bf16.msra.mxu1 %v8019_v20  ;;  %v8814_v20 = vld [vmem:[#allocation3 + $0xf1] sm:$0xff] }
 0x150   :  { %7096 = vmatprep.subr.bf16.mxu1 %v8020_v34  ;;  %v8822_v37 = vpack.c.bf16 %v8814_v20, %v8812_v19 }
 0x152   :  { %7065 = vmatmul.mubr.msk.bf16.gmra.mrb[0].mxu1 %vm241_vm2, %v1470_v38  ;;  %v8828_v38 = vld [vmem:[#allocation3 + $0x101] sm:$0xff] }
 0x153   :  { %7068 = vmatprep.mubr.msk.bf16.mxu1 %vm241_vm2, %v8364_v12  ;;  %v1648_v12 = vpack.c.bf16 %v1636_v56, %v8407_v47 }
 0x15a   :  { %7069 = vmatmul.mubr.msk.bf16.gmra.mrb[4].mxu1 %vm241_vm2, %v8370_v18  ;;  %v1644_v18 = vld [vmem:[#allocation2 + $0x131] sm:$0xff] }
 0x15b   :  { %7072 = vmatprep.mubr.msk.bf16.mxu1 %vm241_vm2, %v8376_v25  ;;  %v1652_v21 = vpack.c.bf16 %v1644_v18, %v8429_v4  ;;  %v8023_v25 = vld [vmem:[%s10080_s5 + $0x8] sm:$0xff]   ;;  %v1822_v4 = vld [vmem:[#allocation2 + $0x132] sm:$0xff] }
 0x15c   :  { %v1830_v22 = vpack.c.bf16 %v1822_v4, %v8615_v9  ;;  %v8798_v9 = vld [vmem:[#allocation3 + $0xb1] sm:$0xff]  ;;  %v2332_v4 = vld [vmem:[#allocation3 + $0xa2] sm:$0xff] }
 0x15d   :  { %v8844_v18 = vld [vmem:[#allocation3 + $0x32] sm:$0xff] }
 0x162   :  { %7073 = vmatmul.mubr.msk.bf16.gmra.mrb[8].mxu1 %vm241_vm2, %v1474_v48  ;;  %v2324_v48 = vld [vmem:[#allocation3 + $0x2] sm:$0xff] }
 0x163   :  { %7080 = vmatprep.mubr.msk.bf16.mxu1 %vm241_vm2, %v8388_v36  ;;  %v349_v36 = vld [vmem:[%s10081_s1 + $0x38] sm:$0xff] }
 0x164   :  { %366 = vst.msk [vmem:[#allocation3 + $0x81] sm:$0xff] %vm283_vm4, %v349_v36 }
 0x16a   :  { %7081 = vmatmul.mubr.msk.bf16.vlgmr.msra.gmra.mrb[12].mxu1 %vm241_vm2, %v8393_v41  ;;  %v1814_v41 = vld [vmem:[#allocation2 + $0x92] sm:$0xff] }
 0x16b   :  { %7097 = vmatpush3.bf16.msra.mxu1 %v8020_v34  ;;  %7084 = vmatprep.mubr.msk.bf16.mxu1 %vm241_vm2, %v8409_v54  ;;  %v1826_v47 = vpack.c.bf16 %v1814_v41, %v8565_v43  ;;  %v357_v54 = vld [vmem:[%s10081_s1 + $0x78] sm:$0xff]  ;;  %v8737_v43 = vld [vmem:[#allocation3 + $0xc0] sm:$0xff]  ;;  %v8818_v34 = vpack.c.bf16 %v8810_v17, %v8808_v16 }
 0x16c   :  { %7098 = vmatprep.subr.bf16.mxu1 %v8021_v52  ;;  %374 = vst.msk [vmem:[#allocation3 + $0x121] sm:$0xff] %vm283_vm4, %v357_v54  ;;  %v8747_v49 = vpack.c.bf16 %v8739_v45, %v8737_v43  ;;  %v8865_v54 = vld [vmem:[#allocation3 + $0x62] sm:$0xff] }
 0x16f   :  { %7099 = vmatpush3.bf16.msra.mxu1 %v8021_v52  ;;  %v8832_v52 = vld [vmem:[#allocation3 + $0x12] sm:$0xff] }
 0x170   :  { %7116 = vmatprep.subr.bf16.mxu1 %v8022_v53  ;;  %v2340_v56 = vpack.c.bf16 %v8832_v52, %v2324_v48  ;;  %v8901_v48 = vld [vmem:[#allocation3 + $0x112] sm:$0xff] }
 0x172   :  { %7085 = vmatmul.mubr.msk.bf16.gmra.mrb[0].mxu1 %vm241_vm2, %v1648_v12  ;;  %v8842_v12 = vld [vmem:[#allocation3 + $0x22] sm:$0xff] }
 0x173   :  { %7088 = vmatprep.mubr.msk.bf16.mxu1 %vm241_vm2, %v8419_v62  ;;  %v1985_v62 = vld [vmem:[#allocation3] sm:$0xff]  ;;  %v8852_v36 = vpack.c.bf16 %v8844_v18, %v8842_v12 }
 0x17a   :  { %7089 = vmatmul.mubr.msk.bf16.gmra.mrb[4].mxu1 %vm241_vm2, %v8421_v63  ;;  %v8694_v63 = vld [vmem:[#allocation3 + $0x10] sm:$0xff] }
 0x17b   :  { %7092 = vmatprep.mubr.msk.bf16.mxu1 %vm241_vm2, %v8431_v7  ;;  %v2001_v7 = vpack.c.bf16 %v8694_v63, %v1985_v62  ;;  %v8867_v62 = vld [vmem:[#allocation3 + $0x72] sm:$0xff] }
 0x182   :  { %7093 = vmatmul.mubr.msk.bf16.gmra.mrb[8].mxu1 %vm241_vm2, %v1652_v21  ;;  %v8846_v21 = vld [vmem:[#allocation3 + $0x42] sm:$0xff] }
 0x183   :  { %7100 = vmatprep.mubr.msk.bf16.mxu1 %vm241_vm2, %v8531_v24  ;;  %v8702_v24 = vld [vmem:[#allocation3 + $0x30] sm:$0xff] }
 0x184   :  { %v8710_v28 = vpack.c.bf16 %v8702_v24, %v8700_v23 }
 0x18a   :  { %7101 = vmatmul.mubr.msk.bf16.vlgmr.msra.gmra.mrb[12].mxu1 %vm241_vm2, %v8533_v26  ;;  %v8704_v26 = vld [vmem:[#allocation3 + $0x40] sm:$0xff] }
 0x18b   :  { %7117 = vmatpush3.bf16.msra.mxu1 %v8022_v53  ;;  %7104 = vmatprep.mubr.msk.bf16.mxu1 %vm241_vm2, %v8568_v44  ;;  %v8714_v29 = vpack.c.bf16 %v8706_v27, %v8704_v26  ;;  %v8743_v44 = vld [vmem:[#allocation3 + $0xf0] sm:$0xff]  ;;  %v8836_v53 = vpack.c.bf16 %v8830_v39, %v8828_v38 }
 0x18c   :  { %7134 = vmatprep.subr.bf16.mxu1 %v8023_v25  ;;  %v8751_v51 = vpack.c.bf16 %v8743_v44, %v8741_v46 }
 0x192   :  { %7105 = vmatmul.mubr.msk.bf16.gmra.mrb[0].mxu1 %vm241_vm2, %v1826_v47  ;;  %v8026_v47 = vld [vmem:[%s10080_s5 + $0x20] sm:$0xff]  }
 0x193   :  { %7108 = vmatprep.mubr.msk.bf16.mxu1 %vm241_vm2, %v8589_v61  ;;  %v8775_v61 = vld [vmem:[#allocation3 + $0x41] sm:$0xff] }
 0x19a   :  { %7109 = vmatmul.mubr.msk.bf16.gmra.mrb[4].mxu1 %vm241_vm2, %v8591_v0  ;;  %v8777_v0 = vld [vmem:[#allocation3 + $0x51] sm:$0xff] }
 0x19b   :  { %7112 = vmatprep.mubr.msk.bf16.mxu1 %vm241_vm2, %v761_v15  ;;  %v8785_v2 = vpack.c.bf16 %v8777_v0, %v8775_v61  ;;  %v2174_v15 = vpack.c.bf16 %v8798_v9, %v2162_v8 }
 0x1a2   :  { %7113 = vmatmul.mubr.msk.bf16.gmra.mrb[8].mxu1 %vm241_vm2, %v1830_v22  ;;  %v8873_v22 = vpack.c.bf16 %v8867_v62, %v8865_v54 }
 0x1a3   :  { %7118 = vmatprep.mubr.msk.bf16.mxu1 %vm283_vm4, %v2001_v7  ;;  %v8869_v7 = vld [vmem:[#allocation3 + $0xb2] sm:$0xff] }
 0x1a4   :  { %10105 = vst [vmem:[#allocation5_spill] sm:$0xff] %v8873_v22 }
 0x1aa   :  { %7119 = vmatmul.mubr.msk.bf16.vlgmr.msra.gmra.mrb[12].mxu1 %vm283_vm4, %v8710_v28 }
 0x1ab   :  { %7135 = vmatpush3.bf16.msra.mxu1 %v8023_v25  ;;  %7122 = vmatprep.mubr.msk.bf16.mxu1 %vm283_vm4, %v8714_v29  ;;  %v8848_v25 = vld [vmem:[#allocation3 + $0x52] sm:$0xff] }
 0x1ac   :  { %7152 = vmatprep.subr.bf16.mxu1 %v8024_v30  ;;  %v8856_v41 = vpack.c.bf16 %v8848_v25, %v8846_v21 }
 0x1ae   :  { %10104 = vst [vmem:[#allocation4_spill] sm:$0xff] %v8856_v41 }
 0x1b2   :  { %7123 = vmatmul.mubr.msk.bf16.gmra.mrb[0].mxu1 %vm283_vm4, %v8731_v40 }
 0x1b3   :  { %7126 = vmatprep.mubr.msk.bf16.mxu1 %vm283_vm4, %v2005_v42  ;;  %v8881_v42 = vld [vmem:[#allocation3 + $0xd2] sm:$0xff] }
 0x1ba   :  { %7127 = vmatmul.mubr.msk.bf16.gmra.mrb[4].mxu1 %vm283_vm4, %v8747_v49 }
 0x1bb   :  { %7130 = vmatprep.mubr.msk.bf16.mxu1 %vm283_vm4, %v8751_v51 }
 0x1c2   :  { %7131 = vmatmul.mubr.msk.bf16.gmra.mrb[8].mxu1 %vm283_vm4, %v8765_v14 }
 0x1c3   :  { %7136 = vmatprep.mubr.msk.bf16.mxu1 %vm283_vm4, %v2170_v58  ;;  %v8885_v58 = vld [vmem:[#allocation3 + $0xf2] sm:$0xff] }
 0x1c4   :  { %v8893_v8 = vpack.c.bf16 %v8885_v58, %v8883_v57 }
 0x1c6   :  { %10107 = vst [vmem:[#allocation7_spill] sm:$0xff] %v8893_v8 }
 0x1ca   :  { %7137 = vmatmul.mubr.msk.bf16.vlgmr.msra.gmra.mrb[12].mxu1 %vm283_vm4, %v8781_v1 }
 0x1cb   :  { %7153 = vmatpush3.bf16.msra.mxu1 %v8024_v30  ;;  %7140 = vmatprep.mubr.msk.bf16.mxu1 %vm283_vm4, %v8785_v2  ;;  %v2344_v30 = vpack.c.bf16 %v8869_v7, %v2332_v4  ;;  %v2510_v4 = vpack.c.bf16 %v8700_v23, %v8694_v63  ;;  %v8027_v63 = vld [vmem:[%s10080_s5 + $0x28] sm:$0xff]   ;;  %v8929_v23 = vld [vmem:[#allocation3 + $0x80] sm:$0xff] }
 0x1cc   :  { %7170 = vmatprep.subr.bf16.mxu1 %v8025_v3 }
 0x1d2   :  { %7141 = vmatmul.mubr.msk.bf16.gmra.mrb[0].mxu1 %vm283_vm4, %v8802_v11 }
 0x1d3   :  { %7144 = vmatprep.mubr.msk.bf16.mxu1 %vm283_vm4, %v2174_v15  ;;  %v8899_v15 = vld [vmem:[#allocation3 + $0x102] sm:$0xff] }
 0x1da   :  { %7145 = vmatmul.mubr.msk.bf16.gmra.mrb[4].mxu1 %vm283_vm4, %v8818_v34 }
 0x1db   :  { %7148 = vmatprep.mubr.msk.bf16.mxu1 %vm283_vm4, %v8822_v37 }
 0x1e2   :  { %7149 = vmatmul.mubr.msk.bf16.gmra.mrb[8].mxu1 %vm283_vm4, %v8836_v53 }
 0x1e3   :  { %7154 = vmatprep.mubr.msk.bf16.mxu1 %vm283_vm4, %v2340_v56  ;;  %v8905_v56 = vpack.c.bf16 %v8901_v48, %v8899_v15 }
 0x1ea   :  { %7155 = vmatmul.mubr.msk.bf16.vlgmr.msra.gmra.mrb[12].mxu1 %vm283_vm4, %v8852_v36 }
 0x1eb   :  { %7171 = vmatpush3.bf16.msra.mxu1 %v8025_v3  ;;  %7158 = vmatprep.mubr.msk.bf16.mxu1 %vm283_vm4, %v8856_v41  ;;  %v8889_v3 = vpack.c.bf16 %v8881_v42, %v8879_v33  ;;  %v2512_v41 = vpack.c.bf16 %v8723_v31, %v8706_v27  ;;  %v2513_v27 = vpack.c.bf16 %v8929_v23, %v8725_v32 }
 0x1ec   :  { %7188 = vmatprep.subr.bf16.mxu1 %v8026_v47  ;;  %v2516_v32 = vpack.c.bf16 %v8757_v13, %v8743_v44  ;;  %v2680_v44 = vpack.c.bf16 %v8771_v59, %v8761_v50  ;;  %v2681_v13 = vpack.c.bf16 %v8775_v61, %v8773_v60  ;;  %v2684_v59 = vpack.c.bf16 %v8808_v16, %v8798_v9 }
 0x1ed   :  { %10106 = vst [vmem:[#allocation6_spill] sm:$0xff] %v8889_v3  ;;  %v2685_v60 = vpack.c.bf16 %v8812_v19, %v8810_v17  ;;  %v2686_v61 = vpack.c.bf16 %v8828_v38, %v8814_v20  ;;  %v2851_v9 = vpack.c.bf16 %v8846_v21, %v8844_v18  ;;  %v2852_v16 = vpack.c.bf16 %v8865_v54, %v8848_v25  ;;  %v8029_v17 = vld [vmem:[%s10080_s5 + $0x38] sm:$0xff]   ;;  %v2841_v19 = vld [vmem:[#allocation3 + $0x82] sm:$0xff]  ;;  %v3012_v25 = vld [vmem:[#allocation3 + $0x90] sm:$0xff] }
 0x1ee   :  { %v2853_v20 = vpack.c.bf16 %v2841_v19, %v8867_v62  ;;  %v2854_v38 = vpack.c.bf16 %v8879_v33, %v8869_v7  ;;  %v8030_v21 = vld [vmem:[%s10080_s5 + $0x40] sm:$0xff]   ;;  %v3024_v54 = vpack.c.bf16 %v3012_v25, %v8929_v23  ;;  %v3553_v33 = vld [vmem:[%s10082_s13 + $0x8] sm:$0xff] }
 0x1ef   :  { %v3552_v7 = vld [vmem:[%s10082_s13] sm:$0xff] }
 0x1f2   :  { %7159 = vmatmul.mubr.msk.bf16.gmra.mrb[0].mxu1 %vm283_vm4, %v8873_v22 }
 0x1f3   :  { %7162 = vmatprep.mubr.msk.bf16.mxu1 %vm283_vm4, %v2344_v30 }
 0x1fa   :  { %7163 = vmatmul.mubr.msk.bf16.gmra.mrb[4].mxu1 %vm283_vm4, %v8889_v3  ;;  %v2511_v3 = vpack.c.bf16 %v8704_v26, %v8702_v24 }
 0x1fb   :  { %7166 = vmatprep.mubr.msk.bf16.mxu1 %vm283_vm4, %v8893_v8 }
 0x202   :  { %7167 = vmatmul.mubr.msk.bf16.gmra.mrb[8].mxu1 %vm283_vm4, %v8905_v56 }
 0x203   :  { %7172 = vmatprep.mubr.msk.bf16.mxu1 %vm283_vm4, %v2510_v4 }
 0x204   :  { %v8912_v30 = vpop.f32.mrb[20].mxu0 }
 0x205   :  { %v8914_v10 = vpop.f32.mrb[21].mxu0 }
 0x206   :  { %v8916_v8 = vpop.f32.mrb[22].mxu0 }
 0x207   :  { %v8920_v22 = vpop.f32.mrb[23].mxu0 }
 0x20a   :  { %7173 = vmatmul.mubr.msk.bf16.vlgmr.msra.gmra.mrb[12].mxu1 %vm283_vm4, %v2511_v3  ;;  %v2514_v3 = vpack.c.bf16 %v8737_v43, %v8727_v35  ;;  %v8959_v35 = vld [vmem:[#allocation3 + $0x120] sm:$0xff] }
 0x20b   :  { %7189 = vmatpush3.bf16.msra.mxu1 %v8026_v47  ;;  %7176 = vmatprep.mubr.msk.bf16.mxu1 %vm283_vm4, %v2512_v41 }
 0x20c   :  { %v8931_v4 = vpop.f32.mrb[24].mxu0  ;;  %7206 = vmatprep.subr.bf16.mxu1 %v8027_v63 }
 0x20d   :  { %10108 = vst [vmem:[#allocation8_spill] sm:$0xff] %v8931_v4  ;;  %v8933_v24 = vpop.f32.mrb[25].mxu0 }
 0x20e   :  { %10109 = vst [vmem:[#allocation9_spill] sm:$0xff] %v8933_v24  ;;  %v8935_v26 = vpop.f32.mrb[26].mxu0 }
 0x20f   :  { %10110 = vst [vmem:[#allocation10_spill] sm:$0xff] %v8935_v26  ;;  %v8939_v31 = vpop.f32.mrb[27].mxu0  ;;  %v2515_v26 = vpack.c.bf16 %v8741_v46, %v8739_v45  ;;  %v2517_v45 = vpack.c.bf16 %v8959_v35, %v8759_v55  ;;  %v2671_v55 = vld [vmem:[#allocation3 + $0x81] sm:$0xff] }
 0x210   :  { %v2683_v50 = vpack.c.bf16 %v2671_v55, %v8796_v6  ;;  %v2850_v6 = vpack.c.bf16 %v8842_v12, %v8832_v52  ;;  %v2856_v52 = vpack.c.bf16 %v8899_v15, %v8885_v58  ;;  %v2849_v12 = vld [vmem:[#allocation3 + $0x122] sm:$0xff]  ;;  %v3554_v58 = vld [vmem:[%s10082_s13 + $0x10] sm:$0xff]  ;;  %v3555_v15 = vld [vmem:[%s10082_s13 + $0x18] sm:$0xff] }
 0x211   :  { %v2857_v18 = vpack.c.bf16 %v2849_v12, %v8901_v48  ;;  %v9086_v48 = vpack.c.bf16 %v3555_v15, %v3554_v58 }
 0x212   :  { %7177 = vmatmul.mubr.msk.bf16.gmra.mrb[0].mxu1 %vm283_vm4, %v2513_v27 }
 0x213   :  { %7180 = vmatprep.mubr.msk.bf16.mxu1 %vm283_vm4, %v2514_v3 }
 0x214   :  { %v8945_v41 = vpop.f32.mrb[28].mxu0 }
 0x215   :  { %v8947_v47 = vpop.f32.mrb[29].mxu0 }
 0x216   :  { %v8949_v4 = vpop.f32.mrb[30].mxu0 }
 0x217   :  { %v8953_v24 = vpop.f32.mrb[31].mxu0 }
 0x21a   :  { %7181 = vmatmul.mubr.msk.bf16.gmra.mrb[4].mxu1 %vm283_vm4, %v2515_v26  ;;  %v2682_v26 = vpack.c.bf16 %v8794_v5, %v8777_v0  ;;  %v2679_v0 = vld [vmem:[#allocation3 + $0x121] sm:$0xff] }
 0x21b   :  { %7184 = vmatprep.mubr.msk.bf16.mxu1 %vm283_vm4, %v2516_v32  ;;  %v8028_v32 = vld [vmem:[%s10080_s5 + $0x30] sm:$0xff]   ;;  %v2687_v5 = vpack.c.bf16 %v2679_v0, %v8830_v39  ;;  %v2855_v39 = vpack.c.bf16 %v8883_v57, %v8881_v42  ;;  %v9075_v42 = vpack.c.bf16 %v3553_v33, %v3552_v7  ;;  %v10098_v57 = vmov 0.0|0.0  }
 0x21c   :  { %v8961_v43 = vpop.f32.mrb[16].mxu0  ;;  %7532 = vmatprep.subr.bf16.mxu0 %v10098_v57 }
 0x21d   :  { %v8963_v27 = vpop.f32.mrb[17].mxu0  ;;  %7534 = vmatpush3.bf16.msra.mxu0 %v9075_v42 }
 0x21e   :  { %v8965_v3 = vpop.f32.mrb[18].mxu0  ;;  %7535 = vmatprep.subr.bf16.mxu0 %v10098_v57 }
 0x21f   :  { %v8969_v46 = vpop.f32.mrb[19].mxu0 }
 0x221   :  { %7537 = vmatpush3.bf16.msra.mxu0 %v9086_v48 }
 0x222   :  { %7185 = vmatmul.mubr.msk.bf16.gmra.mrb[8].mxu1 %vm283_vm4, %v2517_v45 }
 0x223   :  { %7190 = vmatprep.mubr.msk.bf16.mxu1 %vm283_vm4, %v2680_v44 }
 0x22a   :  { %7191 = vmatmul.mubr.msk.bf16.vlgmr.msra.gmra.mrb[12].mxu1 %vm283_vm4, %v2681_v13 }
 0x22b   :  { %7207 = vmatpush3.bf16.msra.mxu1 %v8027_v63  ;;  %7194 = vmatprep.mubr.msk.bf16.mxu1 %vm283_vm4, %v2682_v26  ;;  %v9095_v63 = vld [vmem:[%s10083_s6] ss:$0 sm:$0xff] }
 0x22c   :  { %7224 = vmatprep.subr.bf16.mxu1 %v8028_v32  ;;  %v7560_v23 = vadd.f32 %v8961_v43, %v9095_v63  ;;  %v7564_v44 = vadd.f32 %v8965_v3, %v9095_v63 }
 0x232   :  { %7195 = vmatmul.mubr.msk.bf16.gmra.mrb[0].mxu1 %vm283_vm4, %v2683_v50 }
 0x233   :  { %7198 = vmatprep.mubr.msk.bf16.mxu1 %vm283_vm4, %v2684_v59 }
 0x23a   :  { %7199 = vmatmul.mubr.msk.bf16.gmra.mrb[4].mxu1 %vm283_vm4, %v2685_v60 }
 0x23b   :  { %7202 = vmatprep.mubr.msk.bf16.mxu1 %vm283_vm4, %v2686_v61  ;;  %v7568_v61 = vadd.f32 %v8912_v30, %v9095_v63 }
 0x242   :  { %7203 = vmatmul.mubr.msk.bf16.gmra.mrb[8].mxu1 %vm283_vm4, %v2687_v5 }
 0x243   :  { %7208 = vmatprep.mubr.msk.bf16.mxu1 %vm283_vm4, %v2850_v6 }
 0x24a   :  { %7209 = vmatmul.mubr.msk.bf16.vlgmr.msra.gmra.mrb[12].mxu1 %vm283_vm4, %v2851_v9  ;;  %v7572_v9 = vadd.f32 %v8916_v8, %v9095_v63 }
 0x24b   :  { %7225 = vmatpush3.bf16.msra.mxu1 %v8028_v32  ;;  %7212 = vmatprep.mubr.msk.bf16.mxu1 %vm283_vm4, %v2852_v16  ;;  %v7566_v32 = vadd.f32 %v9095_v63, %v8969_v46  ;;  %v7570_v46 = vadd.f32 %v9095_v63, %v8914_v10 }
 0x24c   :  { %7242 = vmatprep.subr.bf16.mxu1 %v8029_v17 }
 0x252   :  { %7213 = vmatmul.mubr.msk.bf16.gmra.mrb[0].mxu1 %vm283_vm4, %v2853_v20  ;;  %v7574_v20 = vadd.f32 %v9095_v63, %v8920_v22  ;;  %v10116_v22 = vld [vmem:[#allocation8_spill] sm:$0xff] }
 0x253   :  { %7216 = vmatprep.mubr.msk.bf16.mxu1 %vm283_vm4, %v2854_v38 }
 0x25a   :  { %7217 = vmatmul.mubr.msk.bf16.gmra.mrb[4].mxu1 %vm283_vm4, %v2855_v39 }
 0x25b   :  { %7220 = vmatprep.mubr.msk.bf16.mxu1 %vm283_vm4, %v2856_v52 }
 0x262   :  { %7221 = vmatmul.mubr.msk.bf16.gmra.mrb[8].mxu1 %vm283_vm4, %v2857_v18 }
 0x263   :  { %7226 = vmatprep.mubr.msk.bf16.mxu1 %vm283_vm4, %v8710_v28  ;;  %v3020_v28 = vld [vmem:[#allocation3 + $0x130] sm:$0xff] }
 0x26a   :  { %7227 = vmatmul.mubr.msk.bf16.vlgmr.msra.gmra.mrb[12].mxu1 %vm283_vm4, %v8714_v29  ;;  %v3028_v29 = vpack.c.bf16 %v3020_v28, %v8959_v35  ;;  %v7562_v35 = vadd.f32 %v9095_v63, %v8963_v27 }
 0x26b   :  { %7243 = vmatpush3.bf16.msra.mxu1 %v8029_v17  ;;  %7230 = vmatprep.mubr.msk.bf16.mxu1 %vm283_vm4, %v8731_v40  ;;  %v3182_v40 = vld [vmem:[#allocation3 + $0x91] sm:$0xff] }
 0x26c   :  { %7260 = vmatprep.subr.bf16.mxu1 %v8030_v21 }
 0x272   :  { %7231 = vmatmul.mubr.msk.bf16.gmra.mrb[0].mxu1 %vm283_vm4, %v3024_v54  ;;  %v7576_v54 = vadd.f32 %v10116_v22, %v9095_v63 }
 0x273   :  { %7234 = vmatprep.mubr.msk.bf16.mxu1 %vm283_vm4, %v8747_v49  ;;  %v3194_v49 = vpack.c.bf16 %v3182_v40, %v2671_v55 }
 0x27a   :  { %7235 = vmatmul.mubr.msk.bf16.gmra.mrb[4].mxu1 %vm283_vm4, %v8751_v51  ;;  %v3190_v51 = vld [vmem:[#allocation3 + $0x131] sm:$0xff] }
 0x27b   :  { %7238 = vmatprep.mubr.msk.bf16.mxu1 %vm283_vm4, %v8765_v14  ;;  %v3198_v14 = vpack.c.bf16 %v3190_v51, %v2679_v0 }
 0x282   :  { %7239 = vmatmul.mubr.msk.bf16.gmra.mrb[8].mxu1 %vm283_vm4, %v3028_v29  ;;  %v10117_v29 = vld [vmem:[#allocation9_spill] sm:$0xff] }
 0x283   :  { %7244 = vmatprep.mubr.msk.bf16.mxu1 %vm283_vm4, %v8781_v1  ;;  %v10111_v1 = vld [vmem:[#allocation4_spill] sm:$0xff]  ;;  %v7578_v40 = vadd.f32 %v9095_v63, %v10117_v29 }
 0x28a   :  { %7245 = vmatmul.mubr.msk.bf16.vlgmr.msra.gmra.mrb[12].mxu1 %vm283_vm4, %v8785_v2  ;;  %v10112_v2 = vld [vmem:[#allocation5_spill] sm:$0xff] }
 0x28b   :  { %7261 = vmatpush3.bf16.msra.mxu1 %v8030_v21  ;;  %7248 = vmatprep.mubr.msk.bf16.mxu1 %vm283_vm4, %v8802_v11  ;;  %v3352_v11 = vld [vmem:[#allocation3 + $0x92] sm:$0xff] }
 0x292   :  { %7249 = vmatmul.mubr.msk.bf16.gmra.mrb[0].mxu1 %vm283_vm4, %v3194_v49 }
 0x293   :  { %7252 = vmatprep.mubr.msk.bf16.mxu1 %vm283_vm4, %v8818_v34  ;;  %v3364_v34 = vpack.c.bf16 %v3352_v11, %v2841_v19 }
 0x29a   :  { %7253 = vmatmul.mubr.msk.bf16.gmra.mrb[4].mxu1 %vm283_vm4, %v8822_v37  ;;  %v10113_v37 = vld [vmem:[#allocation6_spill] sm:$0xff] }
 0x29b   :  { %7256 = vmatprep.mubr.msk.bf16.mxu1 %vm283_vm4, %v8836_v53  ;;  %v10114_v53 = vld [vmem:[#allocation7_spill] sm:$0xff] }
 0x2a2   :  { %7257 = vmatmul.mubr.msk.bf16.gmra.mrb[8].mxu1 %vm283_vm4, %v3198_v14  ;;  %v10118_v14 = vld [vmem:[#allocation10_spill] sm:$0xff] }
 0x2a3   :  { %7262 = vmatprep.mubr.msk.bf16.mxu1 %vm283_vm4, %v8852_v36  ;;  %v3360_v36 = vld [vmem:[#allocation3 + $0x132] sm:$0xff] }
 0x2a4   :  { %v3368_v62 = vpack.c.bf16 %v3360_v36, %v2849_v12 }
 0x2aa   :  { %7263 = vmatmul.mubr.msk.bf16.vlgmr.msra.gmra.mrb[12].mxu1 %vm283_vm4, %v10111_v1  ;;  %v7580_v1 = vadd.f32 %v10118_v14, %v9095_v63 }
 0x2ab   :  { %7266 = vmatprep.mubr.msk.bf16.mxu1 %vm283_vm4, %v10112_v2 }
 0x2b2   :  { %7267 = vmatmul.mubr.msk.bf16.gmra.mrb[0].mxu1 %vm283_vm4, %v3364_v34 }
 0x2b3   :  { %7270 = vmatprep.mubr.msk.bf16.mxu1 %vm283_vm4, %v10113_v37  ;;  %v7582_v37 = vadd.f32 %v9095_v63, %v8939_v31  ;;  %v7584_v31 = vadd.f32 %v8945_v41, %v9095_v63 }
 0x2ba   :  { %7271 = vmatmul.mubr.msk.bf16.gmra.mrb[4].mxu1 %vm283_vm4, %v10114_v53 }
 0x2bb   :  { %7274 = vmatprep.mubr.msk.bf16.mxu1 %vm283_vm4, %v8905_v56  ;;  %v10115_v56 = vmov 0.0  }
 0x2bc   :  { %7286 = vmatprep.mubr.msk.f32.mxu0 %vm8055_vm6, %v10115_v56  ;;  %7289 = vmatprep.subr.mxu0 %v10115_v56 }
 0x2c2   :  { %7275 = vmatmul.mubr.msk.bf16.gmra.mrb[8].mxu1 %vm283_vm4, %v3368_v62 }
 0x37d   :  { %v7264_v45 = vpop.f32.mrb[12].mxu1 }
 0x37e   :  { %v9103_v13 = vadd.f32 %v7560_v23, %v7264_v45  ;;  %v3436_v26 = vpop.f32.mrb[13].mxu1 }
 0x37f   :  { %v9107_v55 = vadd.f32 %v7562_v35, %v3436_v26  ;;  %v7265_v50 = vpop.f32.mrb[14].mxu1  ;;  %v7586_v26 = vadd.f32 %v9095_v63, %v8947_v47 }
 0x380   :  { %v9109_v59 = vadd.f32 %v7564_v44, %v7265_v50  ;;  %v3439_v60 = vpop.f32.mrb[15].mxu1  ;;  %v3518_v5 = vsel %vm241_vm2, %v9103_v13, 0.0 }
 0x381   :  { %v9111_v43 = vadd.f32 %v7566_v32, %v3439_v60  ;;  %v3515_v27 = vsel %vm241_vm2, %v9107_v55, 0.0  ;;  %v7588_v60 = vadd.f32 %v8949_v4, %v9095_v63 }
 0x382   :  { %v3520_v30 = vsel %vm241_vm2, %v9109_v59, 0.0 }
 0x383   :  { %v3516_v3 = vsel %vm241_vm2, %v9111_v43, 0.0 }
 0x384   :  { %v3517_v0 = vadd.f32 %v3516_v3, %v3515_v27 }
 0x385   :  { %v7268_v6 = vpop.f32.mrb[0].mxu1 }
 0x386   :  { %v3519_v16 = vadd.f32 %v3518_v5, %v3517_v0  ;;  %v9125_v17 = vadd.f32 %v7568_v61, %v7268_v6  ;;  %v3452_v19 = vpop.f32.mrb[1].mxu1  ;;  %v7590_v0 = vadd.f32 %v9095_v63, %v8953_v24 }
 0x387   :  { %v9131_v38 = vadd.f32 %v7570_v46, %v3452_v19  ;;  %v7269_v10 = vpop.f32.mrb[2].mxu1 }
 0x388   :  { %v3521_v39 = vadd.f32 %v3520_v30, %v3519_v16  ;;  %v9133_v52 = vadd.f32 %v7572_v9, %v7269_v10  ;;  %v3455_v12 = vpop.f32.mrb[3].mxu1  ;;  %v3526_v49 = vsel %vm241_vm2, %v9125_v17, 0.0 }
 0x389   :  { %v3522_v8 = vsel %vm241_vm2, %v9131_v38, 0.0  ;;  %v9137_v18 = vadd.f32 %v7574_v20, %v3455_v12 }
 0x38a   :  { %v3523_v21 = vadd.f32 %v3522_v8, %v3521_v39  ;;  %v3528_v53 = vsel %vm241_vm2, %v9133_v52, 0.0 }
 0x38b   :  { %v3524_v25 = vsel %vm241_vm2, %v9137_v18, 0.0 }
 0x38c   :  { %v3525_v28 = vadd.f32 %v3524_v25, %v3523_v21 }
 0x38d   :  { %v7272_v51 = vpop.f32.mrb[4].mxu1 }
 0x38e   :  { %v3527_v2 = vadd.f32 %v3526_v49, %v3525_v28  ;;  %v9149_v11 = vadd.f32 %v7576_v54, %v7272_v51  ;;  %v3468_v34 = vpop.f32.mrb[5].mxu1  ;;  %v9196_v28 = vld [vmem:[%s10084_s14] sm:$0xff]  ;;  %v3704_v51 = vlaneseq }
 0x38f   :  { %v9155_v36 = vadd.f32 %v7578_v40, %v3468_v34  ;;  %v7273_v62 = vpop.f32.mrb[6].mxu1 }
 0x390   :  { %v3529_v7 = vadd.f32 %v3528_v53, %v3527_v2  ;;  %v9157_v33 = vadd.f32 %v7580_v1, %v7273_v62  ;;  %v3471_v58 = vpop.f32.mrb[7].mxu1  ;;  %v3534_v32 = vsel %vm241_vm2, %v9149_v11, 0.0  ;;  %v3705_v14 = vshrl.u32 %v3704_v51, 7 }
 0x391   :  { %v3530_v15 = vsel %vm241_vm2, %v9155_v36, 0.0  ;;  %v9161_v23 = vadd.f32 %v7582_v37, %v3471_v58 }
 0x392   :  { %v3531_v35 = vadd.f32 %v3530_v15, %v3529_v7  ;;  %v3536_v41 = vsel %vm241_vm2, %v9157_v33, 0.0  ;;  %v9210_v1 = vsub.s32 0, %v3705_v14 }
 0x393   :  { %v3532_v45 = vsel %vm241_vm2, %v9161_v23, 0.0 }
 0x394   :  { %v3533_v44 = vadd.f32 %v3532_v45, %v3531_v35  ;;  %10119 = vst [vmem:[#allocation4_spill] sm:$0xff] %v9210_v1 }
 0x395   :  { %v7276_v50 = vpop.f32.mrb[8].mxu1 }
 0x396   :  { %v3535_v27 = vadd.f32 %v3534_v32, %v3533_v44  ;;  %v9173_v3 = vadd.f32 %v7584_v31, %v7276_v50  ;;  %v3484_v61 = vpop.f32.mrb[9].mxu1 }
 0x397   :  { %v9179_v46 = vadd.f32 %v7586_v26, %v3484_v61  ;;  %v7277_v47 = vpop.f32.mrb[10].mxu1 }
 0x398   :  { %v3537_v5 = vadd.f32 %v3536_v41, %v3535_v27  ;;  %v9181_v6 = vadd.f32 %v7588_v60, %v7277_v47  ;;  %v3487_v9 = vpop.f32.mrb[11].mxu1  ;;  %v3542_v63 = vsel %vm241_vm2, %v9173_v3, 0.0 }
 0x399   :  { %v3538_v4 = vsel %vm241_vm2, %v9179_v46, 0.0  ;;  %v9185_v16 = vadd.f32 %v7590_v0, %v3487_v9 }
 0x39a   :  { %v3539_v19 = vadd.f32 %v3538_v4, %v3537_v5  ;;  %v3544_v10 = vsel %vm241_vm2, %v9181_v6, 0.0 }
 0x39b   :  { %v3540_v20 = vsel %vm241_vm2, %v9185_v16, 0.0 }
 0x39c   :  { %v3541_v24 = vadd.f32 %v3540_v20, %v3539_v19 }
 0x39e   :  { %v3543_v30 = vadd.f32 %v3542_v63, %v3541_v24 }
 0x3a0   :  { %v3545_v39 = vadd.f32 %v3544_v10, %v3543_v30 }
 0x3a2   :  { %v3546_v12 = vrot.slane %v3545_v39, 4 }
 0x3a4   :  { %v3547_v8 = vadd.f32 %v3546_v12, %v3545_v39 }
 0x3a6   :  { %v3548_v21 = vrot.slane %v3547_v8, 2 }
 0x3a8   :  { %v3549_v25 = vadd.f32 %v3548_v21, %v3547_v8 }
 0x3aa   :  { %v3550_v22 = vrot.slane %v3549_v25, 1 }
 0x3ac   :  { %v3551_v54 = vadd.f32 %v3550_v22, %v3549_v25 }
 0x3ae   :  { %7287 = vmatmul.mubr.msk.f32.vlgmr.msra.gmra.mrb[32].mxu0 %vm241_vm2, %v3551_v54 }
 0x3af   :  { %7290 = vmatpush3.msra.mxu0 %v9196_v28  ;;  %7291 = vmatprep.mubr.msk.f32.mxu0 %vm8055_vm6, %v10115_v56 }
 0x3b0   :  { %7538 = vmatprep.subr.bf16.mxu0 %v10098_v57 }
 0x481   :  { %v3625_v29 = vpop.f32.mrb[32].mxu0 }
 0x482   :  { %v3629_v40 = vmul.f32 0.001953125, %v3625_v29  ;;  %v7288_v49 = vpop.f32.mrb[33].mxu0 }
 0x484   :  { %7292 = vmatmul.mubr.msk.f32.vlgmr.msra.gmra.mrb[34].mxu0 %vm115_vm1, %v3629_v40 }
 0x485   :  { %7540 = vmatpush3.bf16.msra.mxu0 %v9075_v42  ;;  %7302 = vmatprep.mubr.msk.f32.mxu0 %vm8055_vm6, %v10115_v56 }
 0x486   :  { %7541 = vmatprep.subr.bf16.mxu0 %v10098_v57 }
 0x489   :  { %7543 = vmatpush3.bf16.msra.mxu0 %v9086_v48 }
 0x48a   :  { %7305 = vmatprep.subr.mxu0 %v10115_v56 }
 0x557   :  { %v3700_v2 = vpop.f32.mrb[34].mxu0 }
 0x558   :  { %v3707_v34 = vrot.slane %v3700_v2, %v9210_v1  ;;  %v7293_v37 = vpop.f32.mrb[35].mxu0 }
 0x55a   :  { %v9214_v53 = vsub.f32 %v9107_v55, %v3707_v34  ;;  %v9217_v42 = vsub.f32 %v9111_v43, %v3707_v34  ;;  %v9220_v62 = vsub.f32 %v9103_v13, %v3707_v34  ;;  %v9223_v48 = vsub.f32 %v9109_v59, %v3707_v34 }
 0x55b   :  { %v9230_v15 = vsub.f32 %v9131_v38, %v3707_v34  ;;  %v9235_v43 = vsub.f32 %v9137_v18, %v3707_v34  ;;  %v9242_v31 = vsub.f32 %v9125_v17, %v3707_v34  ;;  %v9248_v18 = vsub.f32 %v9133_v52, %v3707_v34 }
 0x55c   :  { %v3724_v7 = vmul.f32 %v9214_v53, %v9214_v53  ;;  %v3725_v58 = vmul.f32 %v9217_v42, %v9217_v42  ;;  %v3726_v55 = vmul.f32 %v9220_v62, %v9220_v62  ;;  %v3727_v13 = vmul.f32 %v9223_v48, %v9223_v48 }
 0x55d   :  { %v3728_v38 = vmul.f32 %v9230_v15, %v9230_v15  ;;  %v3729_v32 = vmul.f32 %v9235_v43, %v9235_v43  ;;  %v9254_v27 = vsub.f32 %v9155_v36, %v3707_v34  ;;  %v3730_v17 = vmul.f32 %v9242_v31, %v9242_v31 }
 0x55e   :  { %v3740_v59 = vsel %vm241_vm2, %v3724_v7, 0.0  ;;  %v3741_v35 = vsel %vm241_vm2, %v3725_v58, 0.0  ;;  %v3743_v44 = vsel %vm241_vm2, %v3726_v55, 0.0  ;;  %v3745_v50 = vsel %vm241_vm2, %v3727_v13, 0.0 }
 0x55f   :  { %v3742_v45 = vadd.f32 %v3741_v35, %v3740_v59  ;;  %v3747_v61 = vsel %vm241_vm2, %v3728_v38, 0.0  ;;  %v9260_v41 = vsub.f32 %v9161_v23, %v3707_v34  ;;  %v3731_v52 = vmul.f32 %v9248_v18, %v9248_v18 }
 0x560   :  { %v3749_v47 = vsel %vm241_vm2, %v3729_v32, 0.0  ;;  %v9266_v9 = vsub.f32 %v9149_v11, %v3707_v34  ;;  %v3732_v36 = vmul.f32 %v9254_v27, %v9254_v27  ;;  %v3751_v4 = vsel %vm241_vm2, %v3730_v17, 0.0  ;;  %v3851_v17 = vld [vmem:[%s10085_s7] sm:$0x1] }
 0x561   :  { %v3744_v26 = vadd.f32 %v3743_v44, %v3742_v45  ;;  %v9272_v20 = vsub.f32 %v9157_v33, %v3707_v34  ;;  %v3733_v23 = vmul.f32 %v9260_v41, %v9260_v41  ;;  %v3753_v24 = vsel %vm241_vm2, %v3731_v52, 0.0  ;;  %v3948_v52 = vld [vmem:[%s10086_s8] sm:$0x1] }
 0x562   :  { %v9278_v30 = vsub.f32 %v9179_v46, %v3707_v34  ;;  %v3734_v11 = vmul.f32 %v9266_v9, %v9266_v9  ;;  %v3755_v10 = vsel %vm241_vm2, %v3732_v36, 0.0  ;;  %v9284_v12 = vsub.f32 %v9185_v16, %v3707_v34 }
 0x563   :  { %v3746_v60 = vadd.f32 %v3745_v50, %v3744_v26  ;;  %v3735_v33 = vmul.f32 %v9272_v20, %v9272_v20  ;;  %v3757_v8 = vsel %vm241_vm2, %v3733_v23, 0.0  ;;  %v9290_v25 = vsub.f32 %v9173_v3, %v3707_v34 }
 0x564   :  { %v3736_v46 = vmul.f32 %v9278_v30, %v9278_v30  ;;  %v3759_v22 = vsel %vm241_vm2, %v3734_v11, 0.0  ;;  %v9296_v29 = vsub.f32 %v9181_v6, %v3707_v34  ;;  %v3737_v16 = vmul.f32 %v9284_v12, %v9284_v12 }
 0x565   :  { %v3748_v0 = vadd.f32 %v3747_v61, %v3746_v60  ;;  %v3761_v40 = vsel %vm241_vm2, %v3735_v33, 0.0  ;;  %v3738_v51 = vmul.f32 %v9290_v25, %v9290_v25 }
 0x566   :  { %v3763_v3 = vsel %vm241_vm2, %v3736_v46, 0.0  ;;  %v3739_v2 = vmul.f32 %v9296_v29, %v9296_v29  ;;  %v3765_v37 = vsel %vm241_vm2, %v3737_v16, 0.0 }
 0x567   :  { %v3750_v5 = vadd.f32 %v3749_v47, %v3748_v0  ;;  %v3767_v6 = vsel %vm241_vm2, %v3738_v51, 0.0  ;;  %v8031_v47 = vld [vmem:[%s10087_s9] sm:$0xff]  }
 0x568   :  { %v3769_v58 = vsel %vm241_vm2, %v3739_v2, 0.0 }
 0x569   :  { %v3752_v19 = vadd.f32 %v3751_v4, %v3750_v5  ;;  %v8032_v5 = vld [vmem:[%s10087_s9 + $0x8] sm:$0xff]  }
 0x56b   :  { %v3754_v63 = vadd.f32 %v3753_v24, %v3752_v19 }
 0x56d   :  { %v3756_v39 = vadd.f32 %v3755_v10, %v3754_v63 }
 0x56f   :  { %v3758_v21 = vadd.f32 %v3757_v8, %v3756_v39 }
 0x571   :  { %v3760_v54 = vadd.f32 %v3759_v22, %v3758_v21 }
 0x573   :  { %v3762_v49 = vadd.f32 %v3761_v40, %v3760_v54 }
 0x575   :  { %v3764_v14 = vadd.f32 %v3763_v3, %v3762_v49 }
 0x577   :  { %v3766_v7 = vadd.f32 %v3765_v37, %v3764_v14 }
 0x579   :  { %v3768_v34 = vadd.f32 %v3767_v6, %v3766_v7 }
 0x57b   :  { %v3770_v55 = vadd.f32 %v3769_v58, %v3768_v34 }
 0x57d   :  { %v3771_v13 = vrot.slane %v3770_v55, 4 }
 0x57f   :  { %v3772_v59 = vadd.f32 %v3771_v13, %v3770_v55 }
 0x581   :  { %v3773_v35 = vrot.slane %v3772_v59, 2 }
 0x583   :  { %v3774_v45 = vadd.f32 %v3773_v35, %v3772_v59 }
 0x585   :  { %v3775_v38 = vrot.slane %v3774_v45, 1 }
 0x587   :  { %v3776_v44 = vadd.f32 %v3775_v38, %v3774_v45 }
 0x589   :  { %7303 = vmatmul.mubr.msk.f32.vlgmr.msra.gmra.mrb[36].mxu0 %vm241_vm2, %v3776_v44 }
 0x58a   :  { %7306 = vmatpush3.msra.mxu0 %v9196_v28  ;;  %7307 = vmatprep.mubr.msk.f32.mxu0 %vm8055_vm6, %v10115_v56 }
 0x58b   :  { %7310 = vmatprep.subr.mxu0 %v10115_v56 }
 0x65c   :  { %v3846_v26 = vpop.f32.mrb[36].mxu0 }
 0x65d   :  { %v3850_v32 = vmul.f32 0.001953125, %v3846_v26  ;;  %v7304_v50 = vpop.f32.mrb[37].mxu0 }
 0x65f   :  { %v3852_v60 = vadd.f32 1e-05, %v3850_v32 }
 0x661   :  { %8049 = vrsqrt.f32 %v3852_v60 }
 0x66b   :  { %v8050_v61 = vpop.eup %8049 }
 0x66c   :  { %v3854_v0 = vmul.f32 %v8050_v61, %v3851_v17  ;;  %v4082_v17 = vld [vmem:[#allocation2] sm:$0xff] }
 0x66e   :  { %7308 = vmatmul.mubr.msk.f32.vlgmr.msra.gmra.mrb[38].mxu0 %vm115_vm1, %v3854_v0 }
 0x66f   :  { %7311 = vmatpush3.msra.mxu0 %v9196_v28  ;;  %7312 = vmatprep.mubr.msk.f32.mxu0 %vm8055_vm6, %v10115_v56  ;;  %v9334_v28 = vld [vmem:[%s10087_s9 + $0x10] sm:$0xff]  }
 0x670   :  { %7315 = vmatprep.subr.bf16.mxu0 %v8031_v47 }
 0x672   :  { %7313 = vmatmul.mubr.msk.f32.vlgmr.msra.gmra.mrb[40].mxu0 %vm115_vm1, %v3948_v52 }
 0x673   :  { %7316 = vmatpush3.bf16.msra.mxu0 %v8031_v47 }
 0x674   :  { %7317 = vmatprep.subr.bf16.mxu0 %v8032_v5 }
 0x677   :  { %7318 = vmatpush3.bf16.msra.mxu0 %v8032_v5 }
 0x678   :  { %7335 = vmatprep.subr.bf16.mxu0 %v9334_v28 }
 0x741   :  { %v3924_v36 = vpop.f32.mrb[38].mxu0 }
 0x742   :  { %v3931_v4 = vrot.slane %v3924_v36, %v9210_v1  ;;  %v7309_v19 = vpop.f32.mrb[39].mxu0 }
 0x744   :  { %v3932_v23 = vmul.f32 %v3931_v4, %v9214_v53  ;;  %v3933_v24 = vmul.f32 %v3931_v4, %v9217_v42  ;;  %v3934_v63 = vmul.f32 %v3931_v4, %v9220_v62  ;;  %v3935_v11 = vmul.f32 %v3931_v4, %v9223_v48 }
 0x745   :  { %v4018_v10 = vpop.f32.mrb[40].mxu0  ;;  %v3936_v39 = vmul.f32 %v3931_v4, %v9230_v15  ;;  %v3937_v33 = vmul.f32 %v3931_v4, %v9235_v43  ;;  %v3938_v8 = vmul.f32 %v3931_v4, %v9242_v31  ;;  %v3940_v21 = vmul.f32 %v3931_v4, %v9254_v27 }
 0x746   :  { %v4025_v46 = vrot.slane %v4018_v10, %v9210_v1  ;;  %v7314_v22 = vpop.f32.mrb[41].mxu0  ;;  %v3941_v53 = vmul.f32 %v3931_v4, %v9260_v41  ;;  %v3942_v42 = vmul.f32 %v3931_v4, %v9266_v9  ;;  %v3943_v62 = vmul.f32 %v3931_v4, %v9272_v20  ;;  %v8040_v1 = vld [vmem:[%s10087_s9 + $0x48] sm:$0xff]  }
 0x747   :  { %v3944_v48 = vmul.f32 %v3931_v4, %v9278_v30  ;;  %v3945_v54 = vmul.f32 %v3931_v4, %v9284_v12  ;;  %v3946_v15 = vmul.f32 %v3931_v4, %v9290_v25  ;;  %v3939_v43 = vmul.f32 %v3931_v4, %v9248_v18 }
 0x748   :  { %v4026_v31 = vadd.f32 %v4025_v46, %v3932_v23  ;;  %v4027_v16 = vadd.f32 %v4025_v46, %v3933_v24  ;;  %v4028_v27 = vadd.f32 %v4025_v46, %v3934_v63  ;;  %v4029_v40 = vadd.f32 %v4025_v46, %v3935_v11  ;;  %v8034_v63 = vld [vmem:[%s10087_s9 + $0x18] sm:$0xff]  }
 0x749   :  { %v4030_v49 = vadd.f32 %v4025_v46, %v3936_v39  ;;  %v4031_v51 = vadd.f32 %v4025_v46, %v3937_v33  ;;  %v4032_v3 = vadd.f32 %v4025_v46, %v3938_v8  ;;  %v4034_v41 = vadd.f32 %v4025_v46, %v3940_v21 }
 0x74a   :  { %v4042_v14 = vmax.f32 %v4026_v31, 0.0  ;;  %v4043_v9 = vmax.f32 %v4027_v16, 0.0  ;;  %v4044_v2 = vmax.f32 %v4028_v27, 0.0  ;;  %v4045_v20 = vmax.f32 %v4029_v40, 0.0  ;;  %v4445_v31 = vld [vmem:[#allocation2 + $0xa2] sm:$0xff] }
 0x74b   :  { %v4046_v37 = vmax.f32 %v4030_v49, 0.0  ;;  %v4047_v30 = vmax.f32 %v4031_v51, 0.0  ;;  %v4048_v7 = vmax.f32 %v4032_v3, 0.0  ;;  %v4050_v12 = vmax.f32 %v4034_v41, 0.0  ;;  %v8038_v51 = vld [vmem:[%s10087_s9 + $0x38] sm:$0xff]  }
 0x74c   :  { %4058 = vst.msk [vmem:[#allocation2 + $0x11] sm:$0xff] %vm241_vm2, %v4042_v14  ;;  %4059 = vst.msk [vmem:[#allocation2 + $0x21] sm:$0xff] %vm241_vm2, %v4043_v9  ;;  %v4035_v18 = vadd.f32 %v4025_v46, %v3941_v53  ;;  %v4036_v25 = vadd.f32 %v4025_v46, %v3942_v42  ;;  %v4037_v6 = vadd.f32 %v4025_v46, %v3943_v62 }
 0x74d   :  { %4060 = vst.msk [vmem:[#allocation2 + $0x31] sm:$0xff] %vm241_vm2, %v4044_v2  ;;  %4061 = vst.msk [vmem:[#allocation2 + $0x41] sm:$0xff] %vm241_vm2, %v4045_v20  ;;  %v4038_v34 = vadd.f32 %v4025_v46, %v3944_v48  ;;  %v4039_v58 = vadd.f32 %v4025_v46, %v3945_v54  ;;  %v4040_v55 = vadd.f32 %v4025_v46, %v3946_v15 }
 0x74e   :  { %4062 = vst.msk [vmem:[#allocation2 + $0x51] sm:$0xff] %vm241_vm2, %v4046_v37  ;;  %4063 = vst.msk [vmem:[#allocation2 + $0x61] sm:$0xff] %vm241_vm2, %v4047_v30  ;;  %v4033_v13 = vadd.f32 %v4025_v46, %v3939_v43  ;;  %v3947_v59 = vmul.f32 %v3931_v4, %v9296_v29  ;;  %v4051_v35 = vmax.f32 %v4035_v18, 0.0  ;;  %v4052_v45 = vmax.f32 %v4036_v25, 0.0  ;;  %v8035_v43 = vld [vmem:[%s10087_s9 + $0x20] sm:$0xff]  }
 0x74f   :  { %4064 = vst.msk [vmem:[#allocation2 + $0x71] sm:$0xff] %vm241_vm2, %v4048_v7  ;;  %4066 = vst.msk [vmem:[#allocation2 + $0xb1] sm:$0xff] %vm241_vm2, %v4050_v12  ;;  %v4053_v38 = vmax.f32 %v4037_v6, 0.0  ;;  %v4054_v44 = vmax.f32 %v4038_v34, 0.0  ;;  %v4055_v26 = vmax.f32 %v4039_v58, 0.0  ;;  %v4056_v32 = vmax.f32 %v4040_v55, 0.0 }
 0x750   :  { %v4049_v50 = vmax.f32 %v4033_v13, 0.0  ;;  %v4041_v60 = vadd.f32 %v4025_v46, %v3947_v59  ;;  %4067 = vst.msk [vmem:[#allocation2 + $0xc1] sm:$0xff] %vm241_vm2, %v4051_v35  ;;  %4068 = vst.msk [vmem:[#allocation2 + $0xd1] sm:$0xff] %vm241_vm2, %v4052_v45  ;;  %v4267_v25 = vld [vmem:[#allocation2 + $0xa1] sm:$0xff] }
 0x751   :  { %4069 = vst.msk [vmem:[#allocation2 + $0xe1] sm:$0xff] %vm241_vm2, %v4053_v38  ;;  %4070 = vst.msk [vmem:[#allocation2 + $0xf1] sm:$0xff] %vm241_vm2, %v4054_v44  ;;  %v8036_v38 = vld [vmem:[%s10087_s9 + $0x28] sm:$0xff]  }
 0x752   :  { %4071 = vst.msk [vmem:[#allocation2 + $0x101] sm:$0xff] %vm241_vm2, %v4055_v26  ;;  %4072 = vst.msk [vmem:[#allocation2 + $0x111] sm:$0xff] %vm241_vm2, %v4056_v32  ;;  %v4057_v29 = vmax.f32 %v4041_v60, 0.0 }
 0x753   :  { %4065 = vst.msk [vmem:[#allocation2 + $0x81] sm:$0xff] %vm241_vm2, %v4049_v50  ;;  %v9370_v61 = vld [vmem:[#allocation2 + $0x10] sm:$0xff]  ;;  %v9372_v0 = vld [vmem:[#allocation2 + $0x20] sm:$0xff] }
 0x754   :  { %v9374_v52 = vld [vmem:[#allocation2 + $0x30] sm:$0xff]  ;;  %4073 = vst.msk [vmem:[#allocation2 + $0x121] sm:$0xff] %vm241_vm2, %v4057_v29  ;;  %v4098_v47 = vpack.c.bf16 %v9370_v61, %v4082_v17  ;;  %v9382_v36 = vld [vmem:[#allocation2 + $0x40] sm:$0xff] }
 0x755   :  { %v9380_v5 = vpack.c.bf16 %v9374_v52, %v9372_v0  ;;  %v9384_v4 = vld [vmem:[#allocation2 + $0x50] sm:$0xff]  ;;  %v9386_v19 = vld [vmem:[#allocation2 + $0x60] sm:$0xff]  ;;  %v10122_v56 = vpack.c.bf16 %v9382_v36, %v9374_v52 }
 0x756   :  { %v9390_v24 = vld [vmem:[#allocation2 + $0xb0] sm:$0xff]  ;;  %7319 = vmatprep.mubr.msk.bf16.mxu0 %vm241_vm2, %v4098_v47  ;;  %v9404_v33 = vpack.c.bf16 %v9384_v4, %v9382_v36  ;;  %v9406_v8 = vld [vmem:[#allocation2 + $0x21] sm:$0xff] }
 0x757   :  { %v9395_v11 = vld [vmem:[#allocation2 + $0x11] sm:$0xff]  ;;  %v9410_v46 = vld [vmem:[#allocation2 + $0x41] sm:$0xff]  ;;  %7320 = vmatmul.mubr.msk.bf16.vlgmr.msra.gmra.mrb[44].mxu0 %vm241_vm2, %v9380_v5 }
 0x758   :  { %v9408_v21 = vld [vmem:[#allocation2 + $0x31] sm:$0xff]  ;;  %v9414_v22 = vld [vmem:[#allocation2 + $0xc0] sm:$0xff]  ;;  %7336 = vmatpush3.bf16.msra.mxu0 %v9334_v28  ;;  %7323 = vmatprep.mubr.msk.bf16.mxu0 %vm241_vm2, %v9404_v33 }
 0x759   :  { %v9416_v53 = vld [vmem:[#allocation2 + $0xd0] sm:$0xff]  ;;  %v9418_v42 = vld [vmem:[#allocation2 + $0xe0] sm:$0xff]  ;;  %7337 = vmatprep.subr.bf16.mxu0 %v8034_v63  ;;  %v9534_v50 = vpack.c.bf16 %v9408_v21, %v9406_v8 }
 0x75a   :  { %v9427_v54 = vld [vmem:[#allocation2 + $0xf0] sm:$0xff]  ;;  %v9429_v15 = vld [vmem:[#allocation2 + $0x100] sm:$0xff]  ;;  %v10125_v52 = vpack.c.bf16 %v9418_v42, %v9416_v53 }
 0x75b   :  { %v9438_v27 = vld [vmem:[#allocation2 + $0x70] sm:$0xff]  ;;  %v4090_v28 = vld [vmem:[#allocation2 + $0xa0] sm:$0xff]  ;;  %v10126_v36 = vpack.c.bf16 %v9429_v15, %v9427_v54 }
 0x75c   :  { %v9440_v40 = vld [vmem:[#allocation2 + $0x51] sm:$0xff]  ;;  %v9442_v49 = vld [vmem:[#allocation2 + $0x61] sm:$0xff]  ;;  %7338 = vmatpush3.bf16.msra.mxu0 %v8034_v63  ;;  %v9472_v6 = vpack.c.bf16 %v9438_v27, %v9386_v19  ;;  %v4102_v59 = vpack.c.bf16 %v9390_v24, %v4090_v28  ;;  %v9512_v28 = vpack.c.bf16 %v9416_v53, %v9414_v22 }
 0x75d   :  { %v9446_v3 = vld [vmem:[#allocation2 + $0xb1] sm:$0xff]  ;;  %v9448_v41 = vld [vmem:[#allocation2 + $0xc1] sm:$0xff]  ;;  %7355 = vmatprep.subr.bf16.mxu0 %v8035_v43  ;;  %v9541_v13 = vpack.c.bf16 %v9440_v40, %v9410_v46 }
 0x75e   :  { %v9450_v14 = vld [vmem:[#allocation2 + $0xd1] sm:$0xff]  ;;  %v9454_v2 = vld [vmem:[#allocation2 + $0xe1] sm:$0xff]  ;;  %v4279_v30 = vpack.c.bf16 %v9446_v3, %v4267_v25 }
 0x75f   :  { %v9456_v20 = vld [vmem:[#allocation2 + $0xf1] sm:$0xff]  ;;  %v9458_v37 = vld [vmem:[#allocation2 + $0x101] sm:$0xff]  ;;  %7324 = vmatmul.mubr.msk.bf16.gmra.mrb[48].mxu0 %vm241_vm2, %v9472_v6 }
 0x760   :  { %v9462_v7 = vld [vmem:[#allocation2 + $0x12] sm:$0xff]  ;;  %v9464_v12 = vld [vmem:[#allocation2 + $0x22] sm:$0xff]  ;;  %7327 = vmatprep.mubr.msk.bf16.mxu0 %vm241_vm2, %v4102_v59  ;;  %v9516_v59 = vpack.c.bf16 %v9427_v54, %v9418_v42  ;;  %v9566_v9 = vpack.c.bf16 %v9456_v20, %v9454_v2  ;;  %v10132_v53 = vpack.c.bf16 %v9458_v37, %v9456_v20 }
 0x761   :  { %v9474_v34 = vld [vmem:[#allocation2 + $0x32] sm:$0xff]  ;;  %v9476_v58 = vld [vmem:[#allocation2 + $0x42] sm:$0xff] }
 0x762   :  { %v9478_v55 = vld [vmem:[#allocation2 + $0x52] sm:$0xff]  ;;  %v9483_v35 = vld [vmem:[#allocation2 + $0x62] sm:$0xff]  ;;  %v9584_v62 = vpack.c.bf16 %v9474_v34, %v9464_v12 }
 0x763   :  { %v9485_v45 = vld [vmem:[#allocation2 + $0xb2] sm:$0xff]  ;;  %v9491_v44 = vld [vmem:[#allocation2 + $0xc2] sm:$0xff]  ;;  %v9591_v16 = vpack.c.bf16 %v9478_v55, %v9476_v58 }
 0x764   :  { %v9493_v26 = vld [vmem:[#allocation2 + $0xd2] sm:$0xff]  ;;  %v9495_v32 = vld [vmem:[#allocation2 + $0xe2] sm:$0xff]  ;;  %v4457_v10 = vpack.c.bf16 %v9485_v45, %v4445_v31 }
 0x765   :  { %v9500_v60 = vld [vmem:[#allocation2 + $0xf2] sm:$0xff]  ;;  %v9502_v17 = vld [vmem:[#allocation2 + $0x102] sm:$0xff]  ;;  %v10137_v20 = vpack.c.bf16 %v9495_v32, %v9493_v26 }
 0x766   :  { %v9522_v57 = vld [vmem:[#allocation2 + $0x110] sm:$0xff]  ;;  %v4259_v47 = vld [vmem:[#allocation2 + $0x1] sm:$0xff]  ;;  %v9616_v23 = vpack.c.bf16 %v9500_v60, %v9495_v32 }
 0x767   :  { %7328 = vmatmul.mubr.msk.bf16.gmra.mrb[52].mxu0 %vm241_vm2, %v9512_v28  ;;  %v9526_v63 = vpack.c.bf16 %v9522_v57, %v9429_v15  ;;  %v4275_v29 = vpack.c.bf16 %v9395_v11, %v4259_v47  ;;  %v9550_v47 = vld [vmem:[#allocation2 + $0x71] sm:$0xff]  ;;  %v4808_v42 = vld [vmem:[#allocation2 + $0x121] sm:$0xff]  ;;  %v10133_v15 = vpack.c.bf16 %v9464_v12, %v9462_v7 }
 0x768   :  { %7331 = vmatprep.mubr.msk.bf16.mxu0 %vm241_vm2, %v9516_v59  ;;  %v9554_v18 = vpack.c.bf16 %v9550_v47, %v9442_v49  ;;  %v9572_v25 = vld [vmem:[#allocation2 + $0x111] sm:$0xff]  ;;  %10120 = vst [vmem:[#allocation5_spill] sm:$0xff] %v9616_v23 }
 0x769   :  { %v4452_v31 = vld [vmem:[#allocation2 + $0x112] sm:$0xff]  ;;  %v4816_v54 = vpack.c.bf16 %v4808_v42, %v9572_v25 }
 0x76f   :  { %7332 = vmatmul.mubr.msk.bf16.gmra.mrb[56].mxu0 %vm241_vm2, %v9526_v63 }
 0x770   :  { %7339 = vmatprep.mubr.msk.bf16.mxu0 %vm241_vm2, %v4275_v29  ;;  %v8037_v29 = vld [vmem:[%s10087_s9 + $0x30] sm:$0xff]  }
 0x777   :  { %7340 = vmatmul.mubr.msk.bf16.vlgmr.msra.gmra.mrb[44].mxu0 %vm241_vm2, %v9534_v50 }
 0x778   :  { %7356 = vmatpush3.bf16.msra.mxu0 %v8035_v43  ;;  %7343 = vmatprep.mubr.msk.bf16.mxu0 %vm241_vm2, %v9541_v13  ;;  %v9562_v43 = vpack.c.bf16 %v9450_v14, %v9448_v41 }
 0x779   :  { %7357 = vmatprep.subr.bf16.mxu0 %v8036_v38 }
 0x77c   :  { %7358 = vmatpush3.bf16.msra.mxu0 %v8036_v38  ;;  %v4437_v38 = vld [vmem:[#allocation2 + $0x2] sm:$0xff] }
 0x77d   :  { %7375 = vmatprep.subr.bf16.mxu0 %v8037_v29  ;;  %v4453_v48 = vpack.c.bf16 %v9462_v7, %v4437_v38  ;;  %v9600_v38 = vld [vmem:[#allocation2 + $0x72] sm:$0xff]  ;;  %v4986_v7 = vld [vmem:[#allocation2 + $0x122] sm:$0xff] }
 0x77e   :  { %v9604_v39 = vpack.c.bf16 %v9600_v38, %v9483_v35  ;;  %v4994_v12 = vpack.c.bf16 %v4986_v7, %v4452_v31 }
 0x77f   :  { %7344 = vmatmul.mubr.msk.bf16.gmra.mrb[48].mxu0 %vm241_vm2, %v9554_v18 }
 0x780   :  { %7347 = vmatprep.mubr.msk.bf16.mxu0 %vm241_vm2, %v4279_v30  ;;  %v9576_v30 = vpack.c.bf16 %v9572_v25, %v9458_v37  ;;  %v10138_v37 = vpack.c.bf16 %v9502_v17, %v9500_v60 }
 0x787   :  { %7348 = vmatmul.mubr.msk.bf16.gmra.mrb[52].mxu0 %vm241_vm2, %v9562_v43 }
 0x788   :  { %7351 = vmatprep.mubr.msk.bf16.mxu0 %vm241_vm2, %v9566_v9 }
 0x78f   :  { %7352 = vmatmul.mubr.msk.bf16.gmra.mrb[56].mxu0 %vm241_vm2, %v9576_v30 }
 0x790   :  { %7359 = vmatprep.mubr.msk.bf16.mxu0 %vm241_vm2, %v4453_v48  ;;  %v8039_v48 = vld [vmem:[%s10087_s9 + $0x40] sm:$0xff]  }
 0x797   :  { %7360 = vmatmul.mubr.msk.bf16.vlgmr.msra.gmra.mrb[44].mxu0 %vm241_vm2, %v9584_v62 }
 0x798   :  { %7376 = vmatpush3.bf16.msra.mxu0 %v8037_v29  ;;  %7363 = vmatprep.mubr.msk.bf16.mxu0 %vm241_vm2, %v9591_v16  ;;  %v9612_v29 = vpack.c.bf16 %v9493_v26, %v9491_v44  ;;  %v10139_v26 = vmov 0.0|0.0  }
 0x799   :  { %7377 = vmatprep.subr.bf16.mxu0 %v8038_v51 }
 0x79c   :  { %7378 = vmatpush3.bf16.msra.mxu0 %v8038_v51  ;;  %v9623_v51 = vpack.c.bf16 %v4452_v31, %v9502_v17  ;;  %v5721_v17 = vld [vmem:[%s10082_s13 + $0x8] sm:$0xff] }
 0x79d   :  { %7395 = vmatprep.subr.bf16.mxu0 %v8039_v48 }
 0x79f   :  { %7364 = vmatmul.mubr.msk.bf16.gmra.mrb[48].mxu0 %vm241_vm2, %v9604_v39 }
 0x7a0   :  { %7367 = vmatprep.mubr.msk.bf16.mxu0 %vm241_vm2, %v4457_v10  ;;  %v10121_v10 = vpack.c.bf16 %v9372_v0, %v9370_v61  ;;  %v8041_v61 = vld [vmem:[%s10087_s9 + $0x50] sm:$0xff]   ;;  %v4622_v0 = vld [vmem:[#allocation2 + $0x80] sm:$0xff] }
 0x7a7   :  { %7368 = vmatmul.mubr.msk.bf16.gmra.mrb[52].mxu0 %vm241_vm2, %v9612_v29 }
 0x7a8   :  { %7371 = vmatprep.mubr.msk.bf16.mxu0 %vm241_vm2, %v9616_v23  ;;  %v10123_v23 = vpack.c.bf16 %v9386_v19, %v9384_v4  ;;  %v10127_v19 = vpack.c.bf16 %v9406_v8, %v9395_v11  ;;  %v8043_v11 = vld [vmem:[%s10087_s9 + $0x60] sm:$0xff]  }
 0x7a9   :  { %v4800_v8 = vld [vmem:[#allocation2 + $0x81] sm:$0xff] }
 0x7af   :  { %7372 = vmatmul.mubr.msk.bf16.gmra.mrb[56].mxu0 %vm241_vm2, %v9623_v51 }
 0x7b0   :  { %7379 = vmatprep.mubr.msk.bf16.mxu0 %vm241_vm2, %v10121_v10  ;;  %v4634_v10 = vpack.c.bf16 %v4622_v0, %v9438_v27  ;;  %v8044_v27 = vld [vmem:[%s10087_s9 + $0x68] sm:$0xff]  }
 0x7b7   :  { %7380 = vmatmul.mubr.msk.bf16.vlgmr.msra.gmra.mrb[44].mxu0 %vm241_vm2, %v10122_v56  ;;  %v10124_v56 = vpack.c.bf16 %v9414_v22, %v9390_v24  ;;  %v10128_v24 = vpack.c.bf16 %v9410_v46, %v9408_v21  ;;  %v4812_v22 = vpack.c.bf16 %v4800_v8, %v9550_v47  ;;  %v10130_v21 = vpack.c.bf16 %v9448_v41, %v9446_v3  ;;  %v8045_v3 = vld [vmem:[%s10087_s9 + $0x70] sm:$0xff]   ;;  %v4978_v41 = vld [vmem:[#allocation2 + $0x82] sm:$0xff] }
 0x7b8   :  { %7396 = vmatpush3.bf16.msra.mxu0 %v8039_v48  ;;  %7383 = vmatprep.mubr.msk.bf16.mxu0 %vm241_vm2, %v10123_v23  ;;  %v8042_v23 = vld [vmem:[%s10087_s9 + $0x58] sm:$0xff]   ;;  %v10131_v46 = vpack.c.bf16 %v9454_v2, %v9450_v14  ;;  %v4990_v14 = vpack.c.bf16 %v4978_v41, %v9600_v38  ;;  %v10136_v2 = vpack.c.bf16 %v9491_v44, %v9485_v45 }
 0x7b9   :  { %7397 = vmatprep.subr.bf16.mxu0 %v8040_v1  ;;  %v5334_v45 = vld [vmem:[#allocation2 + $0x91] sm:$0xff] }
 0x7ba   :  { %v5346_v44 = vpack.c.bf16 %v5334_v45, %v4800_v8 }
 0x7bc   :  { %7398 = vmatpush3.bf16.msra.mxu0 %v8040_v1  ;;  %v4630_v1 = vld [vmem:[#allocation2 + $0x120] sm:$0xff] }
 0x7bd   :  { %7415 = vmatprep.subr.bf16.mxu0 %v8041_v61  ;;  %v4638_v4 = vpack.c.bf16 %v4630_v1, %v9522_v57  ;;  %v10129_v57 = vpack.c.bf16 %v9442_v49, %v9440_v40  ;;  %v10134_v40 = vpack.c.bf16 %v9476_v58, %v9474_v34  ;;  %v10135_v49 = vpack.c.bf16 %v9483_v35, %v9478_v55  ;;  %v8046_v34 = vld [vmem:[%s10087_s9 + $0x78] sm:$0xff]   ;;  %v8047_v58 = vld [vmem:[%s10087_s9 + $0x80] sm:$0xff]   ;;  %v5156_v55 = vld [vmem:[#allocation2 + $0x90] sm:$0xff] }
 0x7be   :  { %v5168_v35 = vpack.c.bf16 %v5156_v55, %v4622_v0 }
 0x7bf   :  { %7384 = vmatmul.mubr.msk.bf16.gmra.mrb[48].mxu0 %vm241_vm2, %v4634_v10 }
 0x7c0   :  { %7387 = vmatprep.mubr.msk.bf16.mxu0 %vm241_vm2, %v10124_v56 }
 0x7c7   :  { %7388 = vmatmul.mubr.msk.bf16.gmra.mrb[52].mxu0 %vm241_vm2, %v10125_v52 }
 0x7c8   :  { %7391 = vmatprep.mubr.msk.bf16.mxu0 %vm241_vm2, %v10126_v36 }
 0x7cf   :  { %7392 = vmatmul.mubr.msk.bf16.gmra.mrb[56].mxu0 %vm241_vm2, %v4638_v4 }
 0x7d0   :  { %7399 = vmatprep.mubr.msk.bf16.mxu0 %vm241_vm2, %v10127_v19 }
 0x7d7   :  { %7400 = vmatmul.mubr.msk.bf16.vlgmr.msra.gmra.mrb[44].mxu0 %vm241_vm2, %v10128_v24 }
 0x7d8   :  { %7416 = vmatpush3.bf16.msra.mxu0 %v8041_v61  ;;  %7403 = vmatprep.mubr.msk.bf16.mxu0 %vm241_vm2, %v10129_v57 }
 0x7d9   :  { %7417 = vmatprep.subr.bf16.mxu0 %v8042_v23 }
 0x7dc   :  { %7418 = vmatpush3.bf16.msra.mxu0 %v8042_v23 }
 0x7dd   :  { %7435 = vmatprep.subr.bf16.mxu0 %v8043_v11 }
 0x7df   :  { %7404 = vmatmul.mubr.msk.bf16.gmra.mrb[48].mxu0 %vm241_vm2, %v4812_v22 }
 0x7e0   :  { %7407 = vmatprep.mubr.msk.bf16.mxu0 %vm241_vm2, %v10130_v21 }
 0x7e7   :  { %7408 = vmatmul.mubr.msk.bf16.gmra.mrb[52].mxu0 %vm241_vm2, %v10131_v46 }
 0x7e8   :  { %7411 = vmatprep.mubr.msk.bf16.mxu0 %vm241_vm2, %v10132_v53 }
 0x7ef   :  { %7412 = vmatmul.mubr.msk.bf16.gmra.mrb[56].mxu0 %vm241_vm2, %v4816_v54 }
 0x7f0   :  { %7419 = vmatprep.mubr.msk.bf16.mxu0 %vm241_vm2, %v10133_v15 }
 0x7f7   :  { %7420 = vmatmul.mubr.msk.bf16.vlgmr.msra.gmra.mrb[44].mxu0 %vm241_vm2, %v10134_v40 }
 0x7f8   :  { %7436 = vmatpush3.bf16.msra.mxu0 %v8043_v11  ;;  %7423 = vmatprep.mubr.msk.bf16.mxu0 %vm241_vm2, %v10135_v49 }
 0x7f9   :  { %7437 = vmatprep.subr.bf16.mxu0 %v8044_v27 }
 0x7fc   :  { %7438 = vmatpush3.bf16.msra.mxu0 %v8044_v27 }
 0x7fd   :  { %7455 = vmatprep.subr.bf16.mxu0 %v8045_v3 }
 0x7ff   :  { %7424 = vmatmul.mubr.msk.bf16.gmra.mrb[48].mxu0 %vm241_vm2, %v4990_v14 }
 0x800   :  { %7427 = vmatprep.mubr.msk.bf16.mxu0 %vm241_vm2, %v10136_v2 }
 0x807   :  { %7428 = vmatmul.mubr.msk.bf16.gmra.mrb[52].mxu0 %vm241_vm2, %v10137_v20 }
 0x808   :  { %7431 = vmatprep.mubr.msk.bf16.mxu0 %vm241_vm2, %v10138_v37 }
 0x80f   :  { %7432 = vmatmul.mubr.msk.bf16.gmra.mrb[56].mxu0 %vm241_vm2, %v4994_v12 }
 0x810   :  { %7439 = vmatprep.mubr.msk.bf16.mxu0 %vm241_vm2, %v9380_v5  ;;  %v5164_v5 = vld [vmem:[#allocation2 + $0x130] sm:$0xff] }
 0x817   :  { %7440 = vmatmul.mubr.msk.bf16.vlgmr.msra.gmra.mrb[44].mxu0 %vm241_vm2, %v9404_v33  ;;  %v5172_v33 = vpack.c.bf16 %v5164_v5, %v4630_v1 }
 0x818   :  { %7456 = vmatpush3.bf16.msra.mxu0 %v8045_v3  ;;  %7443 = vmatprep.mubr.msk.bf16.mxu0 %vm241_vm2, %v9472_v6  ;;  %v8048_v6 = vld [vmem:[%s10087_s9 + $0x88] sm:$0xff]  }
 0x819   :  { %7457 = vmatprep.subr.bf16.mxu0 %v8046_v34 }
 0x81c   :  { %7458 = vmatpush3.bf16.msra.mxu0 %v8046_v34 }
 0x81d   :  { %7475 = vmatprep.subr.bf16.mxu0 %v8047_v58 }
 0x81f   :  { %7444 = vmatmul.mubr.msk.bf16.gmra.mrb[48].mxu0 %vm241_vm2, %v5168_v35 }
 0x820   :  { %7447 = vmatprep.mubr.msk.bf16.mxu0 %vm241_vm2, %v9512_v28  ;;  %v5722_v28 = vld [vmem:[%s10082_s13 + $0x10] sm:$0xff] }
 0x827   :  { %7448 = vmatmul.mubr.msk.bf16.gmra.mrb[52].mxu0 %vm241_vm2, %v9516_v59  ;;  %v5723_v59 = vld [vmem:[%s10082_s13 + $0x18] sm:$0xff] }
 0x828   :  { %7451 = vmatprep.mubr.msk.bf16.mxu0 %vm241_vm2, %v9526_v63  ;;  %v9798_v47 = vpack.c.bf16 %v5723_v59, %v5722_v28 }
 0x82f   :  { %7452 = vmatmul.mubr.msk.bf16.gmra.mrb[56].mxu0 %vm241_vm2, %v5172_v33 }
 0x830   :  { %7459 = vmatprep.mubr.msk.bf16.mxu0 %vm241_vm2, %v9534_v50 }
 0x837   :  { %7460 = vmatmul.mubr.msk.bf16.vlgmr.msra.gmra.mrb[44].mxu0 %vm241_vm2, %v9541_v13  ;;  %v5342_v13 = vld [vmem:[#allocation2 + $0x131] sm:$0xff] }
 0x838   :  { %7476 = vmatpush3.bf16.msra.mxu0 %v8047_v58  ;;  %7463 = vmatprep.mubr.msk.bf16.mxu0 %vm241_vm2, %v9554_v18  ;;  %v5350_v32 = vpack.c.bf16 %v5342_v13, %v4808_v42  ;;  %v5512_v18 = vld [vmem:[#allocation2 + $0x92] sm:$0xff] }
 0x839   :  { %7477 = vmatprep.subr.bf16.mxu0 %v8048_v6  ;;  %v5524_v50 = vpack.c.bf16 %v5512_v18, %v4978_v41 }
 0x83c   :  { %7478 = vmatpush3.bf16.msra.mxu0 %v8048_v6 }
 0x83d   :  { %7544 = vmatprep.subr.bf16.mxu0 %v10139_v26 }
 0x83f   :  { %7464 = vmatmul.mubr.msk.bf16.gmra.mrb[48].mxu0 %vm241_vm2, %v5346_v44 }
 0x840   :  { %7467 = vmatprep.mubr.msk.bf16.mxu0 %vm241_vm2, %v9562_v43  ;;  %v6488_v43 = vld [vmem:[%s10088_s10] ss:$0 sm:$0xff] }
 0x847   :  { %7468 = vmatmul.mubr.msk.bf16.gmra.mrb[52].mxu0 %vm241_vm2, %v9566_v9  ;;  %v10140_v9 = vld [vmem:[#allocation5_spill] sm:$0xff] }
 0x848   :  { %7471 = vmatprep.mubr.msk.bf16.mxu0 %vm241_vm2, %v9576_v30 }
 0x84f   :  { %7472 = vmatmul.mubr.msk.bf16.gmra.mrb[56].mxu0 %vm241_vm2, %v5350_v32 }
 0x850   :  { %7479 = vmatprep.mubr.msk.bf16.mxu0 %vm241_vm2, %v9584_v62  ;;  %v5520_v62 = vld [vmem:[#allocation2 + $0x132] sm:$0xff] }
 0x851   :  { %v5528_v60 = vpack.c.bf16 %v5520_v62, %v4986_v7 }
 0x857   :  { %7480 = vmatmul.mubr.msk.bf16.vlgmr.msra.gmra.mrb[44].mxu0 %vm241_vm2, %v9591_v16  ;;  %v10141_v16 = vmov 0.0  }
 0x858   :  { %7483 = vmatprep.mubr.msk.bf16.mxu0 %vm241_vm2, %v9604_v39  ;;  %v5720_v39 = vld [vmem:[%s10082_s13] sm:$0xff] }
 0x859   :  { %v9788_v63 = vpack.c.bf16 %v5721_v17, %v5720_v39 }
 0x85b   :  { %7546 = vmatpush3.bf16.msra.mxu0 %v9788_v63 }
 0x85c   :  { %7547 = vmatprep.subr.bf16.mxu0 %v10139_v26 }
 0x85f   :  { %7484 = vmatmul.mubr.msk.bf16.gmra.mrb[48].mxu0 %vm241_vm2, %v5524_v50 }
 0x860   :  { %7487 = vmatprep.mubr.msk.bf16.mxu0 %vm241_vm2, %v9612_v29  ;;  %7549 = vmatpush3.bf16.msra.mxu0 %v9798_v47 }
 0x861   :  { %7506 = vmatprep.subr.mxu0 %v10141_v16 }
 0x867   :  { %7488 = vmatmul.mubr.msk.bf16.gmra.mrb[52].mxu0 %vm241_vm2, %v10140_v9 }
 0x868   :  { %7491 = vmatprep.mubr.msk.bf16.mxu0 %vm241_vm2, %v9623_v51 }
 0x86f   :  { %7492 = vmatmul.mubr.msk.bf16.gmra.mrb[56].mxu0 %vm241_vm2, %v5528_v60 }
 0x870   :  { %7503 = vmatprep.mubr.msk.f32.mxu0 %vm8055_vm6, %v10141_v16 }
 0x92a   :  { %v7481_v25 = vpop.f32.mrb[44].mxu0 }
 0x92b   :  { %v5604_v30 = vpop.f32.mrb[45].mxu0  ;;  %v9807_v31 = vadd.f32 %v7481_v25, %v6488_v43 }
 0x92c   :  { %v9805_v48 = vadd.f32 %v6488_v43, %v5604_v30  ;;  %v7482_v38 = vpop.f32.mrb[46].mxu0 }
 0x92d   :  { %v5607_v29 = vpop.f32.mrb[47].mxu0  ;;  %v9813_v0 = vadd.f32 %v7482_v38, %v6488_v43  ;;  %v5686_v52 = vsel %vm241_vm2, %v9807_v31, 0.0 }
 0x92e   :  { %v9809_v51 = vadd.f32 %v6488_v43, %v5607_v29  ;;  %v5683_v61 = vsel %vm241_vm2, %v9805_v48, 0.0 }
 0x92f   :  { %v5688_v19 = vsel %vm241_vm2, %v9813_v0, 0.0 }
 0x930   :  { %v5684_v10 = vsel %vm241_vm2, %v9809_v51, 0.0 }
 0x931   :  { %v5685_v56 = vadd.f32 %v5684_v10, %v5683_v61 }
 0x932   :  { %v7485_v36 = vpop.f32.mrb[48].mxu0 }
 0x933   :  { %v5687_v1 = vadd.f32 %v5686_v52, %v5685_v56  ;;  %v5620_v4 = vpop.f32.mrb[49].mxu0  ;;  %v9823_v8 = vadd.f32 %v7485_v36, %v6488_v43 }
 0x934   :  { %v9821_v23 = vadd.f32 %v6488_v43, %v5620_v4  ;;  %v7486_v24 = vpop.f32.mrb[50].mxu0 }
 0x935   :  { %v5689_v57 = vadd.f32 %v5688_v19, %v5687_v1  ;;  %v5623_v11 = vpop.f32.mrb[51].mxu0  ;;  %v9829_v53 = vadd.f32 %v7486_v24, %v6488_v43  ;;  %v5694_v15 = vsel %vm241_vm2, %v9823_v8, 0.0 }
 0x936   :  { %v5690_v22 = vsel %vm241_vm2, %v9821_v23, 0.0  ;;  %v9827_v21 = vadd.f32 %v6488_v43, %v5623_v11  ;;  %v10142_v11 = vld [vmem:[#allocation4_spill] sm:$0xff] }
 0x937   :  { %v5691_v46 = vadd.f32 %v5690_v22, %v5689_v57  ;;  %v5696_v3 = vsel %vm241_vm2, %v9829_v53, 0.0 }
 0x938   :  { %v5692_v42 = vsel %vm241_vm2, %v9827_v21, 0.0 }
 0x939   :  { %v5693_v54 = vadd.f32 %v5692_v42, %v5691_v46 }
 0x93a   :  { %v7489_v27 = vpop.f32.mrb[52].mxu0 }
 0x93b   :  { %v5695_v40 = vadd.f32 %v5694_v15, %v5693_v54  ;;  %v5636_v49 = vpop.f32.mrb[53].mxu0  ;;  %v9839_v37 = vadd.f32 %v7489_v27, %v6488_v43 }
 0x93c   :  { %v9837_v41 = vadd.f32 %v6488_v43, %v5636_v49  ;;  %v7490_v14 = vpop.f32.mrb[54].mxu0 }
 0x93d   :  { %v5697_v2 = vadd.f32 %v5696_v3, %v5695_v40  ;;  %v5639_v20 = vpop.f32.mrb[55].mxu0  ;;  %v9845_v58 = vadd.f32 %v7490_v14, %v6488_v43  ;;  %v5702_v5 = vsel %vm241_vm2, %v9839_v37, 0.0 }
 0x93e   :  { %v5698_v7 = vsel %vm241_vm2, %v9837_v41, 0.0  ;;  %v9843_v12 = vadd.f32 %v6488_v43, %v5639_v20 }
 0x93f   :  { %v5699_v34 = vadd.f32 %v5698_v7, %v5697_v2  ;;  %v5704_v44 = vsel %vm241_vm2, %v9845_v58, 0.0 }
 0x940   :  { %v5700_v55 = vsel %vm241_vm2, %v9843_v12, 0.0 }
 0x941   :  { %v5701_v35 = vadd.f32 %v5700_v55, %v5699_v34 }
 0x942   :  { %v7493_v33 = vpop.f32.mrb[56].mxu0 }
 0x943   :  { %v5703_v6 = vadd.f32 %v5702_v5, %v5701_v35  ;;  %v5652_v45 = vpop.f32.mrb[57].mxu0  ;;  %v9855_v9 = vadd.f32 %v7493_v33, %v6488_v43 }
 0x944   :  { %v9853_v13 = vadd.f32 %v6488_v43, %v5652_v45  ;;  %v7494_v32 = vpop.f32.mrb[58].mxu0 }
 0x945   :  { %v5705_v18 = vadd.f32 %v5704_v44, %v5703_v6  ;;  %v5655_v50 = vpop.f32.mrb[59].mxu0  ;;  %v9861_v17 = vadd.f32 %v7494_v32, %v6488_v43  ;;  %v5710_v25 = vsel %vm241_vm2, %v9855_v9, 0.0 }
 0x946   :  { %v5706_v62 = vsel %vm241_vm2, %v9853_v13, 0.0  ;;  %v9859_v60 = vadd.f32 %v6488_v43, %v5655_v50  ;;  %v9872_v43 = vld [vmem:[%s10084_s14] sm:$0xff] }
 0x947   :  { %v5707_v39 = vadd.f32 %v5706_v62, %v5705_v18  ;;  %v5712_v38 = vsel %vm241_vm2, %v9861_v17, 0.0 }
 0x948   :  { %v5708_v28 = vsel %vm241_vm2, %v9859_v60, 0.0 }
 0x949   :  { %v5709_v59 = vadd.f32 %v5708_v28, %v5707_v39 }
 0x94b   :  { %v5711_v30 = vadd.f32 %v5710_v25, %v5709_v59 }
 0x94d   :  { %v5713_v29 = vadd.f32 %v5712_v38, %v5711_v30 }
 0x94f   :  { %v5714_v61 = vrot.slane %v5713_v29, 4 }
 0x951   :  { %v5715_v10 = vadd.f32 %v5714_v61, %v5713_v29 }
 0x953   :  { %v5716_v56 = vrot.slane %v5715_v10, 2 }
 0x955   :  { %v5717_v52 = vadd.f32 %v5716_v56, %v5715_v10 }
 0x957   :  { %v5718_v36 = vrot.slane %v5717_v52, 1 }
 0x959   :  { %v5719_v1 = vadd.f32 %v5718_v36, %v5717_v52 }
 0x95b   :  { %7504 = vmatmul.mubr.msk.f32.vlgmr.msra.gmra.mrb[42].mxu0 %vm241_vm2, %v5719_v1 }
 0x95c   :  { %7507 = vmatpush3.msra.mxu0 %v9872_v43  ;;  %7508 = vmatprep.mubr.msk.f32.mxu0 %vm8055_vm6, %v10141_v16 }
 0x95d   :  { %7550 = vmatprep.subr.bf16.mxu0 %v10139_v26 }
 0xa2e   :  { %v5793_v4 = vpop.f32.mrb[42].mxu0 }
 0xa2f   :  { %v5797_v19 = vmul.f32 0.001953125, %v5793_v4  ;;  %v7505_v24 = vpop.f32.mrb[43].mxu0 }
 0xa31   :  { %7509 = vmatmul.mubr.msk.f32.vlgmr.msra.gmra.mrb[60].mxu0 %vm115_vm1, %v5797_v19 }
 0xa32   :  { %7552 = vmatpush3.bf16.msra.mxu0 %v9788_v63  ;;  %7519 = vmatprep.mubr.msk.f32.mxu0 %vm8055_vm6, %v10141_v16 }
 0xa33   :  { %7553 = vmatprep.subr.bf16.mxu0 %v10139_v26 }
 0xa36   :  { %7555 = vmatpush3.bf16.msra.mxu0 %v9798_v47 }
 0xa37   :  { %7522 = vmatprep.subr.mxu0 %v10141_v16 }
 0xb04   :  { %v5868_v57 = vpop.f32.mrb[60].mxu0 }
 0xb05   :  { %v5875_v22 = vrot.slane %v5868_v57, %v10142_v11  ;;  %v7510_v46 = vpop.f32.mrb[61].mxu0 }
 0xb07   :  { %v9888_v42 = vsub.f32 %v9805_v48, %v5875_v22  ;;  %v9891_v54 = vsub.f32 %v9809_v51, %v5875_v22  ;;  %v9894_v63 = vsub.f32 %v9807_v31, %v5875_v22  ;;  %v9897_v15 = vsub.f32 %v9813_v0, %v5875_v22 }
 0xb08   :  { %v9904_v27 = vsub.f32 %v9821_v23, %v5875_v22  ;;  %v9909_v51 = vsub.f32 %v9827_v21, %v5875_v22  ;;  %v9916_v3 = vsub.f32 %v9823_v8, %v5875_v22  ;;  %v9922_v21 = vsub.f32 %v9829_v53, %v5875_v22 }
 0xb09   :  { %v5892_v26 = vmul.f32 %v9888_v42, %v9888_v42  ;;  %v5893_v47 = vmul.f32 %v9891_v54, %v9891_v54  ;;  %v5894_v48 = vmul.f32 %v9894_v63, %v9894_v63  ;;  %v5895_v31 = vmul.f32 %v9897_v15, %v9897_v15 }
 0xb0a   :  { %v5896_v23 = vmul.f32 %v9904_v27, %v9904_v27  ;;  %v5897_v20 = vmul.f32 %v9909_v51, %v9909_v51  ;;  %v9928_v55 = vsub.f32 %v9837_v41, %v5875_v22  ;;  %v5898_v8 = vmul.f32 %v9916_v3, %v9916_v3 }
 0xb0b   :  { %v5908_v0 = vsel %vm241_vm2, %v5892_v26, 0.0  ;;  %v5909_v40 = vsel %vm241_vm2, %v5893_v47, 0.0  ;;  %v5911_v14 = vsel %vm241_vm2, %v5894_v48, 0.0  ;;  %v5913_v7 = vsel %vm241_vm2, %v5895_v31, 0.0 }
 0xb0c   :  { %v5910_v49 = vadd.f32 %v5909_v40, %v5908_v0  ;;  %v5915_v35 = vsel %vm241_vm2, %v5896_v23, 0.0  ;;  %v9934_v33 = vsub.f32 %v9843_v12, %v5875_v22  ;;  %v5899_v53 = vmul.f32 %v9922_v21, %v9922_v21 }
 0xb0d   :  { %v5917_v6 = vsel %vm241_vm2, %v5897_v20, 0.0  ;;  %v9940_v44 = vsub.f32 %v9839_v37, %v5875_v22  ;;  %v5900_v41 = vmul.f32 %v9928_v55, %v9928_v55  ;;  %v5919_v32 = vsel %vm241_vm2, %v5898_v8, 0.0 }
 0xb0e   :  { %v5912_v2 = vadd.f32 %v5911_v14, %v5910_v49  ;;  %v9946_v50 = vsub.f32 %v9845_v58, %v5875_v22  ;;  %v5901_v12 = vmul.f32 %v9934_v33, %v9934_v33  ;;  %v5921_v62 = vsel %vm241_vm2, %v5899_v53, 0.0 }
 0xb0f   :  { %v9952_v28 = vsub.f32 %v9853_v13, %v5875_v22  ;;  %v5902_v37 = vmul.f32 %v9940_v44, %v9940_v44  ;;  %v5923_v59 = vsel %vm241_vm2, %v5900_v41, 0.0  ;;  %v9958_v30 = vsub.f32 %v9859_v60, %v5875_v22 }
 0xb10   :  { %v5914_v34 = vadd.f32 %v5913_v7, %v5912_v2  ;;  %v5903_v58 = vmul.f32 %v9946_v50, %v9946_v50  ;;  %v5925_v38 = vsel %vm241_vm2, %v5901_v12, 0.0  ;;  %v9964_v61 = vsub.f32 %v9855_v9, %v5875_v22 }
 0xb11   :  { %v5904_v13 = vmul.f32 %v9952_v28, %v9952_v28  ;;  %v5927_v10 = vsel %vm241_vm2, %v5902_v37, 0.0  ;;  %v5891_v52 = vsub.f32 %v9861_v17, %v5875_v22  ;;  %v5905_v60 = vmul.f32 %v9958_v30, %v9958_v30 }
 0xb12   :  { %v5916_v5 = vadd.f32 %v5915_v35, %v5914_v34  ;;  %v5929_v36 = vsel %vm241_vm2, %v5903_v58, 0.0  ;;  %v5906_v4 = vmul.f32 %v9964_v61, %v9964_v61  ;;  %v6019_v34 = vld [vmem:[%s10089_s11] sm:$0x1] }
 0xb13   :  { %v5931_v9 = vsel %vm241_vm2, %v5904_v13, 0.0  ;;  %v5907_v24 = vmul.f32 %v5891_v52, %v5891_v52  ;;  %v5933_v57 = vsel %vm241_vm2, %v5905_v60, 0.0 }
 0xb14   :  { %v5918_v45 = vadd.f32 %v5917_v6, %v5916_v5  ;;  %v5935_v26 = vsel %vm241_vm2, %v5906_v4, 0.0  ;;  %v6116_v5 = vld [vmem:[%s10090_s12] sm:$0x1] }
 0xb15   :  { %v5937_v17 = vsel %vm241_vm2, %v5907_v24, 0.0 }
 0xb16   :  { %v5920_v18 = vadd.f32 %v5919_v32, %v5918_v45 }
 0xb18   :  { %v5922_v39 = vadd.f32 %v5921_v62, %v5920_v18 }
 0xb1a   :  { %v5924_v25 = vadd.f32 %v5923_v59, %v5922_v39 }
 0xb1c   :  { %v5926_v29 = vadd.f32 %v5925_v38, %v5924_v25 }
 0xb1e   :  { %v5928_v56 = vadd.f32 %v5927_v10, %v5926_v29 }
 0xb20   :  { %v5930_v1 = vadd.f32 %v5929_v36, %v5928_v56 }
 0xb22   :  { %v5932_v19 = vadd.f32 %v5931_v9, %v5930_v1 }
 0xb24   :  { %v5934_v46 = vadd.f32 %v5933_v57, %v5932_v19 }
 0xb26   :  { %v5936_v47 = vadd.f32 %v5935_v26, %v5934_v46 }
 0xb28   :  { %v5938_v22 = vadd.f32 %v5937_v17, %v5936_v47 }
 0xb2a   :  { %v5939_v48 = vrot.slane %v5938_v22, 4 }
 0xb2c   :  { %v5940_v31 = vadd.f32 %v5939_v48, %v5938_v22 }
 0xb2e   :  { %v5941_v0 = vrot.slane %v5940_v31, 2 }
 0xb30   :  { %v5942_v40 = vadd.f32 %v5941_v0, %v5940_v31 }
 0xb32   :  { %v5943_v49 = vrot.slane %v5942_v40, 1 }
 0xb34   :  { %v5944_v23 = vadd.f32 %v5943_v49, %v5942_v40 }
 0xb36   :  { %7520 = vmatmul.mubr.msk.f32.vlgmr.msra.gmra.mrb[62].mxu0 %vm241_vm2, %v5944_v23 }
 0xb37   :  { %7523 = vmatpush3.msra.mxu0 %v9872_v43  ;;  %7524 = vmatprep.mubr.msk.f32.mxu0 %vm8055_vm6, %v10141_v16 }
 0xb38   :  { %7527 = vmatprep.subr.mxu0 %v10141_v16 }
 0xc09   :  { %v6014_v14 = vpop.f32.mrb[62].mxu0 }
 0xc0a   :  { %v6018_v2 = vmul.f32 0.001953125, %v6014_v14  ;;  %v7521_v20 = vpop.f32.mrb[63].mxu0 }
 0xc0c   :  { %v6020_v7 = vadd.f32 1e-05, %v6018_v2 }
 0xc0e   :  { %8051 = vrsqrt.f32 %v6020_v7 }
 0xc18   :  { %v8052_v8 = vpop.eup %8051 }
 0xc19   :  { %v6022_v35 = vmul.f32 %v8052_v8, %v6019_v34 }
 0xc1b   :  { %7525 = vmatmul.mubr.msk.f32.vlgmr.msra.gmra.mrb[64].mxu0 %vm115_vm1, %v6022_v35 }
 0xc1c   :  { %7528 = vmatpush3.msra.mxu0 %v9872_v43  ;;  %7529 = vmatprep.mubr.msk.f32.mxu0 %vm8055_vm6, %v10141_v16 }
 0xc1f   :  { %7530 = vmatmul.mubr.msk.f32.vlgmr.msra.gmra.mrb[66].mxu0 %vm115_vm1, %v6116_v5 }
 0xcee   :  { %v6092_v53 = vpop.f32.mrb[64].mxu0 }
 0xcef   :  { %v6099_v6 = vrot.slane %v6092_v53, %v10142_v11  ;;  %v7526_v45 = vpop.f32.mrb[65].mxu0 }
 0xcf1   :  { %v6100_v41 = vmul.f32 %v6099_v6, %v9888_v42  ;;  %v6101_v18 = vmul.f32 %v6099_v6, %v9891_v54  ;;  %v6102_v43 = vmul.f32 %v6099_v6, %v9894_v63  ;;  %v6103_v12 = vmul.f32 %v6099_v6, %v9897_v15 }
 0xcf2   :  { %v6186_v32 = vpop.f32.mrb[66].mxu0  ;;  %v6104_v16 = vmul.f32 %v6099_v6, %v9904_v27  ;;  %v6105_v39 = vmul.f32 %v6099_v6, %v9909_v51  ;;  %v6106_v37 = vmul.f32 %v6099_v6, %v9916_v3  ;;  %v6107_v59 = vmul.f32 %v6099_v6, %v9922_v21 }
 0xcf3   :  { %v7531_v62 = vpop.f32.mrb[67].mxu0  ;;  %v6108_v25 = vmul.f32 %v6099_v6, %v9928_v55  ;;  %v6109_v42 = vmul.f32 %v6099_v6, %v9934_v33  ;;  %v6110_v58 = vmul.f32 %v6099_v6, %v9940_v44  ;;  %v6111_v54 = vmul.f32 %v6099_v6, %v9946_v50 }
 0xcf4   :  { %v6193_v63 = vrot.slane %v6186_v32, %v10142_v11  ;;  %v6112_v15 = vmul.f32 %v6099_v6, %v9952_v28  ;;  %v6113_v27 = vmul.f32 %v6099_v6, %v9958_v30  ;;  %v6114_v51 = vmul.f32 %v6099_v6, %v9964_v61 }
 0xcf5   :  { %v6115_v38 = vmul.f32 %v6099_v6, %v5891_v52 }
 0xcf6   :  { %v6194_v3 = vadd.f32 %v6193_v63, %v6100_v41  ;;  %v6195_v29 = vadd.f32 %v6193_v63, %v6101_v18  ;;  %v6196_v21 = vadd.f32 %v6193_v63, %v6102_v43  ;;  %v6197_v13 = vadd.f32 %v6193_v63, %v6103_v12 }
 0xcf7   :  { %v6198_v55 = vadd.f32 %v6193_v63, %v6104_v16  ;;  %v6199_v10 = vadd.f32 %v6193_v63, %v6105_v39  ;;  %v6200_v33 = vadd.f32 %v6193_v63, %v6106_v37  ;;  %v6201_v56 = vadd.f32 %v6193_v63, %v6107_v59 }
 0xcf8   :  { %v6202_v44 = vadd.f32 %v6193_v63, %v6108_v25  ;;  %v6203_v60 = vadd.f32 %v6193_v63, %v6109_v42  ;;  %v6204_v50 = vadd.f32 %v6193_v63, %v6110_v58  ;;  %v6205_v36 = vadd.f32 %v6193_v63, %v6111_v54 }
 0xcf9   :  { %v6206_v11 = vadd.f32 %v6193_v63, %v6112_v15  ;;  %v6207_v1 = vadd.f32 %v6193_v63, %v6113_v27  ;;  %v6208_v28 = vadd.f32 %v6193_v63, %v6114_v51  ;;  %v6209_v4 = vadd.f32 %v6193_v63, %v6115_v38 }
 0xcfa   :  { %v6210_v30 = vmax.f32 %v6194_v3, 0.0  ;;  %v6211_v9 = vmax.f32 %v6195_v29, 0.0  ;;  %v6212_v61 = vmax.f32 %v6196_v21, 0.0  ;;  %v6213_v52 = vmax.f32 %v6197_v13, 0.0 }
 0xcfb   :  { %v6214_v19 = vmax.f32 %v6198_v55, 0.0  ;;  %v6215_v24 = vmax.f32 %v6199_v10, 0.0  ;;  %v6216_v57 = vmax.f32 %v6200_v33, 0.0  ;;  %v6217_v46 = vmax.f32 %v6201_v56, 0.0 }
 0xcfc   :  { %v6218_v26 = vmax.f32 %v6202_v44, 0.0  ;;  %v6219_v47 = vmax.f32 %v6203_v60, 0.0  ;;  %v6220_v17 = vmax.f32 %v6204_v50, 0.0  ;;  %v6221_v22 = vmax.f32 %v6205_v36, 0.0  ;;  %6226 = vst.msk [vmem:[%s10091_s15] sm:$0xff] %vm241_vm2, %v6210_v30  ;;  %6227 = vst.msk [vmem:[%s10091_s15 + $0x8] sm:$0xff] %vm241_vm2, %v6211_v9 }
 0xcfd   :  { %6228 = vst.msk [vmem:[%s10091_s15 + $0x10] sm:$0xff] %vm241_vm2, %v6212_v61  ;;  %6229 = vst.msk [vmem:[%s10091_s15 + $0x18] sm:$0xff] %vm241_vm2, %v6213_v52  ;;  %v6222_v48 = vmax.f32 %v6206_v11, 0.0  ;;  %v6223_v31 = vmax.f32 %v6207_v1, 0.0  ;;  %v6224_v0 = vmax.f32 %v6208_v28, 0.0  ;;  %v6225_v40 = vmax.f32 %v6209_v4, 0.0 }
 0xcfe   :  { %6230 = vst.msk [vmem:[%s10091_s15 + $0x20] sm:$0xff] %vm241_vm2, %v6214_v19  ;;  %6231 = vst.msk [vmem:[%s10091_s15 + $0x28] sm:$0xff] %vm241_vm2, %v6215_v24 }
 0xcff   :  { %6232 = vst.msk [vmem:[%s10091_s15 + $0x30] sm:$0xff] %vm241_vm2, %v6216_v57  ;;  %6233 = vst.msk [vmem:[%s10091_s15 + $0x38] sm:$0xff] %vm241_vm2, %v6217_v46 }
 0xd00   :  { %6234 = vst.msk [vmem:[%s10091_s15 + $0x40] sm:$0xff] %vm241_vm2, %v6218_v26  ;;  %6235 = vst.msk [vmem:[%s10091_s15 + $0x48] sm:$0xff] %vm241_vm2, %v6219_v47 }
 0xd01   :  { %6236 = vst.msk [vmem:[%s10091_s15 + $0x50] sm:$0xff] %vm241_vm2, %v6220_v17  ;;  %6237 = vst.msk [vmem:[%s10091_s15 + $0x58] sm:$0xff] %vm241_vm2, %v6221_v22 }
 0xd02   :  { %6238 = vst.msk [vmem:[%s10091_s15 + $0x60] sm:$0xff] %vm241_vm2, %v6222_v48  ;;  %6239 = vst.msk [vmem:[%s10091_s15 + $0x68] sm:$0xff] %vm241_vm2, %v6223_v31 }
 0xd03   :  { %6240 = vst.msk [vmem:[%s10091_s15 + $0x70] sm:$0xff] %vm241_vm2, %v6224_v0  ;;  %6241 = vst.msk [vmem:[%s10091_s15 + $0x78] sm:$0xff] %vm241_vm2, %v6225_v40 }

</bundles_post_ra>
